<compile_context>
chip_gen: v7x
topology: tpu7x:2x2x1
jax: 0.10.0
libtpu: 0.0.40
codegen_flags: <defaults>
</compile_context>

<pallas_src>
import jax
import jax.numpy as jnp
from jax import lax
from jax.experimental import pallas as pl
from jax.experimental.pallas import tpu as pltpu

# ----------------------- synthetic "opt" configuration -----------------------
B = 2                                # real batch size (demo)
BT = 8                               # batch tile (sublane tile); raise to 128+ for throughput
B_PAD = max(BT, ((B + BT - 1) // BT) * BT)
E = 128                              # n_src_vocab (entities) -- lane dense
NUM_POS_REL = 4                      # forward relations
N_TRG_VOCAB = 2 * NUM_POS_REL + 1    # fwd + inverse relations + self-loop = 9
V_PAD = 128                          # decoder vocab padded to 128 lanes
JUMP = 3
MAX_SEQ_LEN = JUMP + 1
STEPS = MAX_SEQ_LEN - 1
SRC_LEN = 8
D_MODEL = 16
D_PAD = 128                          # d_model padded to 128 lanes
SRC_PAD_IDX = 0
THR = 1e-20                          # the registered `thr` buffer

# horizontal relation slab: [db_0..db_R-1 | db_0^T..db_R-1^T]
PACK_W = 2 * NUM_POS_REL * E         # 1024 (multiple of 256, MXU friendly)
# known-fact correction capacity (max triples handled per call)
JCAP = 128
CORR_W = 2 * JCAP                    # fwd half | inverse half
assert B_PAD <= JCAP


# ----------------------- fused kernel -----------------------
def _rule_translator_kernel(init_oh_ref, enc_ref, mem0_ref, tgt_ref,
                            emb_ref, wprj_ref, big_ref, sel_ref, ent_ref,
                            scat_ref, stats_ref):
    f32 = jnp.float32
    bf16 = jnp.bfloat16
    vcol = lax.broadcasted_iota(jnp.int32, (BT, V_PAD), 1)
    vcol_f = vcol.astype(f32)

    enc = enc_ref[...]                          # (BT, D_PAD)  f32
    emb_tbl = emb_ref[...]                      # (V_PAD, D_PAD) bf16
    wprj = wprj_ref[...]                        # (D_PAD, V_PAD) bf16
    big = big_ref[...]                          # (E, PACK_W)  bf16 (binary)
    # binary correction matrices: upcast ONCE so the correction stays f32-exact
    sel = sel_ref[...].astype(f32)              # (V_PAD, CORR_W)
    ent = ent_ref[...].astype(f32)              # (E, CORR_W)
    scat = scat_ref[...].astype(f32)            # (CORR_W, E)
    mem0 = mem0_ref[...]                        # (BT, E) f32 one-hot(head)
    tgt = tgt_ref[...]                          # (BT, E) f32 one-hot(tail)

    def decode_probs(oh):
        # one-hot @ embedding table replaces the token gather; synthetic
        # decoder: tanh(emb + pooled enc) -> trg_word_prj -> masked softmax.
        h = jnp.tanh(jnp.dot(oh.astype(bf16), emb_tbl,
                             preferred_element_type=f32) + enc)
        logits = jnp.dot(h.astype(bf16), wprj, preferred_element_type=f32)
        logits = jnp.where(vcol < N_TRG_VOCAB, logits, f32(-1e30))
        e = jnp.exp(logits - jnp.max(logits, axis=-1, keepdims=True))
        return e * pl.reciprocal(jnp.sum(e, axis=-1, keepdims=True), approx=True)

    def argmax_token(p):
        # greedy topk(1): first lane attaining the max (deterministic ties).
        mx = jnp.max(p, axis=-1, keepdims=True)
        tok = jnp.min(jnp.where(p >= mx, vcol_f, f32(V_PAD)),
                      axis=-1, keepdims=True)                 # (BT, 1) f32
        return tok, (vcol_f == tok).astype(f32)

    def walk_step(mem, probs):
        # all 8 relation hops (fwd + transposed) in ONE MXU pass against the
        # horizontal slab; per-block attention scalars via masked lane sums.
        mem_mx = mem.astype(bf16)
        mem_r = mem_mx.astype(f32)               # bf16-rounded memory the MXU sees
        hops = jnp.dot(mem_mx, big, preferred_element_type=f32)   # (BT, PACK_W)

        s_self = jnp.sum(jnp.where(vcol == 2 * NUM_POS_REL, probs, f32(0.0)),
                         axis=-1, keepdims=True)
        added = mem * s_self                      # self-loop uses exact f32 mem
        for k in range(2 * NUM_POS_REL):
            s_k = jnp.sum(jnp.where(vcol == k, probs, f32(0.0)),
                          axis=-1, keepdims=True)
            added = added + hops[:, k * E:(k + 1) * E] * s_k

        # batch-shared known-fact removal as rank-1 corrections:
        #   fwd: subtract probs[:, r_j] * mem[:, h_j] at column t_j
        #   inv: subtract probs[:, r_j+R] * mem[:, t_j] at column h_j
        # (binary selectors, f32 dots -> exact cancellation of the hop terms)
        a = jnp.dot(probs, sel, preferred_element_type=f32)        # (BT, CORR_W)
        m = jnp.dot(mem_r, ent, preferred_element_type=f32)        # (BT, CORR_W)
        corr = jnp.dot(a * m, scat, preferred_element_type=f32)    # (BT, E)
        added = jnp.maximum(added - corr, f32(0.0))

        denom = jnp.maximum(f32(THR), jnp.sum(added, axis=-1, keepdims=True))
        return added / denom                      # exact divide (feeds loss/rank)

    # greedy decode chained with the rule walk (attention stays in VMEM).
    # Unrolled on purpose: decode_probs (VPU/EUP/XLU) of step i+1 overlaps the
    # MXU-heavy walk_step of step i under the LLO scheduler.
    oh = init_oh_ref[...]
    tok0, _ = argmax_token(oh)                    # == trg[:, 1] (init token)
    toks = [tok0]
    mem = mem0
    for _ in range(STEPS):
        probs = decode_probs(oh)                  # attention row for this step
        tok, oh = argmax_token(probs)             # next greedy token
        toks.append(tok)
        mem = walk_step(mem, probs)

    # loss / rank / gen tokens packed into one lane-dense stats tile:
    #   col0 = NLL, col1 = rank, cols 2..2+MAX_SEQ_LEN-1 = greedy tokens.
    loss = -jnp.sum(tgt * jnp.log(jnp.maximum(f32(THR), mem)),
                    axis=-1, keepdims=True)
    tgt_val = jnp.sum(tgt * mem, axis=-1, keepdims=True)
    rank = jnp.sum((mem > tgt_val).astype(f32), axis=-1, keepdims=True)

    ecol = lax.broadcasted_iota(jnp.int32, (BT, E), 1)
    stats = (jnp.where(ecol == 0, loss, f32(0.0)) +
             jnp.where(ecol == 1, rank, f32(0.0)))
    for s, tok in enumerate(toks):
        stats = stats + jnp.where(ecol == (2 + s), tok, f32(0.0))
    stats_ref[...] = stats


def _fused_call(init_oh, enc_p, mem0, tgt, emb_p, wprj_p, big_h, sel, ent, scat):
    nb = B_PAD // BT

    def bspec(shape):       # batch-tiled per-example inputs / output
        return pl.BlockSpec(shape, lambda i: (i, 0))

    def cspec(shape):       # resident constants (fetched once)
        return pl.BlockSpec(shape, lambda i: (0, 0))

    return pl.pallas_call(
        _rule_translator_kernel,
        out_shape=jax.ShapeDtypeStruct((B_PAD, E), jnp.float32),
        grid=(nb,),
        in_specs=[bspec((BT, V_PAD)),       # init one-hot
                  bspec((BT, D_PAD)),       # pooled encoder output
                  bspec((BT, E)),           # mem0 = one-hot(head)
                  bspec((BT, E)),           # tgt  = one-hot(tail)
                  cspec((V_PAD, D_PAD)),    # decoder embedding (bf16)
                  cspec((D_PAD, V_PAD)),    # trg_word_prj (bf16)
                  cspec((E, PACK_W)),       # horizontal relation slab (bf16)
                  cspec((V_PAD, CORR_W)),   # known-fact relation selector (bf16)
                  cspec((E, CORR_W)),       # known-fact entity selector (bf16)
                  cspec((CORR_W, E))],      # known-fact scatter matrix (bf16)
        out_specs=bspec((BT, E)),
        compiler_params=pltpu.CompilerParams(
            dimension_semantics=("parallel",)),   # batch tiles shard across v7x TCs
    )(init_oh, enc_p, mem0, tgt, emb_p, wprj_p, big_h, sel, ent, scat)


# ----------------------- wrapper (layout plumbing) -----------------------
def encode(src_seq, emb_src):
    # get_pad_mask: (src != pad) masked mean pooling of source embeddings.
    emb = emb_src[src_seq]                                        # (B, L, D)
    mask = (src_seq != SRC_PAD_IDX).astype(jnp.float32)[..., None]
    pooled = jnp.sum(emb * mask, axis=1)
    cnt = jnp.maximum(jnp.sum(mask, axis=1), 1.0)
    return pooled / cnt                                           # (B, D)


def build_static_tables(database, emb_trg, w_prj):
    """Built ONCE outside the jitted hot path: horizontal bf16 relation slab
    [db_0..db_R-1 | db_0^T..db_R-1^T] and the padded bf16 decoder tables."""
    blocks = [database[r] for r in range(NUM_POS_REL)]
    blocks += [database[r].T for r in range(NUM_POS_REL)]
    big_h = jnp.concatenate(blocks, axis=1).astype(jnp.bfloat16)   # (E, PACK_W)
    emb_p = (jnp.zeros((V_PAD, D_PAD), jnp.float32)
             .at[:N_TRG_VOCAB, :D_MODEL].set(emb_trg)).astype(jnp.bfloat16)
    wprj_p = (jnp.zeros((D_PAD, V_PAD), jnp.float32)
              .at[:D_MODEL, :N_TRG_VOCAB].set(w_prj)).astype(jnp.bfloat16)
    return emb_p, wprj_p, big_h


def rule_translator_forward(src_seq, trg, emb_src, database, statics):
    emb_p, wprj_p, big_h = statics
    bsz = src_seq.shape[0]

    enc_pool = encode(src_seq, emb_src)                           # (B, D_MODEL)
    enc_p = jnp.zeros((B_PAD, D_PAD), jnp.float32).at[:bsz, :D_MODEL].set(enc_pool)

    h_idx, r_idx, t_idx = trg[:, 0], trg[:, 1], trg[:, 2]
    brange = jnp.arange(bsz)
    init_oh = jnp.zeros((B_PAD, V_PAD), jnp.float32).at[brange, r_idx].set(1.0)
    mem0 = jnp.zeros((B_PAD, E), jnp.float32).at[brange, h_idx].set(1.0)
    tgt = jnp.zeros((B_PAD, E), jnp.float32).at[brange, t_idx].set(1.0)

    # Batch-shared known-fact removal data (all binary, exact in bf16): for
    # every queried triple (h, r, t) with r < NUM_POS_REL and db_r[h, t] == 1,
    # the kernel subtracts that edge's contribution from EVERY row's hop,
    # matching the reference's zeroing of the shared database copy.  The big
    # relation slab itself is never re-materialised per call.
    valid = (r_idx < NUM_POS_REL)
    rs = jnp.where(valid, r_idx, 0)
    fact = database[rs, h_idx, t_idx] * valid.astype(jnp.float32)  # (B,)
    sel = jnp.zeros((V_PAD, CORR_W), jnp.float32)
    sel = sel.at[rs, brange].set(fact)                             # fwd columns
    sel = sel.at[rs + NUM_POS_REL, JCAP + brange].set(fact)        # inverse columns
    ent = jnp.zeros((E, CORR_W), jnp.float32)
    ent = ent.at[h_idx, brange].set(1.0)                           # picks mem[:, h_j]
    ent = ent.at[t_idx, JCAP + brange].set(1.0)                    # picks mem[:, t_j]
    scat = jnp.zeros((CORR_W, E), jnp.float32)
    scat = scat.at[brange, t_idx].set(1.0)                         # subtract at col t_j
    scat = scat.at[JCAP + brange, h_idx].set(1.0)                  # subtract at col h_j

    stats = _fused_call(init_oh, enc_p, mem0, tgt, emb_p, wprj_p, big_h,
                        sel.astype(jnp.bfloat16), ent.astype(jnp.bfloat16),
                        scat.astype(jnp.bfloat16))

    gen_seq = stats[:bsz, 2:2 + MAX_SEQ_LEN].astype(jnp.int32)
    loss = jnp.mean(stats[:bsz, 0])
    rank = stats[:bsz, 1].astype(jnp.int32)
    return gen_seq, loss, rank


# ----------------------- main -----------------------
if __name__ == "__main__":
    key = jax.random.PRNGKey(0)
    k1, k2, k3, k4, k5, k6, k7 = jax.random.split(key, 7)

    # deterministic synthetic parameters
    emb_src = 0.1 * jax.random.normal(k1, (E, D_MODEL), jnp.float32)
    emb_trg = 0.1 * jax.random.normal(k2, (N_TRG_VOCAB, D_MODEL), jnp.float32)
    w_prj = 0.1 * jax.random.normal(k3, (D_MODEL, N_TRG_VOCAB), jnp.float32)
    database = (jax.random.uniform(k4, (NUM_POS_REL, E, E)) < 0.15).astype(jnp.float32)

    # deterministic example inputs
    src_seq = jax.random.randint(k5, (B, SRC_LEN), 0, E, dtype=jnp.int32)
    heads = jax.random.randint(k6, (B,), 1, E, dtype=jnp.int32)
    tails = jax.random.randint(k7, (B,), 1, E, dtype=jnp.int32)
    rels = jnp.array([1, 2], dtype=jnp.int32)
    trg = jnp.stack([heads, rels, tails], axis=1)                  # (B, 3): (h, r, t)

    statics = build_static_tables(database, emb_trg, w_prj)        # once, outside jit

    fwd = jax.jit(rule_translator_forward)
    gen_seq, loss, rank = fwd(src_seq, trg, emb_src, database, statics)
    jax.block_until_ready((gen_seq, loss, rank))
    print("KERNEL_OK")
</pallas_src>

<mosaic_0001>
module attributes {stable_mosaic.version = 11 : i64} {
  func.func @_rule_translator_kernel(%arg0: i32, %arg1: memref<8x128xf32, #tpu.memory_space<vmem>>, %arg2: memref<8x128xf32, #tpu.memory_space<vmem>>, %arg3: memref<8x128xf32, #tpu.memory_space<vmem>>, %arg4: memref<8x128xf32, #tpu.memory_space<vmem>>, %arg5: memref<128x128xbf16, #tpu.memory_space<vmem>>, %arg6: memref<128x128xbf16, #tpu.memory_space<vmem>>, %arg7: memref<128x1024xbf16, #tpu.memory_space<vmem>>, %arg8: memref<128x256xbf16, #tpu.memory_space<vmem>>, %arg9: memref<128x256xbf16, #tpu.memory_space<vmem>>, %arg10: memref<256x128xbf16, #tpu.memory_space<vmem>>, %arg11: memref<8x128xf32, #tpu.memory_space<vmem>>) attributes {dimension_semantics = [#tpu.dimension_semantics<parallel>], iteration_bounds = array<i64: 1>, scalar_prefetch = 0 : i64, scratch_operands = 0 : i64, tpu.core_type = #tpu.core_type<tc>, window_params = [{transform_indices = @transform_0, window_bounds = array<i64: 8, 128>}, {transform_indices = @transform_1, window_bounds = array<i64: 8, 128>}, {transform_indices = @transform_2, window_bounds = array<i64: 8, 128>}, {transform_indices = @transform_3, window_bounds = array<i64: 8, 128>}, {pipeline_mode = #tpu.pipeline_mode<synchronous>, transform_indices = @transform_4, window_bounds = array<i64: 128, 128>}, {pipeline_mode = #tpu.pipeline_mode<synchronous>, transform_indices = @transform_5, window_bounds = array<i64: 128, 128>}, {pipeline_mode = #tpu.pipeline_mode<synchronous>, transform_indices = @transform_6, window_bounds = array<i64: 128, 1024>}, {pipeline_mode = #tpu.pipeline_mode<synchronous>, transform_indices = @transform_7, window_bounds = array<i64: 128, 256>}, {pipeline_mode = #tpu.pipeline_mode<synchronous>, transform_indices = @transform_8, window_bounds = array<i64: 128, 256>}, {pipeline_mode = #tpu.pipeline_mode<synchronous>, transform_indices = @transform_9, window_bounds = array<i64: 256, 128>}, {transform_indices = @transform_10, window_bounds = array<i64: 8, 128>}]} {
    %0 = tpu.iota {dimensions = array<i32: 1>} : vector<8x128xi32>
    %1 = arith.sitofp %0 : vector<8x128xi32> to vector<8x128xf32>
    %c0 = arith.constant 0 : index
    %c0_0 = arith.constant 0 : index
    %2 = vector.load %arg2[%c0, %c0_0] : memref<8x128xf32, #tpu.memory_space<vmem>>, vector<8x128xf32>
    %c0_1 = arith.constant 0 : index
    %c0_2 = arith.constant 0 : index
    %3 = vector.load %arg5[%c0_1, %c0_2] : memref<128x128xbf16, #tpu.memory_space<vmem>>, vector<128x128xbf16>
    %c0_3 = arith.constant 0 : index
    %c0_4 = arith.constant 0 : index
    %4 = vector.load %arg6[%c0_3, %c0_4] : memref<128x128xbf16, #tpu.memory_space<vmem>>, vector<128x128xbf16>
    %c0_5 = arith.constant 0 : index
    %c0_6 = arith.constant 0 : index
    %5 = vector.load %arg7[%c0_5, %c0_6] : memref<128x1024xbf16, #tpu.memory_space<vmem>>, vector<128x1024xbf16>
    %c0_7 = arith.constant 0 : index
    %c0_8 = arith.constant 0 : index
    %6 = vector.load %arg8[%c0_7, %c0_8] : memref<128x256xbf16, #tpu.memory_space<vmem>>, vector<128x256xbf16>
    %7 = arith.extf %6 : vector<128x256xbf16> to vector<128x256xf32>
    %c0_9 = arith.constant 0 : index
    %c0_10 = arith.constant 0 : index
    %8 = vector.load %arg9[%c0_9, %c0_10] : memref<128x256xbf16, #tpu.memory_space<vmem>>, vector<128x256xbf16>
    %9 = arith.extf %8 : vector<128x256xbf16> to vector<128x256xf32>
    %c0_11 = arith.constant 0 : index
    %c0_12 = arith.constant 0 : index
    %10 = vector.load %arg10[%c0_11, %c0_12] : memref<256x128xbf16, #tpu.memory_space<vmem>>, vector<256x128xbf16>
    %11 = arith.extf %10 : vector<256x128xbf16> to vector<256x128xf32>
    %c0_13 = arith.constant 0 : index
    %c0_14 = arith.constant 0 : index
    %12 = vector.load %arg3[%c0_13, %c0_14] : memref<8x128xf32, #tpu.memory_space<vmem>>, vector<8x128xf32>
    %c0_15 = arith.constant 0 : index
    %c0_16 = arith.constant 0 : index
    %13 = vector.load %arg4[%c0_15, %c0_16] : memref<8x128xf32, #tpu.memory_space<vmem>>, vector<8x128xf32>
    %c0_17 = arith.constant 0 : index
    %c0_18 = arith.constant 0 : index
    %14 = vector.load %arg1[%c0_17, %c0_18] : memref<8x128xf32, #tpu.memory_space<vmem>>, vector<8x128xf32>
    %cst = arith.constant dense<0xFF800000> : vector<8xf32>
    %15 = vector.multi_reduction <maximumf>, %14, %cst [1] : vector<8x128xf32> to vector<8xf32>
    %16 = vector.shape_cast %15 : vector<8xf32> to vector<8x1xf32>
    %17 = vector.broadcast %16 : vector<8x1xf32> to vector<8x128xf32>
    %18 = arith.cmpf oge, %14, %17 : vector<8x128xf32>
    %cst_19 = arith.constant 1.280000e+02 : f32
    %19 = vector.broadcast %cst_19 : f32 to vector<8x128xf32>
    %20 = arith.select %18, %1, %19 : vector<8x128xi1>, vector<8x128xf32>
    %cst_20 = arith.constant dense<0x7F800000> : vector<8xf32>
    %21 = vector.multi_reduction <minimumf>, %20, %cst_20 [1] : vector<8x128xf32> to vector<8xf32>
    %22 = vector.shape_cast %21 : vector<8xf32> to vector<8x1xf32>
    %23 = arith.truncf %14 : vector<8x128xf32> to vector<8x128xbf16>
    %cst_21 = arith.constant dense<0.000000e+00> : vector<8x128xf32>
    %24 = tpu.matmul %23, %3, %cst_21 {dimension_numbers = #tpu.dot_dimension_numbers<[1], [0], [0], [1], [0, 0, 1, 1], [], []>} : vector<8x128xbf16>, vector<128x128xbf16>, vector<8x128xf32> -> vector<8x128xf32>
    %25 = arith.addf %24, %2 : vector<8x128xf32>
    %26 = math.tanh %25 : vector<8x128xf32>
    %27 = arith.truncf %26 : vector<8x128xf32> to vector<8x128xbf16>
    %cst_22 = arith.constant dense<0.000000e+00> : vector<8x128xf32>
    %28 = tpu.matmul %27, %4, %cst_22 {dimension_numbers = #tpu.dot_dimension_numbers<[1], [0], [0], [1], [0, 0, 1, 1], [], []>} : vector<8x128xbf16>, vector<128x128xbf16>, vector<8x128xf32> -> vector<8x128xf32>
    %c9_i32 = arith.constant 9 : i32
    %29 = vector.broadcast %c9_i32 : i32 to vector<8x128xi32>
    %30 = arith.cmpi slt, %0, %29 : vector<8x128xi32>
    %cst_23 = arith.constant -1.000000e+30 : f32
    %31 = vector.broadcast %cst_23 : f32 to vector<8x128xf32>
    %32 = arith.select %30, %28, %31 : vector<8x128xi1>, vector<8x128xf32>
    %cst_24 = arith.constant dense<0xFF800000> : vector<8xf32>
    %33 = vector.multi_reduction <maximumf>, %32, %cst_24 [1] : vector<8x128xf32> to vector<8xf32>
    %34 = vector.shape_cast %33 : vector<8xf32> to vector<8x1xf32>
    %35 = vector.broadcast %34 : vector<8x1xf32> to vector<8x128xf32>
    %36 = arith.subf %32, %35 : vector<8x128xf32>
    %37 = math.exp %36 : vector<8x128xf32>
    %cst_25 = arith.constant dense<0.000000e+00> : vector<8xf32>
    %38 = vector.multi_reduction <add>, %37, %cst_25 [1] : vector<8x128xf32> to vector<8xf32>
    %39 = vector.shape_cast %38 : vector<8xf32> to vector<8x1xf32>
    %40 = tpu.reciprocal %39 {approx = true} : vector<8x1xf32> -> vector<8x1xf32>
    %41 = vector.broadcast %40 : vector<8x1xf32> to vector<8x128xf32>
    %42 = arith.mulf %37, %41 : vector<8x128xf32>
    %cst_26 = arith.constant dense<0xFF800000> : vector<8xf32>
    %43 = vector.multi_reduction <maximumf>, %42, %cst_26 [1] : vector<8x128xf32> to vector<8xf32>
    %44 = vector.shape_cast %43 : vector<8xf32> to vector<8x1xf32>
    %45 = vector.broadcast %44 : vector<8x1xf32> to vector<8x128xf32>
    %46 = arith.cmpf oge, %42, %45 : vector<8x128xf32>
    %cst_27 = arith.constant 1.280000e+02 : f32
    %47 = vector.broadcast %cst_27 : f32 to vector<8x128xf32>
    %48 = arith.select %46, %1, %47 : vector<8x128xi1>, vector<8x128xf32>
    %cst_28 = arith.constant dense<0x7F800000> : vector<8xf32>
    %49 = vector.multi_reduction <minimumf>, %48, %cst_28 [1] : vector<8x128xf32> to vector<8xf32>
    %50 = vector.shape_cast %49 : vector<8xf32> to vector<8x1xf32>
    %51 = vector.broadcast %50 : vector<8x1xf32> to vector<8x128xf32>
    %52 = arith.cmpf oeq, %1, %51 : vector<8x128xf32>
    %53 = arith.extui %52 : vector<8x128xi1> to vector<8x128xi32>
    %54 = arith.sitofp %53 : vector<8x128xi32> to vector<8x128xf32>
    %55 = arith.truncf %12 : vector<8x128xf32> to vector<8x128xbf16>
    %56 = arith.extf %55 : vector<8x128xbf16> to vector<8x128xf32>
    %cst_29 = arith.constant dense<0.000000e+00> : vector<8x1024xf32>
    %57 = tpu.matmul %55, %5, %cst_29 {dimension_numbers = #tpu.dot_dimension_numbers<[1], [0], [0], [1], [0, 0, 1, 1], [], []>} : vector<8x128xbf16>, vector<128x1024xbf16>, vector<8x1024xf32> -> vector<8x1024xf32>
    %c8_i32 = arith.constant 8 : i32
    %58 = vector.broadcast %c8_i32 : i32 to vector<8x128xi32>
    %59 = arith.cmpi eq, %0, %58 : vector<8x128xi32>
    %cst_30 = arith.constant 0.000000e+00 : f32
    %60 = vector.broadcast %cst_30 : f32 to vector<8x128xf32>
    %61 = arith.select %59, %42, %60 : vector<8x128xi1>, vector<8x128xf32>
    %cst_31 = arith.constant dense<0.000000e+00> : vector<8xf32>
    %62 = vector.multi_reduction <add>, %61, %cst_31 [1] : vector<8x128xf32> to vector<8xf32>
    %63 = vector.shape_cast %62 : vector<8xf32> to vector<8x1xf32>
    %64 = vector.broadcast %63 : vector<8x1xf32> to vector<8x128xf32>
    %65 = arith.mulf %12, %64 : vector<8x128xf32>
    %c0_i32 = arith.constant 0 : i32
    %66 = vector.broadcast %c0_i32 : i32 to vector<8x128xi32>
    %67 = arith.cmpi eq, %0, %66 : vector<8x128xi32>
    %cst_32 = arith.constant 0.000000e+00 : f32
    %68 = vector.broadcast %cst_32 : f32 to vector<8x128xf32>
    %69 = arith.select %67, %42, %68 : vector<8x128xi1>, vector<8x128xf32>
    %cst_33 = arith.constant dense<0.000000e+00> : vector<8xf32>
    %70 = vector.multi_reduction <add>, %69, %cst_33 [1] : vector<8x128xf32> to vector<8xf32>
    %71 = vector.shape_cast %70 : vector<8xf32> to vector<8x1xf32>
    %72 = vector.extract_strided_slice %57 {offsets = [0, 0], sizes = [8, 128], strides = [1, 1]} : vector<8x1024xf32> to vector<8x128xf32>
    %73 = vector.broadcast %71 : vector<8x1xf32> to vector<8x128xf32>
    %74 = arith.mulf %72, %73 : vector<8x128xf32>
    %75 = arith.addf %65, %74 : vector<8x128xf32>
    %c1_i32 = arith.constant 1 : i32
    %76 = vector.broadcast %c1_i32 : i32 to vector<8x128xi32>
    %77 = arith.cmpi eq, %0, %76 : vector<8x128xi32>
    %cst_34 = arith.constant 0.000000e+00 : f32
    %78 = vector.broadcast %cst_34 : f32 to vector<8x128xf32>
    %79 = arith.select %77, %42, %78 : vector<8x128xi1>, vector<8x128xf32>
    %cst_35 = arith.constant dense<0.000000e+00> : vector<8xf32>
    %80 = vector.multi_reduction <add>, %79, %cst_35 [1] : vector<8x128xf32> to vector<8xf32>
    %81 = vector.shape_cast %80 : vector<8xf32> to vector<8x1xf32>
    %82 = vector.extract_strided_slice %57 {offsets = [0, 128], sizes = [8, 128], strides = [1, 1]} : vector<8x1024xf32> to vector<8x128xf32>
    %83 = vector.broadcast %81 : vector<8x1xf32> to vector<8x128xf32>
    %84 = arith.mulf %82, %83 : vector<8x128xf32>
    %85 = arith.addf %75, %84 : vector<8x128xf32>
    %c2_i32 = arith.constant 2 : i32
    %86 = vector.broadcast %c2_i32 : i32 to vector<8x128xi32>
    %87 = arith.cmpi eq, %0, %86 : vector<8x128xi32>
    %cst_36 = arith.constant 0.000000e+00 : f32
    %88 = vector.broadcast %cst_36 : f32 to vector<8x128xf32>
    %89 = arith.select %87, %42, %88 : vector<8x128xi1>, vector<8x128xf32>
    %cst_37 = arith.constant dense<0.000000e+00> : vector<8xf32>
    %90 = vector.multi_reduction <add>, %89, %cst_37 [1] : vector<8x128xf32> to vector<8xf32>
    %91 = vector.shape_cast %90 : vector<8xf32> to vector<8x1xf32>
    %92 = vector.extract_strided_slice %57 {offsets = [0, 256], sizes = [8, 128], strides = [1, 1]} : vector<8x1024xf32> to vector<8x128xf32>
    %93 = vector.broadcast %91 : vector<8x1xf32> to vector<8x128xf32>
    %94 = arith.mulf %92, %93 : vector<8x128xf32>
    %95 = arith.addf %85, %94 : vector<8x128xf32>
    %c3_i32 = arith.constant 3 : i32
    %96 = vector.broadcast %c3_i32 : i32 to vector<8x128xi32>
    %97 = arith.cmpi eq, %0, %96 : vector<8x128xi32>
    %cst_38 = arith.constant 0.000000e+00 : f32
    %98 = vector.broadcast %cst_38 : f32 to vector<8x128xf32>
    %99 = arith.select %97, %42, %98 : vector<8x128xi1>, vector<8x128xf32>
    %cst_39 = arith.constant dense<0.000000e+00> : vector<8xf32>
    %100 = vector.multi_reduction <add>, %99, %cst_39 [1] : vector<8x128xf32> to vector<8xf32>
    %101 = vector.shape_cast %100 : vector<8xf32> to vector<8x1xf32>
    %102 = vector.extract_strided_slice %57 {offsets = [0, 384], sizes = [8, 128], strides = [1, 1]} : vector<8x1024xf32> to vector<8x128xf32>
    %103 = vector.broadcast %101 : vector<8x1xf32> to vector<8x128xf32>
    %104 = arith.mulf %102, %103 : vector<8x128xf32>
    %105 = arith.addf %95, %104 : vector<8x128xf32>
    %c4_i32 = arith.constant 4 : i32
    %106 = vector.broadcast %c4_i32 : i32 to vector<8x128xi32>
    %107 = arith.cmpi eq, %0, %106 : vector<8x128xi32>
    %cst_40 = arith.constant 0.000000e+00 : f32
    %108 = vector.broadcast %cst_40 : f32 to vector<8x128xf32>
    %109 = arith.select %107, %42, %108 : vector<8x128xi1>, vector<8x128xf32>
    %cst_41 = arith.constant dense<0.000000e+00> : vector<8xf32>
    %110 = vector.multi_reduction <add>, %109, %cst_41 [1] : vector<8x128xf32> to vector<8xf32>
    %111 = vector.shape_cast %110 : vector<8xf32> to vector<8x1xf32>
    %112 = vector.extract_strided_slice %57 {offsets = [0, 512], sizes = [8, 128], strides = [1, 1]} : vector<8x1024xf32> to vector<8x128xf32>
    %113 = vector.broadcast %111 : vector<8x1xf32> to vector<8x128xf32>
    %114 = arith.mulf %112, %113 : vector<8x128xf32>
    %115 = arith.addf %105, %114 : vector<8x128xf32>
    %c5_i32 = arith.constant 5 : i32
    %116 = vector.broadcast %c5_i32 : i32 to vector<8x128xi32>
    %117 = arith.cmpi eq, %0, %116 : vector<8x128xi32>
    %cst_42 = arith.constant 0.000000e+00 : f32
    %118 = vector.broadcast %cst_42 : f32 to vector<8x128xf32>
    %119 = arith.select %117, %42, %118 : vector<8x128xi1>, vector<8x128xf32>
    %cst_43 = arith.constant dense<0.000000e+00> : vector<8xf32>
    %120 = vector.multi_reduction <add>, %119, %cst_43 [1] : vector<8x128xf32> to vector<8xf32>
    %121 = vector.shape_cast %120 : vector<8xf32> to vector<8x1xf32>
    %122 = vector.extract_strided_slice %57 {offsets = [0, 640], sizes = [8, 128], strides = [1, 1]} : vector<8x1024xf32> to vector<8x128xf32>
    %123 = vector.broadcast %121 : vector<8x1xf32> to vector<8x128xf32>
    %124 = arith.mulf %122, %123 : vector<8x128xf32>
    %125 = arith.addf %115, %124 : vector<8x128xf32>
    %c6_i32 = arith.constant 6 : i32
    %126 = vector.broadcast %c6_i32 : i32 to vector<8x128xi32>
    %127 = arith.cmpi eq, %0, %126 : vector<8x128xi32>
    %cst_44 = arith.constant 0.000000e+00 : f32
    %128 = vector.broadcast %cst_44 : f32 to vector<8x128xf32>
    %129 = arith.select %127, %42, %128 : vector<8x128xi1>, vector<8x128xf32>
    %cst_45 = arith.constant dense<0.000000e+00> : vector<8xf32>
    %130 = vector.multi_reduction <add>, %129, %cst_45 [1] : vector<8x128xf32> to vector<8xf32>
    %131 = vector.shape_cast %130 : vector<8xf32> to vector<8x1xf32>
    %132 = vector.extract_strided_slice %57 {offsets = [0, 768], sizes = [8, 128], strides = [1, 1]} : vector<8x1024xf32> to vector<8x128xf32>
    %133 = vector.broadcast %131 : vector<8x1xf32> to vector<8x128xf32>
    %134 = arith.mulf %132, %133 : vector<8x128xf32>
    %135 = arith.addf %125, %134 : vector<8x128xf32>
    %c7_i32 = arith.constant 7 : i32
    %136 = vector.broadcast %c7_i32 : i32 to vector<8x128xi32>
    %137 = arith.cmpi eq, %0, %136 : vector<8x128xi32>
    %cst_46 = arith.constant 0.000000e+00 : f32
    %138 = vector.broadcast %cst_46 : f32 to vector<8x128xf32>
    %139 = arith.select %137, %42, %138 : vector<8x128xi1>, vector<8x128xf32>
    %cst_47 = arith.constant dense<0.000000e+00> : vector<8xf32>
    %140 = vector.multi_reduction <add>, %139, %cst_47 [1] : vector<8x128xf32> to vector<8xf32>
    %141 = vector.shape_cast %140 : vector<8xf32> to vector<8x1xf32>
    %142 = vector.extract_strided_slice %57 {offsets = [0, 896], sizes = [8, 128], strides = [1, 1]} : vector<8x1024xf32> to vector<8x128xf32>
    %143 = vector.broadcast %141 : vector<8x1xf32> to vector<8x128xf32>
    %144 = arith.mulf %142, %143 : vector<8x128xf32>
    %145 = arith.addf %135, %144 : vector<8x128xf32>
    %cst_48 = arith.constant dense<0.000000e+00> : vector<8x256xf32>
    %146 = tpu.matmul %42, %7, %cst_48 {dimension_numbers = #tpu.dot_dimension_numbers<[1], [0], [0], [1], [0, 0, 1, 1], [], []>} : vector<8x128xf32>, vector<128x256xf32>, vector<8x256xf32> -> vector<8x256xf32>
    %cst_49 = arith.constant dense<0.000000e+00> : vector<8x256xf32>
    %147 = tpu.matmul %56, %9, %cst_49 {dimension_numbers = #tpu.dot_dimension_numbers<[1], [0], [0], [1], [0, 0, 1, 1], [], []>} : vector<8x128xf32>, vector<128x256xf32>, vector<8x256xf32> -> vector<8x256xf32>
    %148 = arith.mulf %146, %147 : vector<8x256xf32>
    %cst_50 = arith.constant dense<0.000000e+00> : vector<8x128xf32>
    %149 = tpu.matmul %148, %11, %cst_50 {dimension_numbers = #tpu.dot_dimension_numbers<[1], [0], [0], [1], [0, 0, 1, 1], [], []>} : vector<8x256xf32>, vector<256x128xf32>, vector<8x128xf32> -> vector<8x128xf32>
    %150 = arith.subf %145, %149 : vector<8x128xf32>
    %cst_51 = arith.constant 0.000000e+00 : f32
    %151 = vector.broadcast %cst_51 : f32 to vector<8x128xf32>
    %152 = arith.maximumf %150, %151 : vector<8x128xf32>
    %cst_52 = arith.constant dense<0.000000e+00> : vector<8xf32>
    %153 = vector.multi_reduction <add>, %152, %cst_52 [1] : vector<8x128xf32> to vector<8xf32>
    %154 = vector.shape_cast %153 : vector<8xf32> to vector<8x1xf32>
    %cst_53 = arith.constant 9.99999968E-21 : f32
    %155 = vector.broadcast %cst_53 : f32 to vector<8x1xf32>
    %156 = arith.maximumf %155, %154 : vector<8x1xf32>
    %157 = vector.broadcast %156 : vector<8x1xf32> to vector<8x128xf32>
    %158 = arith.divf %152, %157 : vector<8x128xf32>
    %159 = arith.truncf %54 : vector<8x128xf32> to vector<8x128xbf16>
    %cst_54 = arith.constant dense<0.000000e+00> : vector<8x128xf32>
    %160 = tpu.matmul %159, %3, %cst_54 {dimension_numbers = #tpu.dot_dimension_numbers<[1], [0], [0], [1], [0, 0, 1, 1], [], []>} : vector<8x128xbf16>, vector<128x128xbf16>, vector<8x128xf32> -> vector<8x128xf32>
    %161 = arith.addf %160, %2 : vector<8x128xf32>
    %162 = math.tanh %161 : vector<8x128xf32>
    %163 = arith.truncf %162 : vector<8x128xf32> to vector<8x128xbf16>
    %cst_55 = arith.constant dense<0.000000e+00> : vector<8x128xf32>
    %164 = tpu.matmul %163, %4, %cst_55 {dimension_numbers = #tpu.dot_dimension_numbers<[1], [0], [0], [1], [0, 0, 1, 1], [], []>} : vector<8x128xbf16>, vector<128x128xbf16>, vector<8x128xf32> -> vector<8x128xf32>
    %c9_i32_56 = arith.constant 9 : i32
    %165 = vector.broadcast %c9_i32_56 : i32 to vector<8x128xi32>
    %166 = arith.cmpi slt, %0, %165 : vector<8x128xi32>
    %cst_57 = arith.constant -1.000000e+30 : f32
    %167 = vector.broadcast %cst_57 : f32 to vector<8x128xf32>
    %168 = arith.select %166, %164, %167 : vector<8x128xi1>, vector<8x128xf32>
    %cst_58 = arith.constant dense<0xFF800000> : vector<8xf32>
    %169 = vector.multi_reduction <maximumf>, %168, %cst_58 [1] : vector<8x128xf32> to vector<8xf32>
    %170 = vector.shape_cast %169 : vector<8xf32> to vector<8x1xf32>
    %171 = vector.broadcast %170 : vector<8x1xf32> to vector<8x128xf32>
    %172 = arith.subf %168, %171 : vector<8x128xf32>
    %173 = math.exp %172 : vector<8x128xf32>
    %cst_59 = arith.constant dense<0.000000e+00> : vector<8xf32>
    %174 = vector.multi_reduction <add>, %173, %cst_59 [1] : vector<8x128xf32> to vector<8xf32>
    %175 = vector.shape_cast %174 : vector<8xf32> to vector<8x1xf32>
    %176 = tpu.reciprocal %175 {approx = true} : vector<8x1xf32> -> vector<8x1xf32>
    %177 = vector.broadcast %176 : vector<8x1xf32> to vector<8x128xf32>
    %178 = arith.mulf %173, %177 : vector<8x128xf32>
    %cst_60 = arith.constant dense<0xFF800000> : vector<8xf32>
    %179 = vector.multi_reduction <maximumf>, %178, %cst_60 [1] : vector<8x128xf32> to vector<8xf32>
    %180 = vector.shape_cast %179 : vector<8xf32> to vector<8x1xf32>
    %181 = vector.broadcast %180 : vector<8x1xf32> to vector<8x128xf32>
    %182 = arith.cmpf oge, %178, %181 : vector<8x128xf32>
    %cst_61 = arith.constant 1.280000e+02 : f32
    %183 = vector.broadcast %cst_61 : f32 to vector<8x128xf32>
    %184 = arith.select %182, %1, %183 : vector<8x128xi1>, vector<8x128xf32>
    %cst_62 = arith.constant dense<0x7F800000> : vector<8xf32>
    %185 = vector.multi_reduction <minimumf>, %184, %cst_62 [1] : vector<8x128xf32> to vector<8xf32>
    %186 = vector.shape_cast %185 : vector<8xf32> to vector<8x1xf32>
    %187 = vector.broadcast %186 : vector<8x1xf32> to vector<8x128xf32>
    %188 = arith.cmpf oeq, %1, %187 : vector<8x128xf32>
    %189 = arith.extui %188 : vector<8x128xi1> to vector<8x128xi32>
    %190 = arith.sitofp %189 : vector<8x128xi32> to vector<8x128xf32>
    %191 = arith.truncf %158 : vector<8x128xf32> to vector<8x128xbf16>
    %192 = arith.extf %191 : vector<8x128xbf16> to vector<8x128xf32>
    %cst_63 = arith.constant dense<0.000000e+00> : vector<8x1024xf32>
    %193 = tpu.matmul %191, %5, %cst_63 {dimension_numbers = #tpu.dot_dimension_numbers<[1], [0], [0], [1], [0, 0, 1, 1], [], []>} : vector<8x128xbf16>, vector<128x1024xbf16>, vector<8x1024xf32> -> vector<8x1024xf32>
    %c8_i32_64 = arith.constant 8 : i32
    %194 = vector.broadcast %c8_i32_64 : i32 to vector<8x128xi32>
    %195 = arith.cmpi eq, %0, %194 : vector<8x128xi32>
    %cst_65 = arith.constant 0.000000e+00 : f32
    %196 = vector.broadcast %cst_65 : f32 to vector<8x128xf32>
    %197 = arith.select %195, %178, %196 : vector<8x128xi1>, vector<8x128xf32>
    %cst_66 = arith.constant dense<0.000000e+00> : vector<8xf32>
    %198 = vector.multi_reduction <add>, %197, %cst_66 [1] : vector<8x128xf32> to vector<8xf32>
    %199 = vector.shape_cast %198 : vector<8xf32> to vector<8x1xf32>
    %200 = vector.broadcast %199 : vector<8x1xf32> to vector<8x128xf32>
    %201 = arith.mulf %158, %200 : vector<8x128xf32>
    %c0_i32_67 = arith.constant 0 : i32
    %202 = vector.broadcast %c0_i32_67 : i32 to vector<8x128xi32>
    %203 = arith.cmpi eq, %0, %202 : vector<8x128xi32>
    %cst_68 = arith.constant 0.000000e+00 : f32
    %204 = vector.broadcast %cst_68 : f32 to vector<8x128xf32>
    %205 = arith.select %203, %178, %204 : vector<8x128xi1>, vector<8x128xf32>
    %cst_69 = arith.constant dense<0.000000e+00> : vector<8xf32>
    %206 = vector.multi_reduction <add>, %205, %cst_69 [1] : vector<8x128xf32> to vector<8xf32>
    %207 = vector.shape_cast %206 : vector<8xf32> to vector<8x1xf32>
    %208 = vector.extract_strided_slice %193 {offsets = [0, 0], sizes = [8, 128], strides = [1, 1]} : vector<8x1024xf32> to vector<8x128xf32>
    %209 = vector.broadcast %207 : vector<8x1xf32> to vector<8x128xf32>
    %210 = arith.mulf %208, %209 : vector<8x128xf32>
    %211 = arith.addf %201, %210 : vector<8x128xf32>
    %c1_i32_70 = arith.constant 1 : i32
    %212 = vector.broadcast %c1_i32_70 : i32 to vector<8x128xi32>
    %213 = arith.cmpi eq, %0, %212 : vector<8x128xi32>
    %cst_71 = arith.constant 0.000000e+00 : f32
    %214 = vector.broadcast %cst_71 : f32 to vector<8x128xf32>
    %215 = arith.select %213, %178, %214 : vector<8x128xi1>, vector<8x128xf32>
    %cst_72 = arith.constant dense<0.000000e+00> : vector<8xf32>
    %216 = vector.multi_reduction <add>, %215, %cst_72 [1] : vector<8x128xf32> to vector<8xf32>
    %217 = vector.shape_cast %216 : vector<8xf32> to vector<8x1xf32>
    %218 = vector.extract_strided_slice %193 {offsets = [0, 128], sizes = [8, 128], strides = [1, 1]} : vector<8x1024xf32> to vector<8x128xf32>
    %219 = vector.broadcast %217 : vector<8x1xf32> to vector<8x128xf32>
    %220 = arith.mulf %218, %219 : vector<8x128xf32>
    %221 = arith.addf %211, %220 : vector<8x128xf32>
    %c2_i32_73 = arith.constant 2 : i32
    %222 = vector.broadcast %c2_i32_73 : i32 to vector<8x128xi32>
    %223 = arith.cmpi eq, %0, %222 : vector<8x128xi32>
    %cst_74 = arith.constant 0.000000e+00 : f32
    %224 = vector.broadcast %cst_74 : f32 to vector<8x128xf32>
    %225 = arith.select %223, %178, %224 : vector<8x128xi1>, vector<8x128xf32>
    %cst_75 = arith.constant dense<0.000000e+00> : vector<8xf32>
    %226 = vector.multi_reduction <add>, %225, %cst_75 [1] : vector<8x128xf32> to vector<8xf32>
    %227 = vector.shape_cast %226 : vector<8xf32> to vector<8x1xf32>
    %228 = vector.extract_strided_slice %193 {offsets = [0, 256], sizes = [8, 128], strides = [1, 1]} : vector<8x1024xf32> to vector<8x128xf32>
    %229 = vector.broadcast %227 : vector<8x1xf32> to vector<8x128xf32>
    %230 = arith.mulf %228, %229 : vector<8x128xf32>
    %231 = arith.addf %221, %230 : vector<8x128xf32>
    %c3_i32_76 = arith.constant 3 : i32
    %232 = vector.broadcast %c3_i32_76 : i32 to vector<8x128xi32>
    %233 = arith.cmpi eq, %0, %232 : vector<8x128xi32>
    %cst_77 = arith.constant 0.000000e+00 : f32
    %234 = vector.broadcast %cst_77 : f32 to vector<8x128xf32>
    %235 = arith.select %233, %178, %234 : vector<8x128xi1>, vector<8x128xf32>
    %cst_78 = arith.constant dense<0.000000e+00> : vector<8xf32>
    %236 = vector.multi_reduction <add>, %235, %cst_78 [1] : vector<8x128xf32> to vector<8xf32>
    %237 = vector.shape_cast %236 : vector<8xf32> to vector<8x1xf32>
    %238 = vector.extract_strided_slice %193 {offsets = [0, 384], sizes = [8, 128], strides = [1, 1]} : vector<8x1024xf32> to vector<8x128xf32>
    %239 = vector.broadcast %237 : vector<8x1xf32> to vector<8x128xf32>
    %240 = arith.mulf %238, %239 : vector<8x128xf32>
    %241 = arith.addf %231, %240 : vector<8x128xf32>
    %c4_i32_79 = arith.constant 4 : i32
    %242 = vector.broadcast %c4_i32_79 : i32 to vector<8x128xi32>
    %243 = arith.cmpi eq, %0, %242 : vector<8x128xi32>
    %cst_80 = arith.constant 0.000000e+00 : f32
    %244 = vector.broadcast %cst_80 : f32 to vector<8x128xf32>
    %245 = arith.select %243, %178, %244 : vector<8x128xi1>, vector<8x128xf32>
    %cst_81 = arith.constant dense<0.000000e+00> : vector<8xf32>
    %246 = vector.multi_reduction <add>, %245, %cst_81 [1] : vector<8x128xf32> to vector<8xf32>
    %247 = vector.shape_cast %246 : vector<8xf32> to vector<8x1xf32>
    %248 = vector.extract_strided_slice %193 {offsets = [0, 512], sizes = [8, 128], strides = [1, 1]} : vector<8x1024xf32> to vector<8x128xf32>
    %249 = vector.broadcast %247 : vector<8x1xf32> to vector<8x128xf32>
    %250 = arith.mulf %248, %249 : vector<8x128xf32>
    %251 = arith.addf %241, %250 : vector<8x128xf32>
    %c5_i32_82 = arith.constant 5 : i32
    %252 = vector.broadcast %c5_i32_82 : i32 to vector<8x128xi32>
    %253 = arith.cmpi eq, %0, %252 : vector<8x128xi32>
    %cst_83 = arith.constant 0.000000e+00 : f32
    %254 = vector.broadcast %cst_83 : f32 to vector<8x128xf32>
    %255 = arith.select %253, %178, %254 : vector<8x128xi1>, vector<8x128xf32>
    %cst_84 = arith.constant dense<0.000000e+00> : vector<8xf32>
    %256 = vector.multi_reduction <add>, %255, %cst_84 [1] : vector<8x128xf32> to vector<8xf32>
    %257 = vector.shape_cast %256 : vector<8xf32> to vector<8x1xf32>
    %258 = vector.extract_strided_slice %193 {offsets = [0, 640], sizes = [8, 128], strides = [1, 1]} : vector<8x1024xf32> to vector<8x128xf32>
    %259 = vector.broadcast %257 : vector<8x1xf32> to vector<8x128xf32>
    %260 = arith.mulf %258, %259 : vector<8x128xf32>
    %261 = arith.addf %251, %260 : vector<8x128xf32>
    %c6_i32_85 = arith.constant 6 : i32
    %262 = vector.broadcast %c6_i32_85 : i32 to vector<8x128xi32>
    %263 = arith.cmpi eq, %0, %262 : vector<8x128xi32>
    %cst_86 = arith.constant 0.000000e+00 : f32
    %264 = vector.broadcast %cst_86 : f32 to vector<8x128xf32>
    %265 = arith.select %263, %178, %264 : vector<8x128xi1>, vector<8x128xf32>
    %cst_87 = arith.constant dense<0.000000e+00> : vector<8xf32>
    %266 = vector.multi_reduction <add>, %265, %cst_87 [1] : vector<8x128xf32> to vector<8xf32>
    %267 = vector.shape_cast %266 : vector<8xf32> to vector<8x1xf32>
    %268 = vector.extract_strided_slice %193 {offsets = [0, 768], sizes = [8, 128], strides = [1, 1]} : vector<8x1024xf32> to vector<8x128xf32>
    %269 = vector.broadcast %267 : vector<8x1xf32> to vector<8x128xf32>
    %270 = arith.mulf %268, %269 : vector<8x128xf32>
    %271 = arith.addf %261, %270 : vector<8x128xf32>
    %c7_i32_88 = arith.constant 7 : i32
    %272 = vector.broadcast %c7_i32_88 : i32 to vector<8x128xi32>
    %273 = arith.cmpi eq, %0, %272 : vector<8x128xi32>
    %cst_89 = arith.constant 0.000000e+00 : f32
    %274 = vector.broadcast %cst_89 : f32 to vector<8x128xf32>
    %275 = arith.select %273, %178, %274 : vector<8x128xi1>, vector<8x128xf32>
    %cst_90 = arith.constant dense<0.000000e+00> : vector<8xf32>
    %276 = vector.multi_reduction <add>, %275, %cst_90 [1] : vector<8x128xf32> to vector<8xf32>
    %277 = vector.shape_cast %276 : vector<8xf32> to vector<8x1xf32>
    %278 = vector.extract_strided_slice %193 {offsets = [0, 896], sizes = [8, 128], strides = [1, 1]} : vector<8x1024xf32> to vector<8x128xf32>
    %279 = vector.broadcast %277 : vector<8x1xf32> to vector<8x128xf32>
    %280 = arith.mulf %278, %279 : vector<8x128xf32>
    %281 = arith.addf %271, %280 : vector<8x128xf32>
    %cst_91 = arith.constant dense<0.000000e+00> : vector<8x256xf32>
    %282 = tpu.matmul %178, %7, %cst_91 {dimension_numbers = #tpu.dot_dimension_numbers<[1], [0], [0], [1], [0, 0, 1, 1], [], []>} : vector<8x128xf32>, vector<128x256xf32>, vector<8x256xf32> -> vector<8x256xf32>
    %cst_92 = arith.constant dense<0.000000e+00> : vector<8x256xf32>
    %283 = tpu.matmul %192, %9, %cst_92 {dimension_numbers = #tpu.dot_dimension_numbers<[1], [0], [0], [1], [0, 0, 1, 1], [], []>} : vector<8x128xf32>, vector<128x256xf32>, vector<8x256xf32> -> vector<8x256xf32>
    %284 = arith.mulf %282, %283 : vector<8x256xf32>
    %cst_93 = arith.constant dense<0.000000e+00> : vector<8x128xf32>
    %285 = tpu.matmul %284, %11, %cst_93 {dimension_numbers = #tpu.dot_dimension_numbers<[1], [0], [0], [1], [0, 0, 1, 1], [], []>} : vector<8x256xf32>, vector<256x128xf32>, vector<8x128xf32> -> vector<8x128xf32>
    %286 = arith.subf %281, %285 : vector<8x128xf32>
    %cst_94 = arith.constant 0.000000e+00 : f32
    %287 = vector.broadcast %cst_94 : f32 to vector<8x128xf32>
    %288 = arith.maximumf %286, %287 : vector<8x128xf32>
    %cst_95 = arith.constant dense<0.000000e+00> : vector<8xf32>
    %289 = vector.multi_reduction <add>, %288, %cst_95 [1] : vector<8x128xf32> to vector<8xf32>
    %290 = vector.shape_cast %289 : vector<8xf32> to vector<8x1xf32>
    %cst_96 = arith.constant 9.99999968E-21 : f32
    %291 = vector.broadcast %cst_96 : f32 to vector<8x1xf32>
    %292 = arith.maximumf %291, %290 : vector<8x1xf32>
    %293 = vector.broadcast %292 : vector<8x1xf32> to vector<8x128xf32>
    %294 = arith.divf %288, %293 : vector<8x128xf32>
    %295 = arith.truncf %190 : vector<8x128xf32> to vector<8x128xbf16>
    %cst_97 = arith.constant dense<0.000000e+00> : vector<8x128xf32>
    %296 = tpu.matmul %295, %3, %cst_97 {dimension_numbers = #tpu.dot_dimension_numbers<[1], [0], [0], [1], [0, 0, 1, 1], [], []>} : vector<8x128xbf16>, vector<128x128xbf16>, vector<8x128xf32> -> vector<8x128xf32>
    %297 = arith.addf %296, %2 : vector<8x128xf32>
    %298 = math.tanh %297 : vector<8x128xf32>
    %299 = arith.truncf %298 : vector<8x128xf32> to vector<8x128xbf16>
    %cst_98 = arith.constant dense<0.000000e+00> : vector<8x128xf32>
    %300 = tpu.matmul %299, %4, %cst_98 {dimension_numbers = #tpu.dot_dimension_numbers<[1], [0], [0], [1], [0, 0, 1, 1], [], []>} : vector<8x128xbf16>, vector<128x128xbf16>, vector<8x128xf32> -> vector<8x128xf32>
    %c9_i32_99 = arith.constant 9 : i32
    %301 = vector.broadcast %c9_i32_99 : i32 to vector<8x128xi32>
    %302 = arith.cmpi slt, %0, %301 : vector<8x128xi32>
    %cst_100 = arith.constant -1.000000e+30 : f32
    %303 = vector.broadcast %cst_100 : f32 to vector<8x128xf32>
    %304 = arith.select %302, %300, %303 : vector<8x128xi1>, vector<8x128xf32>
    %cst_101 = arith.constant dense<0xFF800000> : vector<8xf32>
    %305 = vector.multi_reduction <maximumf>, %304, %cst_101 [1] : vector<8x128xf32> to vector<8xf32>
    %306 = vector.shape_cast %305 : vector<8xf32> to vector<8x1xf32>
    %307 = vector.broadcast %306 : vector<8x1xf32> to vector<8x128xf32>
    %308 = arith.subf %304, %307 : vector<8x128xf32>
    %309 = math.exp %308 : vector<8x128xf32>
    %cst_102 = arith.constant dense<0.000000e+00> : vector<8xf32>
    %310 = vector.multi_reduction <add>, %309, %cst_102 [1] : vector<8x128xf32> to vector<8xf32>
    %311 = vector.shape_cast %310 : vector<8xf32> to vector<8x1xf32>
    %312 = tpu.reciprocal %311 {approx = true} : vector<8x1xf32> -> vector<8x1xf32>
    %313 = vector.broadcast %312 : vector<8x1xf32> to vector<8x128xf32>
    %314 = arith.mulf %309, %313 : vector<8x128xf32>
    %cst_103 = arith.constant dense<0xFF800000> : vector<8xf32>
    %315 = vector.multi_reduction <maximumf>, %314, %cst_103 [1] : vector<8x128xf32> to vector<8xf32>
    %316 = vector.shape_cast %315 : vector<8xf32> to vector<8x1xf32>
    %317 = vector.broadcast %316 : vector<8x1xf32> to vector<8x128xf32>
    %318 = arith.cmpf oge, %314, %317 : vector<8x128xf32>
    %cst_104 = arith.constant 1.280000e+02 : f32
    %319 = vector.broadcast %cst_104 : f32 to vector<8x128xf32>
    %320 = arith.select %318, %1, %319 : vector<8x128xi1>, vector<8x128xf32>
    %cst_105 = arith.constant dense<0x7F800000> : vector<8xf32>
    %321 = vector.multi_reduction <minimumf>, %320, %cst_105 [1] : vector<8x128xf32> to vector<8xf32>
    %322 = vector.shape_cast %321 : vector<8xf32> to vector<8x1xf32>
    %323 = arith.truncf %294 : vector<8x128xf32> to vector<8x128xbf16>
    %324 = arith.extf %323 : vector<8x128xbf16> to vector<8x128xf32>
    %cst_106 = arith.constant dense<0.000000e+00> : vector<8x1024xf32>
    %325 = tpu.matmul %323, %5, %cst_106 {dimension_numbers = #tpu.dot_dimension_numbers<[1], [0], [0], [1], [0, 0, 1, 1], [], []>} : vector<8x128xbf16>, vector<128x1024xbf16>, vector<8x1024xf32> -> vector<8x1024xf32>
    %c8_i32_107 = arith.constant 8 : i32
    %326 = vector.broadcast %c8_i32_107 : i32 to vector<8x128xi32>
    %327 = arith.cmpi eq, %0, %326 : vector<8x128xi32>
    %cst_108 = arith.constant 0.000000e+00 : f32
    %328 = vector.broadcast %cst_108 : f32 to vector<8x128xf32>
    %329 = arith.select %327, %314, %328 : vector<8x128xi1>, vector<8x128xf32>
    %cst_109 = arith.constant dense<0.000000e+00> : vector<8xf32>
    %330 = vector.multi_reduction <add>, %329, %cst_109 [1] : vector<8x128xf32> to vector<8xf32>
    %331 = vector.shape_cast %330 : vector<8xf32> to vector<8x1xf32>
    %332 = vector.broadcast %331 : vector<8x1xf32> to vector<8x128xf32>
    %333 = arith.mulf %294, %332 : vector<8x128xf32>
    %c0_i32_110 = arith.constant 0 : i32
    %334 = vector.broadcast %c0_i32_110 : i32 to vector<8x128xi32>
    %335 = arith.cmpi eq, %0, %334 : vector<8x128xi32>
    %cst_111 = arith.constant 0.000000e+00 : f32
    %336 = vector.broadcast %cst_111 : f32 to vector<8x128xf32>
    %337 = arith.select %335, %314, %336 : vector<8x128xi1>, vector<8x128xf32>
    %cst_112 = arith.constant dense<0.000000e+00> : vector<8xf32>
    %338 = vector.multi_reduction <add>, %337, %cst_112 [1] : vector<8x128xf32> to vector<8xf32>
    %339 = vector.shape_cast %338 : vector<8xf32> to vector<8x1xf32>
    %340 = vector.extract_strided_slice %325 {offsets = [0, 0], sizes = [8, 128], strides = [1, 1]} : vector<8x1024xf32> to vector<8x128xf32>
    %341 = vector.broadcast %339 : vector<8x1xf32> to vector<8x128xf32>
    %342 = arith.mulf %340, %341 : vector<8x128xf32>
    %343 = arith.addf %333, %342 : vector<8x128xf32>
    %c1_i32_113 = arith.constant 1 : i32
    %344 = vector.broadcast %c1_i32_113 : i32 to vector<8x128xi32>
    %345 = arith.cmpi eq, %0, %344 : vector<8x128xi32>
    %cst_114 = arith.constant 0.000000e+00 : f32
    %346 = vector.broadcast %cst_114 : f32 to vector<8x128xf32>
    %347 = arith.select %345, %314, %346 : vector<8x128xi1>, vector<8x128xf32>
    %cst_115 = arith.constant dense<0.000000e+00> : vector<8xf32>
    %348 = vector.multi_reduction <add>, %347, %cst_115 [1] : vector<8x128xf32> to vector<8xf32>
    %349 = vector.shape_cast %348 : vector<8xf32> to vector<8x1xf32>
    %350 = vector.extract_strided_slice %325 {offsets = [0, 128], sizes = [8, 128], strides = [1, 1]} : vector<8x1024xf32> to vector<8x128xf32>
    %351 = vector.broadcast %349 : vector<8x1xf32> to vector<8x128xf32>
    %352 = arith.mulf %350, %351 : vector<8x128xf32>
    %353 = arith.addf %343, %352 : vector<8x128xf32>
    %c2_i32_116 = arith.constant 2 : i32
    %354 = vector.broadcast %c2_i32_116 : i32 to vector<8x128xi32>
    %355 = arith.cmpi eq, %0, %354 : vector<8x128xi32>
    %cst_117 = arith.constant 0.000000e+00 : f32
    %356 = vector.broadcast %cst_117 : f32 to vector<8x128xf32>
    %357 = arith.select %355, %314, %356 : vector<8x128xi1>, vector<8x128xf32>
    %cst_118 = arith.constant dense<0.000000e+00> : vector<8xf32>
    %358 = vector.multi_reduction <add>, %357, %cst_118 [1] : vector<8x128xf32> to vector<8xf32>
    %359 = vector.shape_cast %358 : vector<8xf32> to vector<8x1xf32>
    %360 = vector.extract_strided_slice %325 {offsets = [0, 256], sizes = [8, 128], strides = [1, 1]} : vector<8x1024xf32> to vector<8x128xf32>
    %361 = vector.broadcast %359 : vector<8x1xf32> to vector<8x128xf32>
    %362 = arith.mulf %360, %361 : vector<8x128xf32>
    %363 = arith.addf %353, %362 : vector<8x128xf32>
    %c3_i32_119 = arith.constant 3 : i32
    %364 = vector.broadcast %c3_i32_119 : i32 to vector<8x128xi32>
    %365 = arith.cmpi eq, %0, %364 : vector<8x128xi32>
    %cst_120 = arith.constant 0.000000e+00 : f32
    %366 = vector.broadcast %cst_120 : f32 to vector<8x128xf32>
    %367 = arith.select %365, %314, %366 : vector<8x128xi1>, vector<8x128xf32>
    %cst_121 = arith.constant dense<0.000000e+00> : vector<8xf32>
    %368 = vector.multi_reduction <add>, %367, %cst_121 [1] : vector<8x128xf32> to vector<8xf32>
    %369 = vector.shape_cast %368 : vector<8xf32> to vector<8x1xf32>
    %370 = vector.extract_strided_slice %325 {offsets = [0, 384], sizes = [8, 128], strides = [1, 1]} : vector<8x1024xf32> to vector<8x128xf32>
    %371 = vector.broadcast %369 : vector<8x1xf32> to vector<8x128xf32>
    %372 = arith.mulf %370, %371 : vector<8x128xf32>
    %373 = arith.addf %363, %372 : vector<8x128xf32>
    %c4_i32_122 = arith.constant 4 : i32
    %374 = vector.broadcast %c4_i32_122 : i32 to vector<8x128xi32>
    %375 = arith.cmpi eq, %0, %374 : vector<8x128xi32>
    %cst_123 = arith.constant 0.000000e+00 : f32
    %376 = vector.broadcast %cst_123 : f32 to vector<8x128xf32>
    %377 = arith.select %375, %314, %376 : vector<8x128xi1>, vector<8x128xf32>
    %cst_124 = arith.constant dense<0.000000e+00> : vector<8xf32>
    %378 = vector.multi_reduction <add>, %377, %cst_124 [1] : vector<8x128xf32> to vector<8xf32>
    %379 = vector.shape_cast %378 : vector<8xf32> to vector<8x1xf32>
    %380 = vector.extract_strided_slice %325 {offsets = [0, 512], sizes = [8, 128], strides = [1, 1]} : vector<8x1024xf32> to vector<8x128xf32>
    %381 = vector.broadcast %379 : vector<8x1xf32> to vector<8x128xf32>
    %382 = arith.mulf %380, %381 : vector<8x128xf32>
    %383 = arith.addf %373, %382 : vector<8x128xf32>
    %c5_i32_125 = arith.constant 5 : i32
    %384 = vector.broadcast %c5_i32_125 : i32 to vector<8x128xi32>
    %385 = arith.cmpi eq, %0, %384 : vector<8x128xi32>
    %cst_126 = arith.constant 0.000000e+00 : f32
    %386 = vector.broadcast %cst_126 : f32 to vector<8x128xf32>
    %387 = arith.select %385, %314, %386 : vector<8x128xi1>, vector<8x128xf32>
    %cst_127 = arith.constant dense<0.000000e+00> : vector<8xf32>
    %388 = vector.multi_reduction <add>, %387, %cst_127 [1] : vector<8x128xf32> to vector<8xf32>
    %389 = vector.shape_cast %388 : vector<8xf32> to vector<8x1xf32>
    %390 = vector.extract_strided_slice %325 {offsets = [0, 640], sizes = [8, 128], strides = [1, 1]} : vector<8x1024xf32> to vector<8x128xf32>
    %391 = vector.broadcast %389 : vector<8x1xf32> to vector<8x128xf32>
    %392 = arith.mulf %390, %391 : vector<8x128xf32>
    %393 = arith.addf %383, %392 : vector<8x128xf32>
    %c6_i32_128 = arith.constant 6 : i32
    %394 = vector.broadcast %c6_i32_128 : i32 to vector<8x128xi32>
    %395 = arith.cmpi eq, %0, %394 : vector<8x128xi32>
    %cst_129 = arith.constant 0.000000e+00 : f32
    %396 = vector.broadcast %cst_129 : f32 to vector<8x128xf32>
    %397 = arith.select %395, %314, %396 : vector<8x128xi1>, vector<8x128xf32>
    %cst_130 = arith.constant dense<0.000000e+00> : vector<8xf32>
    %398 = vector.multi_reduction <add>, %397, %cst_130 [1] : vector<8x128xf32> to vector<8xf32>
    %399 = vector.shape_cast %398 : vector<8xf32> to vector<8x1xf32>
    %400 = vector.extract_strided_slice %325 {offsets = [0, 768], sizes = [8, 128], strides = [1, 1]} : vector<8x1024xf32> to vector<8x128xf32>
    %401 = vector.broadcast %399 : vector<8x1xf32> to vector<8x128xf32>
    %402 = arith.mulf %400, %401 : vector<8x128xf32>
    %403 = arith.addf %393, %402 : vector<8x128xf32>
    %c7_i32_131 = arith.constant 7 : i32
    %404 = vector.broadcast %c7_i32_131 : i32 to vector<8x128xi32>
    %405 = arith.cmpi eq, %0, %404 : vector<8x128xi32>
    %cst_132 = arith.constant 0.000000e+00 : f32
    %406 = vector.broadcast %cst_132 : f32 to vector<8x128xf32>
    %407 = arith.select %405, %314, %406 : vector<8x128xi1>, vector<8x128xf32>
    %cst_133 = arith.constant dense<0.000000e+00> : vector<8xf32>
    %408 = vector.multi_reduction <add>, %407, %cst_133 [1] : vector<8x128xf32> to vector<8xf32>
    %409 = vector.shape_cast %408 : vector<8xf32> to vector<8x1xf32>
    %410 = vector.extract_strided_slice %325 {offsets = [0, 896], sizes = [8, 128], strides = [1, 1]} : vector<8x1024xf32> to vector<8x128xf32>
    %411 = vector.broadcast %409 : vector<8x1xf32> to vector<8x128xf32>
    %412 = arith.mulf %410, %411 : vector<8x128xf32>
    %413 = arith.addf %403, %412 : vector<8x128xf32>
    %cst_134 = arith.constant dense<0.000000e+00> : vector<8x256xf32>
    %414 = tpu.matmul %314, %7, %cst_134 {dimension_numbers = #tpu.dot_dimension_numbers<[1], [0], [0], [1], [0, 0, 1, 1], [], []>} : vector<8x128xf32>, vector<128x256xf32>, vector<8x256xf32> -> vector<8x256xf32>
    %cst_135 = arith.constant dense<0.000000e+00> : vector<8x256xf32>
    %415 = tpu.matmul %324, %9, %cst_135 {dimension_numbers = #tpu.dot_dimension_numbers<[1], [0], [0], [1], [0, 0, 1, 1], [], []>} : vector<8x128xf32>, vector<128x256xf32>, vector<8x256xf32> -> vector<8x256xf32>
    %416 = arith.mulf %414, %415 : vector<8x256xf32>
    %cst_136 = arith.constant dense<0.000000e+00> : vector<8x128xf32>
    %417 = tpu.matmul %416, %11, %cst_136 {dimension_numbers = #tpu.dot_dimension_numbers<[1], [0], [0], [1], [0, 0, 1, 1], [], []>} : vector<8x256xf32>, vector<256x128xf32>, vector<8x128xf32> -> vector<8x128xf32>
    %418 = arith.subf %413, %417 : vector<8x128xf32>
    %cst_137 = arith.constant 0.000000e+00 : f32
    %419 = vector.broadcast %cst_137 : f32 to vector<8x128xf32>
    %420 = arith.maximumf %418, %419 : vector<8x128xf32>
    %cst_138 = arith.constant dense<0.000000e+00> : vector<8xf32>
    %421 = vector.multi_reduction <add>, %420, %cst_138 [1] : vector<8x128xf32> to vector<8xf32>
    %422 = vector.shape_cast %421 : vector<8xf32> to vector<8x1xf32>
    %cst_139 = arith.constant 9.99999968E-21 : f32
    %423 = vector.broadcast %cst_139 : f32 to vector<8x1xf32>
    %424 = arith.maximumf %423, %422 : vector<8x1xf32>
    %425 = vector.broadcast %424 : vector<8x1xf32> to vector<8x128xf32>
    %426 = arith.divf %420, %425 : vector<8x128xf32>
    %cst_140 = arith.constant 9.99999968E-21 : f32
    %427 = vector.broadcast %cst_140 : f32 to vector<8x128xf32>
    %428 = arith.maximumf %427, %426 : vector<8x128xf32>
    %429 = math.log %428 : vector<8x128xf32>
    %430 = arith.mulf %13, %429 : vector<8x128xf32>
    %cst_141 = arith.constant dense<0.000000e+00> : vector<8xf32>
    %431 = vector.multi_reduction <add>, %430, %cst_141 [1] : vector<8x128xf32> to vector<8xf32>
    %432 = vector.shape_cast %431 : vector<8xf32> to vector<8x1xf32>
    %cst_142 = arith.constant 0.000000e+00 : f32
    %433 = vector.broadcast %cst_142 : f32 to vector<8x1xf32>
    %434 = arith.subf %433, %432 : vector<8x1xf32>
    %435 = arith.mulf %13, %426 : vector<8x128xf32>
    %cst_143 = arith.constant dense<0.000000e+00> : vector<8xf32>
    %436 = vector.multi_reduction <add>, %435, %cst_143 [1] : vector<8x128xf32> to vector<8xf32>
    %437 = vector.shape_cast %436 : vector<8xf32> to vector<8x1xf32>
    %438 = vector.broadcast %437 : vector<8x1xf32> to vector<8x128xf32>
    %439 = arith.cmpf ogt, %426, %438 : vector<8x128xf32>
    %440 = arith.extui %439 : vector<8x128xi1> to vector<8x128xi32>
    %441 = arith.sitofp %440 : vector<8x128xi32> to vector<8x128xf32>
    %cst_144 = arith.constant dense<0.000000e+00> : vector<8xf32>
    %442 = vector.multi_reduction <add>, %441, %cst_144 [1] : vector<8x128xf32> to vector<8xf32>
    %443 = vector.shape_cast %442 : vector<8xf32> to vector<8x1xf32>
    %444 = tpu.iota {dimensions = array<i32: 1>} : vector<8x128xi32>
    %c0_i32_145 = arith.constant 0 : i32
    %445 = vector.broadcast %c0_i32_145 : i32 to vector<8x128xi32>
    %446 = arith.cmpi eq, %444, %445 : vector<8x128xi32>
    %cst_146 = arith.constant 0.000000e+00 : f32
    %447 = vector.shape_cast %434 : vector<8x1xf32> to vector<8x1xf32>
    %448 = vector.broadcast %447 : vector<8x1xf32> to vector<8x128xf32>
    %449 = vector.broadcast %cst_146 : f32 to vector<8x128xf32>
    %450 = arith.select %446, %448, %449 : vector<8x128xi1>, vector<8x128xf32>
    %c1_i32_147 = arith.constant 1 : i32
    %451 = vector.broadcast %c1_i32_147 : i32 to vector<8x128xi32>
    %452 = arith.cmpi eq, %444, %451 : vector<8x128xi32>
    %cst_148 = arith.constant 0.000000e+00 : f32
    %453 = vector.shape_cast %443 : vector<8x1xf32> to vector<8x1xf32>
    %454 = vector.broadcast %453 : vector<8x1xf32> to vector<8x128xf32>
    %455 = vector.broadcast %cst_148 : f32 to vector<8x128xf32>
    %456 = arith.select %452, %454, %455 : vector<8x128xi1>, vector<8x128xf32>
    %457 = arith.addf %450, %456 : vector<8x128xf32>
    %c2_i32_149 = arith.constant 2 : i32
    %458 = vector.broadcast %c2_i32_149 : i32 to vector<8x128xi32>
    %459 = arith.cmpi eq, %444, %458 : vector<8x128xi32>
    %cst_150 = arith.constant 0.000000e+00 : f32
    %460 = vector.shape_cast %22 : vector<8x1xf32> to vector<8x1xf32>
    %461 = vector.broadcast %460 : vector<8x1xf32> to vector<8x128xf32>
    %462 = vector.broadcast %cst_150 : f32 to vector<8x128xf32>
    %463 = arith.select %459, %461, %462 : vector<8x128xi1>, vector<8x128xf32>
    %464 = arith.addf %457, %463 : vector<8x128xf32>
    %c3_i32_151 = arith.constant 3 : i32
    %465 = vector.broadcast %c3_i32_151 : i32 to vector<8x128xi32>
    %466 = arith.cmpi eq, %444, %465 : vector<8x128xi32>
    %cst_152 = arith.constant 0.000000e+00 : f32
    %467 = vector.shape_cast %50 : vector<8x1xf32> to vector<8x1xf32>
    %468 = vector.broadcast %467 : vector<8x1xf32> to vector<8x128xf32>
    %469 = vector.broadcast %cst_152 : f32 to vector<8x128xf32>
    %470 = arith.select %466, %468, %469 : vector<8x128xi1>, vector<8x128xf32>
    %471 = arith.addf %464, %470 : vector<8x128xf32>
    %c4_i32_153 = arith.constant 4 : i32
    %472 = vector.broadcast %c4_i32_153 : i32 to vector<8x128xi32>
    %473 = arith.cmpi eq, %444, %472 : vector<8x128xi32>
    %cst_154 = arith.constant 0.000000e+00 : f32
    %474 = vector.shape_cast %186 : vector<8x1xf32> to vector<8x1xf32>
    %475 = vector.broadcast %474 : vector<8x1xf32> to vector<8x128xf32>
    %476 = vector.broadcast %cst_154 : f32 to vector<8x128xf32>
    %477 = arith.select %473, %475, %476 : vector<8x128xi1>, vector<8x128xf32>
    %478 = arith.addf %471, %477 : vector<8x128xf32>
    %c5_i32_155 = arith.constant 5 : i32
    %479 = vector.broadcast %c5_i32_155 : i32 to vector<8x128xi32>
    %480 = arith.cmpi eq, %444, %479 : vector<8x128xi32>
    %cst_156 = arith.constant 0.000000e+00 : f32
    %481 = vector.shape_cast %322 : vector<8x1xf32> to vector<8x1xf32>
    %482 = vector.broadcast %481 : vector<8x1xf32> to vector<8x128xf32>
    %483 = vector.broadcast %cst_156 : f32 to vector<8x128xf32>
    %484 = arith.select %480, %482, %483 : vector<8x128xi1>, vector<8x128xf32>
    %485 = arith.addf %478, %484 : vector<8x128xf32>
    %c0_157 = arith.constant 0 : index
    %c0_158 = arith.constant 0 : index
    %486 = vector.load %arg11[%c0_157, %c0_158] : memref<8x128xf32, #tpu.memory_space<vmem>>, vector<8x128xf32>
    tpu.vector_store %arg11[%c0_157, %c0_158], %485 {strides = array<i32>} : memref<8x128xf32, #tpu.memory_space<vmem>>, vector<8x128xf32>,
    return
  }
  func.func @transform_0(%arg0: i32) -> (i32, i32) {
    %c0_i32 = arith.constant 0 : i32
    %c0_i32_0 = arith.constant 0 : i32
    return %arg0, %c0_i32 : i32, i32
  }
  func.func @transform_1(%arg0: i32) -> (i32, i32) {
    %c0_i32 = arith.constant 0 : i32
    %c0_i32_0 = arith.constant 0 : i32
    return %arg0, %c0_i32 : i32, i32
  }
  func.func @transform_2(%arg0: i32) -> (i32, i32) {
    %c0_i32 = arith.constant 0 : i32
    %c0_i32_0 = arith.constant 0 : i32
    return %arg0, %c0_i32 : i32, i32
  }
  func.func @transform_3(%arg0: i32) -> (i32, i32) {
    %c0_i32 = arith.constant 0 : i32
    %c0_i32_0 = arith.constant 0 : i32
    return %arg0, %c0_i32 : i32, i32
  }
  func.func @transform_4(%arg0: i32) -> (i32, i32) {
    %c0_i32 = arith.constant 0 : i32
    %c0_i32_0 = arith.constant 0 : i32
    %c0_i32_1 = arith.constant 0 : i32
    return %c0_i32, %c0_i32_0 : i32, i32
  }
  func.func @transform_5(%arg0: i32) -> (i32, i32) {
    %c0_i32 = arith.constant 0 : i32
    %c0_i32_0 = arith.constant 0 : i32
    %c0_i32_1 = arith.constant 0 : i32
    return %c0_i32, %c0_i32_0 : i32, i32
  }
  func.func @transform_6(%arg0: i32) -> (i32, i32) {
    %c0_i32 = arith.constant 0 : i32
    %c0_i32_0 = arith.constant 0 : i32
    %c0_i32_1 = arith.constant 0 : i32
    return %c0_i32, %c0_i32_0 : i32, i32
  }
  func.func @transform_7(%arg0: i32) -> (i32, i32) {
    %c0_i32 = arith.constant 0 : i32
    %c0_i32_0 = arith.constant 0 : i32
    %c0_i32_1 = arith.constant 0 : i32
    return %c0_i32, %c0_i32_0 : i32, i32
  }
  func.func @transform_8(%arg0: i32) -> (i32, i32) {
    %c0_i32 = arith.constant 0 : i32
    %c0_i32_0 = arith.constant 0 : i32
    %c0_i32_1 = arith.constant 0 : i32
    return %c0_i32, %c0_i32_0 : i32, i32
  }
  func.func @transform_9(%arg0: i32) -> (i32, i32) {
    %c0_i32 = arith.constant 0 : i32
    %c0_i32_0 = arith.constant 0 : i32
    %c0_i32_1 = arith.constant 0 : i32
    return %c0_i32, %c0_i32_0 : i32, i32
  }
  func.func @transform_10(%arg0: i32) -> (i32, i32) {
    %c0_i32 = arith.constant 0 : i32
    %c0_i32_0 = arith.constant 0 : i32
    return %arg0, %c0_i32 : i32, i32
  }
}

</mosaic_0001>

<bundles_post_ra>
// kernel: rule_translator_forward.1
= control target key start
LH: loop header
LB: loop body
LE: loop exit
PB: predicated region body
PF: predicated region fallthrough
CT: control target
= control target key end

     0   :  { %v4903_v0 = vmov 0.0   ;;  %vm3348_vm0 = vmmov 0   ;;  %v36_v27 = vlaneseq  ;;  %v4905_v37 = vmov 0   ;;  %s4892_s4 = inlined_call_operand.vmem [shape: bf16[128,128], index: 4, kind: input, shape index: {}]   ;;  %s4893_s5 = inlined_call_operand.vmem [shape: bf16[128,128], index: 5, kind: input, shape index: {}]   ;;  %s4894_s0 = inlined_call_operand.vmem [shape: f32[8,128], index: 0, kind: input, shape index: {}]   ;;  %s4895_s1 = inlined_call_operand.vmem [shape: f32[8,128], index: 1, kind: input, shape index: {}]   ;;  %s4896_s6 = inlined_call_operand.vmem [shape: bf16[128,1024], index: 6, kind: input, shape index: {}]   ;;  %s4897_s7 = inlined_call_operand.vmem [shape: bf16[128,256], index: 7, kind: input, shape index: {}]   ;;  %s4898_s8 = inlined_call_operand.vmem [shape: bf16[128,256], index: 8, kind: input, shape index: {}]   ;;  %s4899_s2 = inlined_call_operand.vmem [shape: f32[8,128], index: 2, kind: input, shape index: {}]   ;;  %s4900_s9 = inlined_call_operand.vmem [shape: bf16[256,128], index: 9, kind: input, shape index: {}]   ;;  %s4901_s3 = inlined_call_operand.vmem [shape: f32[8,128], index: 3, kind: input, shape index: {}]   ;;  %s4902_s10 = inlined_call_operand.vmem [shape: f32[8,128], index: 10, kind: output, shape index: {}]  }
   0x1   :  { %2683 = vmatprep.subr.bf16.mxu0 %v4903_v0  ;;  %v3410_v1 = vld [vmem:[%s4892_s4] sm:$0xff]   ;;  %2699 = vmatprep.mubr.msk.bf16.mxu0 %vm3348_vm0, %v4903_v0  ;;  %v3421_v2 = vld [vmem:[%s4892_s4 + $0x8] sm:$0xff]   ;;  %v3428_v3 = vld [vmem:[%s4892_s4 + $0x10] sm:$0xff]  }
   0x2   :  { %2703 = vmatprep.subr.bf16.mxu1 %v4903_v0  ;;  %2719 = vmatprep.mubr.msk.bf16.mxu1 %vm3348_vm0, %v4903_v0  ;;  %v3434_v4 = vld [vmem:[%s4893_s5] sm:$0xff]   ;;  %v3440_v5 = vld [vmem:[%s4892_s4 + $0x18] sm:$0xff]   ;;  %v3447_v6 = vld [vmem:[%s4893_s5 + $0x8] sm:$0xff]   ;;  %v3531_v28 = vand.u32 127, %v36_v27 }
   0x3   :  { %2684 = vmatpush3.bf16.msra.mxu0 %v3410_v1  ;;  %2704 = vmatpush3.bf16.msra.mxu1 %v3434_v4  ;;  %v3452_v7 = vld [vmem:[%s4892_s4 + $0x20] sm:$0xff]   ;;  %v3461_v8 = vld [vmem:[%s4893_s5 + $0x10] sm:$0xff]   ;;  %v3468_v9 = vld [vmem:[%s4892_s4 + $0x28] sm:$0xff]  }
   0x4   :  { %2685 = vmatprep.subr.bf16.mxu0 %v4903_v0  ;;  %2705 = vmatprep.subr.bf16.mxu1 %v4903_v0  ;;  %v3475_v10 = vld [vmem:[%s4893_s5 + $0x18] sm:$0xff]   ;;  %v3482_v11 = vld [vmem:[%s4892_s4 + $0x30] sm:$0xff]   ;;  %v298_v13 = vld [vmem:[%s4894_s0] sm:$0xff]  ;;  %5034 = vst [vmem:[#allocation2_spill] sm:$0xff] %v3531_v28  ;;  %vm484_vm1 = vcmp.lt.s32.totalorder %v3531_v28, 9  ;;  %vm988_vm3 = vcmp.eq.s32.totalorder %v3531_v28, 8 }
   0x5   :  { %v3491_v12 = vld [vmem:[%s4892_s4 + $0x38] sm:$0xff]   ;;  %v305_v14 = vpack.c.bf16 %v298_v13, %v298_v13  ;;  %v3501_v15 = vld [vmem:[%s4893_s5 + $0x20] sm:$0xff]   ;;  %v3508_v16 = vld [vmem:[%s4893_s5 + $0x28] sm:$0xff]   ;;  %vm999_vm4 = vcmp.eq.s32.totalorder %v3531_v28, 1  ;;  %vm1011_vm5 = vcmp.eq.s32.totalorder %v3531_v28, 3  ;;  %vm1023_vm6 = vcmp.eq.s32.totalorder %v3531_v28, 5 }
   0x6   :  { %v3515_v17 = vld [vmem:[%s4893_s5 + $0x30] sm:$0xff]   ;;  %v3522_v18 = vld [vmem:[%s4893_s5 + $0x38] sm:$0xff]   ;;  %v3528_v19 = vld [vmem:[%s4895_s1] sm:$0xff]  ;;  %vm1035_vm7 = vcmp.eq.s32.totalorder %v3531_v28, 7  ;;  %vm993_vm10 = vcmp.eq.s32.totalorder %v3531_v28, 0  ;;  %vm1005_vm11 = vcmp.eq.s32.totalorder %v3531_v28, 2 }
   0x7   :  { %2686 = vmatpush3.bf16.msra.mxu0 %v3421_v2  ;;  %2706 = vmatpush3.bf16.msra.mxu1 %v3447_v6  ;;  %v72_v34 = vld [vmem:[%s4896_s6] sm:$0xff]  ;;  %v73_v36 = vld [vmem:[%s4896_s6 + $0x8] sm:$0xff]  ;;  %vm1017_vm12 = vcmp.eq.s32.totalorder %v3531_v28, 4  ;;  %vm1029_vm13 = vcmp.eq.s32.totalorder %v3531_v28, 6 }
   0x8   :  { %2687 = vmatprep.subr.bf16.mxu0 %v4903_v0  ;;  %2707 = vmatprep.subr.bf16.mxu1 %v4903_v0  ;;  %v76_v35 = vld [vmem:[%s4896_s6 + $0x20] sm:$0xff]  ;;  %v77_v40 = vld [vmem:[%s4896_s6 + $0x28] sm:$0xff] }
   0x9   :  { %v3550_v38 = vcombine.low %v72_v34, %v76_v35  ;;  %v3552_v39 = vcombine.high %v72_v34, %v76_v35  ;;  %v80_v41 = vld [vmem:[%s4896_s6 + $0x40] sm:$0xff]  ;;  %v3563_v43 = vcombine.low %v73_v36, %v77_v40  ;;  %v3565_v44 = vcombine.high %v73_v36, %v77_v40  ;;  %v81_v46 = vld [vmem:[%s4896_s6 + $0x48] sm:$0xff] }
   0xa   :  { %v84_v42 = vld [vmem:[%s4896_s6 + $0x60] sm:$0xff]  ;;  %v85_v47 = vld [vmem:[%s4896_s6 + $0x68] sm:$0xff] }
   0xb   :  { %2688 = vmatpush3.bf16.msra.mxu0 %v3428_v3  ;;  %2708 = vmatpush3.bf16.msra.mxu1 %v3461_v8  ;;  %5035 = vst [vmem:[#allocation3_spill] sm:$0xff] %v3552_v39  ;;  %v3567_v45 = vcombine.high %v80_v41, %v84_v42  ;;  %v88_v48 = vld [vmem:[%s4896_s6 + $0x80] sm:$0xff]  ;;  %v3579_v49 = vcombine.high %v81_v46, %v85_v47  ;;  %v89_v51 = vld [vmem:[%s4896_s6 + $0x88] sm:$0xff] }
   0xc   :  { %2689 = vmatprep.subr.bf16.mxu0 %v4903_v0  ;;  %2709 = vmatprep.subr.bf16.mxu1 %v4903_v0  ;;  %v92_v50 = vld [vmem:[%s4896_s6 + $0xa0] sm:$0xff]  ;;  %v93_v52 = vld [vmem:[%s4896_s6 + $0xa8] sm:$0xff]  ;;  %v3592_v53 = vcombine.low %v80_v41, %v84_v42  ;;  %v3596_v54 = vcombine.low %v81_v46, %v85_v47 }
   0xd   :  { %v3598_v55 = vcombine.high %v88_v48, %v92_v50  ;;  %v3601_v56 = vcombine.high %v89_v51, %v93_v52  ;;  %v96_v57 = vld [vmem:[%s4896_s6 + $0xc0] sm:$0xff]  ;;  %v97_v59 = vld [vmem:[%s4896_s6 + $0xc8] sm:$0xff]  ;;  %v3616_v61 = vcombine.low %v88_v48, %v92_v50  ;;  %v3620_v62 = vcombine.low %v89_v51, %v93_v52 }
   0xe   :  { %v100_v58 = vld [vmem:[%s4896_s6 + $0xe0] sm:$0xff]  ;;  %v101_v60 = vld [vmem:[%s4896_s6 + $0xe8] sm:$0xff] }
   0xf   :  { %2690 = vmatpush3.bf16.msra.mxu0 %v3440_v5  ;;  %2710 = vmatpush3.bf16.msra.mxu1 %v3475_v10  ;;  %v3622_v63 = vcombine.high %v96_v57, %v100_v58  ;;  %v3625_v13 = vcombine.high %v97_v59, %v101_v60  ;;  %v112_v27 = vld [vmem:[%s4896_s6 + $0x140] sm:$0xff]  ;;  %v121_v42 = vld [vmem:[%s4896_s6 + $0x188] sm:$0xff] }
  0x10   :  { %2691 = vmatprep.subr.bf16.mxu0 %v4903_v0  ;;  %2711 = vmatprep.subr.bf16.mxu1 %v4903_v0  ;;  %v120_v40 = vld [vmem:[%s4896_s6 + $0x180] sm:$0xff]  ;;  %v125_v46 = vld [vmem:[%s4896_s6 + $0x1a8] sm:$0xff] }
  0x11   :  { %v124_v41 = vld [vmem:[%s4896_s6 + $0x1a0] sm:$0xff]  ;;  %v3700_v52 = vcombine.high %v121_v42, %v125_v46 }
  0x12   :  { %v3694_v50 = vcombine.high %v120_v40, %v124_v41  ;;  %v128_v51 = vld [vmem:[%s4896_s6 + $0x1c0] sm:$0xff] }
  0x13   :  { %2692 = vmatpush3.bf16.msra.mxu0 %v3452_v7  ;;  %2712 = vmatpush3.bf16.msra.mxu1 %v3501_v15  ;;  %5041 = vst [vmem:[#allocation9_spill] sm:$0xff] %v3700_v52 }
  0x14   :  { %2693 = vmatprep.subr.bf16.mxu0 %v4903_v0  ;;  %2713 = vmatprep.subr.bf16.mxu1 %v4903_v0 }
  0x17   :  { %2694 = vmatpush3.bf16.msra.mxu0 %v3468_v9  ;;  %2714 = vmatpush3.bf16.msra.mxu1 %v3508_v16 }
  0x18   :  { %2695 = vmatprep.subr.bf16.mxu0 %v4903_v0  ;;  %2715 = vmatprep.subr.bf16.mxu1 %v4903_v0 }
  0x1b   :  { %2696 = vmatpush3.bf16.msra.mxu0 %v3482_v11  ;;  %2716 = vmatpush3.bf16.msra.mxu1 %v3515_v17 }
  0x1c   :  { %2697 = vmatprep.subr.bf16.mxu0 %v4903_v0  ;;  %2717 = vmatprep.subr.bf16.mxu1 %v4903_v0  ;;  %v83_v0 = vld [vmem:[%s4896_s6 + $0x58] sm:$0xff] }
  0x1f   :  { %2698 = vmatpush3.bf16.msra.mxu0 %v3491_v12  ;;  %2718 = vmatpush3.bf16.msra.mxu1 %v3522_v18 }
  0x20   :  { %824 = vmatprep.subr.bf16.mxu0 %v3552_v39  ;;  %865 = vmatprep.subr.bf16.mxu1 %v3565_v44 }
  0x22   :  { %2700 = vmatmul.mubr.bf16.vlgmr.msra.gmra.mrb[0].mxu0 %v305_v14  ;;  %v104_v14 = vld [vmem:[%s4896_s6 + $0x100] sm:$0xff] }
  0x23   :  { %856 = vmatprep.mubr.bf16.mxu0 %v4905_v37  ;;  %825 = vmatpush1.bf16.msra.mxu0 %v3550_v38 }
  0x24   :  { %826 = vmatprep.subr.bf16.mxu0 %v3567_v45 }
  0x27   :  { %827 = vmatpush1.bf16.msra.mxu0 %v3592_v53 }
  0x28   :  { %828 = vmatprep.subr.bf16.mxu0 %v3598_v55 }
  0x2b   :  { %829 = vmatpush1.bf16.msra.mxu0 %v3616_v61 }
  0x2c   :  { %830 = vmatprep.subr.bf16.mxu0 %v3622_v63 }
  0xf5   :  { %v388_v20 = vpop.f32.mrb[0].mxu0 }
  0xf6   :  { %v389_v21 = vadd.f32 %v388_v20, %v3528_v19  ;;  %v2701_v22 = vpop.f32.mrb[1].mxu0  ;;  %v108_v20 = vld [vmem:[%s4896_s6 + $0x120] sm:$0xff] }
  0xf7   :  { %v391_v23 = vpop.f32.mrb[2].mxu0  ;;  %v109_v22 = vld [vmem:[%s4896_s6 + $0x128] sm:$0xff] }
  0xf8   :  { %3255 = vtanh.f32 %v389_v21  ;;  %v2702_v24 = vpop.f32.mrb[3].mxu0  ;;  %v105_v21 = vld [vmem:[%s4896_s6 + $0x108] sm:$0xff]  ;;  %v3640_v23 = vcombine.low %v96_v57, %v100_v58  ;;  %v132_v57 = vld [vmem:[%s4896_s6 + $0x1e0] sm:$0xff] }
  0xf9   :  { %v3644_v24 = vcombine.low %v97_v59, %v101_v60  ;;  %v3668_v34 = vcombine.low %v105_v21, %v109_v22  ;;  %v129_v58 = vld [vmem:[%s4896_s6 + $0x1c8] sm:$0xff]  ;;  %v3712_v60 = vcombine.low %v120_v40, %v124_v41  ;;  %v3741_v40 = vld [vmem:[%s4899_s2] sm:$0xff] }
  0xfa   :  { %831 = vmatpush1.bf16.msra.mxu0 %v3640_v23  ;;  %v133_v59 = vld [vmem:[%s4896_s6 + $0x1e8] sm:$0xff] }
  0xfb   :  { %5036 = vst [vmem:[#allocation4_spill] sm:$0xff] %v3644_v24  ;;  %5038 = vst [vmem:[#allocation6_spill] sm:$0xff] %v3668_v34  ;;  %v3745_v41 = vcombine.low %v129_v58, %v133_v59 }
  0xfd   :  { %5044 = vst [vmem:[#allocation12_spill] sm:$0xff] %v3745_v41 }
 0x102   :  { %v3256_v25 = vpop.eup %3255 }
 0x103   :  { %v395_v26 = vpack.c.bf16 %v3256_v25, %v3256_v25  ;;  %v3646_v25 = vcombine.high %v104_v14, %v108_v20 }
 0x105   :  { %2720 = vmatmul.mubr.bf16.vlgmr.msra.gmra.mrb[0].mxu1 %v395_v26  ;;  %v3649_v26 = vcombine.high %v105_v21, %v109_v22  ;;  %832 = vmatprep.subr.bf16.mxu0 %v3646_v25  ;;  %v74_v21 = vld [vmem:[%s4896_s6 + $0x10] sm:$0xff]  ;;  %v3724_v22 = vcombine.high %v129_v58, %v133_v59  ;;  %v3763_v58 = vpack.c.bf16 %v3741_v40, %v3741_v40  ;;  %v87_v59 = vld [vmem:[%s4896_s6 + $0x78] sm:$0xff] }
 0x106   :  { %897 = vmatprep.mubr.bf16.mxu1 %v4905_v37  ;;  %866 = vmatpush1.bf16.msra.mxu1 %v3563_v43 }
 0x107   :  { %867 = vmatprep.subr.bf16.mxu1 %v3579_v49  ;;  %5037 = vst [vmem:[#allocation5_spill] sm:$0xff] %v3649_v26  ;;  %5043 = vst [vmem:[#allocation11_spill] sm:$0xff] %v3724_v22 }
 0x10a   :  { %868 = vmatpush1.bf16.msra.mxu1 %v3596_v54 }
 0x10b   :  { %869 = vmatprep.subr.bf16.mxu1 %v3601_v56 }
 0x10e   :  { %870 = vmatpush1.bf16.msra.mxu1 %v3620_v62 }
 0x10f   :  { %871 = vmatprep.subr.bf16.mxu1 %v3625_v13 }
 0x112   :  { %872 = vmatpush1.bf16.msra.mxu1 %v3644_v24 }
 0x113   :  { %873 = vmatprep.subr.bf16.mxu1 %v3649_v26  ;;  %v106_v26 = vld [vmem:[%s4896_s6 + $0x110] sm:$0xff] }
 0x116   :  { %874 = vmatpush1.bf16.msra.mxu1 %v3668_v34 }
 0x1d8   :  { %v478_v29 = vpop.f32.mrb[0].mxu1 }
 0x1d9   :  { %v2721_v30 = vpop.f32.mrb[1].mxu1  ;;  %v3536_v31 = vsel %vm484_vm1, %v478_v29, -1e+30  ;;  %v116_v29 = vld [vmem:[%s4896_s6 + $0x160] sm:$0xff] }
 0x1da   :  { %486 = vmax.xlane.f32.xlu0 %v3536_v31  ;;  %v481_v32 = vpop.f32.mrb[2].mxu1  ;;  %v113_v30 = vld [vmem:[%s4896_s6 + $0x148] sm:$0xff]  ;;  %v3670_v35 = vcombine.high %v112_v27, %v116_v29  ;;  %v3688_v47 = vcombine.low %v112_v27, %v116_v29  ;;  %v78_v27 = vld [vmem:[%s4896_s6 + $0x30] sm:$0xff]  ;;  %v75_v29 = vld [vmem:[%s4896_s6 + $0x18] sm:$0xff] }
 0x1db   :  { %v2722_v33 = vpop.f32.mrb[3].mxu1  ;;  %v117_v32 = vld [vmem:[%s4896_s6 + $0x168] sm:$0xff]  ;;  %v3769_v37 = vcombine.low %v74_v21, %v78_v27 }
 0x1dc   :  { %v3664_v33 = vcombine.low %v104_v14, %v108_v20  ;;  %v3673_v36 = vcombine.high %v113_v30, %v117_v32  ;;  %v3692_v48 = vcombine.low %v113_v30, %v117_v32  ;;  %v3716_v14 = vcombine.low %v121_v42, %v125_v46  ;;  %v79_v30 = vld [vmem:[%s4896_s6 + $0x38] sm:$0xff]  ;;  %v82_v46 = vld [vmem:[%s4896_s6 + $0x50] sm:$0xff] }
 0x1dd   :  { %v3718_v20 = vcombine.high %v128_v51, %v132_v57  ;;  %v3736_v32 = vcombine.low %v128_v51, %v132_v57  ;;  %v3747_v42 = vcombine.high %v74_v21, %v78_v27  ;;  %v3753_v51 = vcombine.high %v75_v29, %v79_v30  ;;  %v86_v57 = vld [vmem:[%s4896_s6 + $0x70] sm:$0xff]  ;;  %5046 = vst [vmem:[#allocation14_spill] sm:$0xff] %v3769_v37  ;;  %v91_v27 = vld [vmem:[%s4896_s6 + $0x98] sm:$0xff] }
 0x1de   :  { %5039 = vst [vmem:[#allocation7_spill] sm:$0xff] %v3673_v36  ;;  %833 = vmatpush1.bf16.msra.mxu0 %v3664_v33  ;;  %5040 = vst [vmem:[#allocation8_spill] sm:$0xff] %v3692_v48  ;;  %875 = vmatprep.subr.bf16.mxu1 %v3673_v36  ;;  %v3784_v21 = vcombine.high %v83_v0, %v87_v59  ;;  %v3805_v36 = vcombine.low %v83_v0, %v87_v59 }
 0x1df   :  { %834 = vmatprep.subr.bf16.mxu0 %v3670_v35  ;;  %876 = vmatpush1.bf16.msra.mxu1 %v3692_v48  ;;  %5042 = vst [vmem:[#allocation10_spill] sm:$0xff] %v3716_v14  ;;  %5045 = vst [vmem:[#allocation13_spill] sm:$0xff] %v3753_v51  ;;  %v94_v48 = vld [vmem:[%s4896_s6 + $0xb0] sm:$0xff] }
 0x1e0   :  { %877 = vmatprep.subr.bf16.mxu1 %v3700_v52  ;;  %v90_v52 = vld [vmem:[%s4896_s6 + $0x90] sm:$0xff]  ;;  %5049 = vst [vmem:[#allocation17_spill] sm:$0xff] %v3784_v21  ;;  %5051 = vst [vmem:[#allocation19_spill] sm:$0xff] %v3805_v36 }
 0x1e1   :  { %v3807_v34 = vcombine.high %v90_v52, %v94_v48  ;;  %v3821_v0 = vcombine.low %v90_v52, %v94_v48  ;;  %v110_v48 = vld [vmem:[%s4896_s6 + $0x130] sm:$0xff]  ;;  %v107_v52 = vld [vmem:[%s4896_s6 + $0x118] sm:$0xff] }
 0x1e2   :  { %835 = vmatpush1.bf16.msra.mxu0 %v3688_v47 }
 0x1e3   :  { %836 = vmatprep.subr.bf16.mxu0 %v3694_v50  ;;  %878 = vmatpush1.bf16.msra.mxu1 %v3716_v14  ;;  %v3775_v14 = vcombine.high %v82_v46, %v86_v57  ;;  %5052 = vst [vmem:[#allocation20_spill] sm:$0xff] %v3807_v34  ;;  %5055 = vst [vmem:[#allocation22_spill] sm:$0xff] %v3821_v0 }
 0x1e4   :  { %879 = vmatprep.subr.bf16.mxu1 %v3724_v22  ;;  %v3773_v22 = vcombine.low %v75_v29, %v79_v30  ;;  %v95_v29 = vld [vmem:[%s4896_s6 + $0xb8] sm:$0xff]  ;;  %v3795_v30 = vcombine.low %v82_v46, %v86_v57  ;;  %v5054_v57 = vmov 0  }
 0x1e5   :  { %5048 = vst [vmem:[#allocation16_spill] sm:$0xff] %v3775_v14  ;;  %v3810_v46 = vcombine.high %v91_v27, %v95_v29  ;;  %v3825_v59 = vcombine.low %v91_v27, %v95_v29  ;;  %v111_v27 = vld [vmem:[%s4896_s6 + $0x138] sm:$0xff] }
 0x1e6   :  { %837 = vmatpush1.bf16.msra.mxu0 %v3712_v60  ;;  %5047 = vst [vmem:[#allocation15_spill] sm:$0xff] %v3773_v22  ;;  %5050 = vst [vmem:[#allocation18_spill] sm:$0xff] %v3795_v30 }
 0x1e7   :  { %838 = vmatprep.subr.bf16.mxu0 %v3718_v20  ;;  %880 = vmatpush1.bf16.msra.mxu1 %v3745_v41  ;;  %v102_v41 = vld [vmem:[%s4896_s6 + $0xf0] sm:$0xff]  ;;  %5053 = vst [vmem:[#allocation21_spill] sm:$0xff] %v3810_v46  ;;  %5056 = vst [vmem:[#allocation23_spill] sm:$0xff] %v3825_v59 }
 0x1e8   :  { %947 = vmatprep.subr.bf16.mxu1 %v3753_v51  ;;  %v98_v51 = vld [vmem:[%s4896_s6 + $0xd0] sm:$0xff] }
 0x1e9   :  { %v3845_v29 = vcombine.low %v98_v51, %v102_v41 }
 0x1ea   :  { %839 = vmatpush1.bf16.msra.mxu0 %v3736_v32  ;;  %898 = vmatmul.mubr.bf16.vlgmr.msra.gmra.mrb[4].mxu1 %v3763_v58 }
 0x1eb   :  { %906 = vmatprep.subr.bf16.mxu0 %v3747_v42  ;;  %948 = vmatpush1.bf16.msra.mxu1 %v3773_v22  ;;  %v103_v22 = vld [vmem:[%s4896_s6 + $0xf8] sm:$0xff]  ;;  %5059 = vst [vmem:[#allocation26_spill] sm:$0xff] %v3845_v29 }
 0x1ec   :  { %949 = vmatprep.subr.bf16.mxu1 %v3784_v21  ;;  %979 = vmatprep.mubr.bf16.mxu1 %v5054_v57  ;;  %v3827_v21 = vcombine.high %v98_v51, %v102_v41  ;;  %v118_v41 = vld [vmem:[%s4896_s6 + $0x170] sm:$0xff]  ;;  %v115_v51 = vld [vmem:[%s4896_s6 + $0x158] sm:$0xff] }
 0x1ed   :  { %857 = vmatmul.mubr.bf16.vlgmr.msra.gmra.mrb[4].mxu0 %v3763_v58 }
 0x1ee   :  { %907 = vmatpush1.bf16.msra.mxu0 %v3769_v37  ;;  %938 = vmatprep.mubr.bf16.mxu0 %v5054_v57  ;;  %v99_v37 = vld [vmem:[%s4896_s6 + $0xd8] sm:$0xff]  ;;  %5057 = vst [vmem:[#allocation24_spill] sm:$0xff] %v3827_v21 }
 0x1ef   :  { %908 = vmatprep.subr.bf16.mxu0 %v3775_v14  ;;  %950 = vmatpush1.bf16.msra.mxu1 %v3805_v36  ;;  %v3830_v14 = vcombine.high %v99_v37, %v103_v22  ;;  %v3854_v36 = vcombine.high %v107_v52, %v111_v27 }
 0x1f0   :  { %951 = vmatprep.subr.bf16.mxu1 %v3810_v46  ;;  %v3849_v46 = vcombine.low %v99_v37, %v103_v22  ;;  %v119_v37 = vld [vmem:[%s4896_s6 + $0x178] sm:$0xff]  ;;  %v3869_v22 = vcombine.low %v106_v26, %v110_v48 }
 0x1f1   :  { %5058 = vst [vmem:[#allocation25_spill] sm:$0xff] %v3830_v14  ;;  %5062 = vst [vmem:[#allocation29_spill] sm:$0xff] %v3854_v36 }
 0x1f2   :  { %909 = vmatpush1.bf16.msra.mxu0 %v3795_v30  ;;  %5060 = vst [vmem:[#allocation27_spill] sm:$0xff] %v3849_v46  ;;  %v114_v30 = vld [vmem:[%s4896_s6 + $0x150] sm:$0xff]  ;;  %5063 = vst [vmem:[#allocation30_spill] sm:$0xff] %v3869_v22 }
 0x1f3   :  { %910 = vmatprep.subr.bf16.mxu0 %v3807_v34  ;;  %952 = vmatpush1.bf16.msra.mxu1 %v3825_v59  ;;  %v3851_v34 = vcombine.high %v106_v26, %v110_v48  ;;  %v3878_v59 = vcombine.high %v115_v51, %v119_v37  ;;  %v126_v26 = vld [vmem:[%s4896_s6 + $0x1b0] sm:$0xff]  ;;  %v123_v48 = vld [vmem:[%s4896_s6 + $0x198] sm:$0xff] }
 0x1f4   :  { %953 = vmatprep.subr.bf16.mxu1 %v3830_v14  ;;  %v3873_v14 = vcombine.low %v107_v52, %v111_v27  ;;  %v127_v52 = vld [vmem:[%s4896_s6 + $0x1b8] sm:$0xff]  ;;  %v3893_v27 = vcombine.low %v114_v30, %v118_v41 }
 0x1f5   :  { %5061 = vst [vmem:[#allocation28_spill] sm:$0xff] %v3851_v34  ;;  %5066 = vst [vmem:[#allocation33_spill] sm:$0xff] %v3878_v59 }
 0x1f6   :  { %911 = vmatpush1.bf16.msra.mxu0 %v3821_v0  ;;  %5064 = vst [vmem:[#allocation31_spill] sm:$0xff] %v3873_v14  ;;  %v122_v0 = vld [vmem:[%s4896_s6 + $0x190] sm:$0xff]  ;;  %5067 = vst [vmem:[#allocation34_spill] sm:$0xff] %v3893_v27 }
 0x1f7   :  { %912 = vmatprep.subr.bf16.mxu0 %v3827_v21  ;;  %954 = vmatpush1.bf16.msra.mxu1 %v3849_v46  ;;  %v3875_v21 = vcombine.high %v114_v30, %v118_v41  ;;  %v3902_v46 = vcombine.high %v123_v48, %v127_v52  ;;  %v134_v30 = vld [vmem:[%s4896_s6 + $0x1f0] sm:$0xff]  ;;  %v131_v41 = vld [vmem:[%s4896_s6 + $0x1d8] sm:$0xff] }
 0x1f8   :  { %955 = vmatprep.subr.bf16.mxu1 %v3854_v36  ;;  %v3897_v36 = vcombine.low %v115_v51, %v119_v37  ;;  %v135_v51 = vld [vmem:[%s4896_s6 + $0x1f8] sm:$0xff]  ;;  %v3917_v37 = vcombine.low %v122_v0, %v126_v26 }
 0x1f9   :  { %5065 = vst [vmem:[#allocation32_spill] sm:$0xff] %v3875_v21  ;;  %5070 = vst [vmem:[#allocation37_spill] sm:$0xff] %v3902_v46 }
 0x1fa   :  { %913 = vmatpush1.bf16.msra.mxu0 %v3845_v29  ;;  %5068 = vst [vmem:[#allocation35_spill] sm:$0xff] %v3897_v36  ;;  %v130_v29 = vld [vmem:[%s4896_s6 + $0x1d0] sm:$0xff]  ;;  %5071 = vst [vmem:[#allocation38_spill] sm:$0xff] %v3917_v37 }
 0x1fb   :  { %914 = vmatprep.subr.bf16.mxu0 %v3851_v34  ;;  %956 = vmatpush1.bf16.msra.mxu1 %v3873_v14  ;;  %v3899_v34 = vcombine.high %v122_v0, %v126_v26  ;;  %v3926_v14 = vcombine.high %v131_v41, %v135_v51  ;;  %v3933_v0 = vcombine.low %v131_v41, %v135_v51  ;;  %v3938_v26 = vld [vmem:[%s4897_s7 + $0x4] ss:$8 sps:$4 sm:$0xff]   ;;  %v3968_v41 = vld [vmem:[%s4898_s8 + $0x14] ss:$8 sps:$4 sm:$0xff]   ;;  %v3976_v51 = vld [vmem:[%s4897_s7 + $0x10] ss:$8 sps:$4 sm:$0xff]  }
 0x1fc   :  { %957 = vmatprep.subr.bf16.mxu1 %v3878_v59  ;;  %v3921_v59 = vcombine.low %v123_v48, %v127_v52  ;;  %5077 = vst [vmem:[#allocation44_spill] sm:$0xff] %v3938_v26  ;;  %v3944_v48 = vld [vmem:[%s4898_s8 + $0x4] ss:$8 sps:$4 sm:$0xff]   ;;  %v3957_v52 = vld [vmem:[%s4898_s8] ss:$8 sps:$4 sm:$0xff]   ;;  %5082 = vst [vmem:[#allocation49_spill] sm:$0xff] %v3968_v41 }
 0x1fd   :  { %5069 = vst [vmem:[#allocation36_spill] sm:$0xff] %v3899_v34  ;;  %5074 = vst [vmem:[#allocation41_spill] sm:$0xff] %v3926_v14 }
 0x1fe   :  { %915 = vmatpush1.bf16.msra.mxu0 %v3869_v22  ;;  %5072 = vst [vmem:[#allocation39_spill] sm:$0xff] %v3921_v59  ;;  %v3929_v22 = vcombine.low %v130_v29, %v134_v30  ;;  %5076 = vst [vmem:[#allocation43_spill] sm:$0xff] %v3933_v0 }
 0x1ff   :  { %916 = vmatprep.subr.bf16.mxu0 %v3875_v21  ;;  %958 = vmatpush1.bf16.msra.mxu1 %v3897_v36  ;;  %v3923_v21 = vcombine.high %v130_v29, %v134_v30  ;;  %5078 = vst [vmem:[#allocation45_spill] sm:$0xff] %v3944_v48  ;;  %v3950_v29 = vld [vmem:[%s4897_s7] ss:$8 sps:$4 sm:$0xff]   ;;  %5080 = vst [vmem:[#allocation47_spill] sm:$0xff] %v3957_v52  ;;  %v3962_v30 = vld [vmem:[%s4897_s7 + $0x14] ss:$8 sps:$4 sm:$0xff]  }
 0x200   :  { %959 = vmatprep.subr.bf16.mxu1 %v3902_v46  ;;  %5075 = vst [vmem:[#allocation42_spill] sm:$0xff] %v3929_v22  ;;  %5079 = vst [vmem:[#allocation46_spill] sm:$0xff] %v3950_v29 }
 0x201   :  { %5073 = vst [vmem:[#allocation40_spill] sm:$0xff] %v3923_v21  ;;  %5081 = vst [vmem:[#allocation48_spill] sm:$0xff] %v3962_v30 }
 0x202   :  { %917 = vmatpush1.bf16.msra.mxu0 %v3893_v27  ;;  %5083 = vst [vmem:[#allocation50_spill] sm:$0xff] %v3976_v51 }
 0x203   :  { %918 = vmatprep.subr.bf16.mxu0 %v3899_v34  ;;  %960 = vmatpush1.bf16.msra.mxu1 %v3921_v59 }
 0x204   :  { %961 = vmatprep.subr.bf16.mxu1 %v3926_v14 }
 0x206   :  { %919 = vmatpush1.bf16.msra.mxu0 %v3917_v37 }
 0x207   :  { %920 = vmatprep.subr.bf16.mxu0 %v3923_v21  ;;  %962 = vmatpush1.bf16.msra.mxu1 %v3933_v0 }
 0x208   :  { %2836 = vmatprep.subr.bf16.mxu1 %v3944_v48  ;;  %v3983_v48 = vld [vmem:[%s4898_s8 + $0x10] ss:$8 sps:$4 sm:$0xff]  }
 0x209   :  { %5084 = vst [vmem:[#allocation51_spill] sm:$0xff] %v3983_v48 }
 0x20a   :  { %921 = vmatpush1.bf16.msra.mxu0 %v3929_v22  ;;  %980 = vmatmul.mubr.bf16.vlgmr.msra.gmra.mrb[8].mxu1 %v3763_v58 }
 0x20b   :  { %2804 = vmatprep.subr.bf16.mxu0 %v3938_v26  ;;  %2838 = vmatpush1.bf16.msra.mxu1 %v3957_v52  ;;  %v5087_v52 = vmov 0.0   ;;  %v4014_v26 = vld [vmem:[%s4897_s7 + $0x34] ss:$8 sps:$4 sm:$0xff]  }
 0x20c   :  { %2840 = vmatprep.subr.bf16.mxu1 %v3968_v41  ;;  %1176 = vmatprep.mubr.f32.mxu1 %v5087_v52  ;;  %v4009_v41 = vld [vmem:[%s4898_s8 + $0x20] ss:$8 sps:$4 sm:$0xff]   ;;  %5090 = vst [vmem:[#allocation56_spill] sm:$0xff] %v4014_v26 }
 0x20d   :  { %939 = vmatmul.mubr.bf16.vlgmr.msra.gmra.mrb[8].mxu0 %v3763_v58  ;;  %v3988_v58 = vld [vmem:[%s4897_s7 + $0x24] ss:$8 sps:$4 sm:$0xff]   ;;  %5089 = vst [vmem:[#allocation55_spill] sm:$0xff] %v4009_v41 }
 0x20e   :  { %2806 = vmatpush1.bf16.msra.mxu0 %v3950_v29  ;;  %5085 = vst [vmem:[#allocation52_spill] sm:$0xff] %v3988_v58  ;;  %v3994_v29 = vld [vmem:[%s4898_s8 + $0x24] ss:$8 sps:$4 sm:$0xff]   ;;  %1105 = vmatprep.mubr.f32.mxu0 %v5087_v52 }
 0x20f   :  { %2808 = vmatprep.subr.bf16.mxu0 %v3962_v30  ;;  %5086 = vst [vmem:[#allocation53_spill] sm:$0xff] %v3994_v29  ;;  %v4002_v30 = vld [vmem:[%s4897_s7 + $0x20] ss:$8 sps:$4 sm:$0xff]   ;;  %2842 = vmatpush1.bf16.msra.mxu1 %v3983_v48  ;;  %v4038_v48 = vld [vmem:[%s4897_s7 + $0x44] ss:$8 sps:$4 sm:$0xff]  }
 0x210   :  { %5088 = vst [vmem:[#allocation54_spill] sm:$0xff] %v4002_v30  ;;  %2844 = vmatprep.subr.bf16.mxu1 %v3994_v29  ;;  %v4033_v29 = vld [vmem:[%s4898_s8 + $0x30] ss:$8 sps:$4 sm:$0xff]   ;;  %5094 = vst [vmem:[#allocation60_spill] sm:$0xff] %v4038_v48 }
 0x211   :  { %5093 = vst [vmem:[#allocation59_spill] sm:$0xff] %v4033_v29 }
 0x212   :  { %2810 = vmatpush1.bf16.msra.mxu0 %v3976_v51  ;;  %v4020_v51 = vld [vmem:[%s4898_s8 + $0x34] ss:$8 sps:$4 sm:$0xff]  }
 0x213   :  { %2812 = vmatprep.subr.bf16.mxu0 %v3988_v58  ;;  %5091 = vst [vmem:[#allocation57_spill] sm:$0xff] %v4020_v51  ;;  %v4026_v58 = vld [vmem:[%s4897_s7 + $0x30] ss:$8 sps:$4 sm:$0xff]   ;;  %2846 = vmatpush1.bf16.msra.mxu1 %v4009_v41 }
 0x214   :  { %5092 = vst [vmem:[#allocation58_spill] sm:$0xff] %v4026_v58  ;;  %2848 = vmatprep.subr.bf16.mxu1 %v4020_v51  ;;  %v4057_v51 = vld [vmem:[%s4898_s8 + $0x40] ss:$8 sps:$4 sm:$0xff]  }
 0x215   :  { %5097 = vst [vmem:[#allocation63_spill] sm:$0xff] %v4057_v51 }
 0x216   :  { %2814 = vmatpush1.bf16.msra.mxu0 %v4002_v30  ;;  %v4044_v30 = vld [vmem:[%s4898_s8 + $0x44] ss:$8 sps:$4 sm:$0xff]  }
 0x217   :  { %2816 = vmatprep.subr.bf16.mxu0 %v4014_v26  ;;  %5095 = vst [vmem:[#allocation61_spill] sm:$0xff] %v4044_v30  ;;  %v4050_v26 = vld [vmem:[%s4897_s7 + $0x40] ss:$8 sps:$4 sm:$0xff]   ;;  %2850 = vmatpush1.bf16.msra.mxu1 %v4033_v29 }
 0x218   :  { %5096 = vst [vmem:[#allocation62_spill] sm:$0xff] %v4050_v26  ;;  %2852 = vmatprep.subr.bf16.mxu1 %v4044_v30  ;;  %v4071_v30 = vld [vmem:[%s4898_s8 + $0x54] ss:$8 sps:$4 sm:$0xff]  }
 0x219   :  { %5099 = vst [vmem:[#allocation65_spill] sm:$0xff] %v4071_v30 }
 0x21a   :  { %2818 = vmatpush1.bf16.msra.mxu0 %v4026_v58 }
 0x21b   :  { %2820 = vmatprep.subr.bf16.mxu0 %v4038_v48  ;;  %2854 = vmatpush1.bf16.msra.mxu1 %v4057_v51  ;;  %v4066_v48 = vld [vmem:[%s4897_s7 + $0x54] ss:$8 sps:$4 sm:$0xff]   ;;  %v4076_v51 = vld [vmem:[%s4897_s7 + $0x50] ss:$8 sps:$4 sm:$0xff]  }
 0x21c   :  { %5098 = vst [vmem:[#allocation64_spill] sm:$0xff] %v4066_v48  ;;  %5100 = vst [vmem:[#allocation66_spill] sm:$0xff] %v4076_v51  ;;  %2856 = vmatprep.subr.bf16.mxu1 %v4071_v30  ;;  %v4119_v30 = vld [vmem:[%s4898_s8 + $0x74] ss:$8 sps:$4 sm:$0xff]  }
 0x21d   :  { %5107 = vst [vmem:[#allocation73_spill] sm:$0xff] %v4119_v30 }
 0x21e   :  { %2822 = vmatpush1.bf16.msra.mxu0 %v4050_v26 }
 0x21f   :  { %2824 = vmatprep.subr.bf16.mxu0 %v4066_v48  ;;  %v4213_v48 = vld [vmem:[%s4900_s9 + $0x58] sm:$0xff]  }
 0x220   :  { %5116 = vst [vmem:[#allocation82_spill] sm:$0xff] %v4213_v48 }
 0x222   :  { %2826 = vmatpush1.bf16.msra.mxu0 %v4076_v51  ;;  %v4105_v51 = vld [vmem:[%s4898_s8 + $0x60] ss:$8 sps:$4 sm:$0xff]  }
 0x223   :  { %5105 = vst [vmem:[#allocation71_spill] sm:$0xff] %v4105_v51 }
 0x267   :  { %v487_v58 = vpop.xlane.xlu0 %486 }
 0x268   :  { %v488_v41 = vsub.f32 %v3536_v31, %v487_v58  ;;  %v4081_v31 = vld [vmem:[%s4898_s8 + $0x50] ss:$8 sps:$4 sm:$0xff]   ;;  %v4100_v58 = vld [vmem:[%s4897_s7 + $0x60] ss:$8 sps:$4 sm:$0xff]  }
 0x269   :  { %5101 = vst [vmem:[#allocation67_spill] sm:$0xff] %v4081_v31  ;;  %2858 = vmatpush1.bf16.msra.mxu1 %v4081_v31  ;;  %5104 = vst [vmem:[#allocation70_spill] sm:$0xff] %v4100_v58  ;;  %v4114_v31 = vld [vmem:[%s4897_s7 + $0x74] ss:$8 sps:$4 sm:$0xff]  }
 0x26a   :  { %v489_v0 = vmul.f32 1.442695, %v488_v41  ;;  %v4095_v41 = vld [vmem:[%s4898_s8 + $0x64] ss:$8 sps:$4 sm:$0xff]   ;;  %5106 = vst [vmem:[#allocation72_spill] sm:$0xff] %v4114_v31 }
 0x26b   :  { %5103 = vst [vmem:[#allocation69_spill] sm:$0xff] %v4095_v41  ;;  %2860 = vmatprep.subr.bf16.mxu1 %v4095_v41  ;;  %v4208_v41 = vld [vmem:[%s4900_s9 + $0x10] sm:$0xff]  }
 0x26c   :  { %3257 = vpow2.f32 %v489_v0  ;;  %v4090_v0 = vld [vmem:[%s4897_s7 + $0x64] ss:$8 sps:$4 sm:$0xff]   ;;  %5115 = vst [vmem:[#allocation81_spill] sm:$0xff] %v4208_v41 }
 0x26d   :  { %5102 = vst [vmem:[#allocation68_spill] sm:$0xff] %v4090_v0  ;;  %2828 = vmatprep.subr.bf16.mxu0 %v4090_v0  ;;  %2862 = vmatpush1.bf16.msra.mxu1 %v4105_v51  ;;  %v4124_v0 = vld [vmem:[%s4897_s7 + $0x70] ss:$8 sps:$4 sm:$0xff]  }
 0x26e   :  { %2830 = vmatpush1.bf16.msra.mxu0 %v4100_v58  ;;  %5108 = vst [vmem:[#allocation74_spill] sm:$0xff] %v4124_v0  ;;  %v4129_v58 = vld [vmem:[%s4898_s8 + $0x70] ss:$8 sps:$4 sm:$0xff]   ;;  %2864 = vmatprep.subr.bf16.mxu1 %v4119_v30  ;;  %v4188_v30 = vld [vmem:[%s4900_s9 + $0x8] sm:$0xff]  }
 0x26f   :  { %5109 = vst [vmem:[#allocation75_spill] sm:$0xff] %v4129_v58  ;;  %2832 = vmatprep.subr.bf16.mxu0 %v4114_v31  ;;  %5113 = vst [vmem:[#allocation79_spill] sm:$0xff] %v4188_v30 }
 0x271   :  { %2866 = vmatpush1.bf16.msra.mxu1 %v4129_v58 }
 0x272   :  { %2834 = vmatpush1.bf16.msra.mxu0 %v4124_v0  ;;  %2723 = vmatprep.subr.bf16.mxu1 %v5087_v52 }
 0x274   :  { %1177 = vmatmul.mubr.f32.vlgmr.msra.gmra.mrb[12].mxu1 %v3741_v40 }
 0x275   :  { %2724 = vmatpush3.bf16.msra.mxu1 %v3410_v1  ;;  %2739 = vmatprep.mubr.msk.bf16.mxu1 %vm3348_vm0, %v5087_v52 }
 0x276   :  { %v3258_v22 = vpop.eup %3257  ;;  %2725 = vmatprep.subr.bf16.mxu1 %v5087_v52 }
 0x277   :  { %491 = vadd.xlane.f32.xlu0 %v3258_v22 }
 0x279   :  { %2726 = vmatpush3.bf16.msra.mxu1 %v3421_v2 }
 0x27a   :  { %2727 = vmatprep.subr.bf16.mxu1 %v5087_v52 }
 0x27d   :  { %2728 = vmatpush3.bf16.msra.mxu1 %v3428_v3 }
 0x27e   :  { %2729 = vmatprep.subr.bf16.mxu1 %v5087_v52 }
 0x281   :  { %2730 = vmatpush3.bf16.msra.mxu1 %v3440_v5 }
 0x282   :  { %2731 = vmatprep.subr.bf16.mxu1 %v5087_v52 }
 0x285   :  { %2732 = vmatpush3.bf16.msra.mxu1 %v3452_v7 }
 0x286   :  { %2733 = vmatprep.subr.bf16.mxu1 %v5087_v52 }
 0x289   :  { %2734 = vmatpush3.bf16.msra.mxu1 %v3468_v9  ;;  %v4166_v9 = vld [vmem:[%s4900_s9 + $0x40] sm:$0xff]  }
 0x28a   :  { %2735 = vmatprep.subr.bf16.mxu1 %v5087_v52  ;;  %5110 = vst [vmem:[#allocation76_spill] sm:$0xff] %v4166_v9  ;;  %2868 = vmatprep.subr.bf16.mxu0 %v4166_v9 }
 0x28d   :  { %2736 = vmatpush3.bf16.msra.mxu1 %v3482_v11  ;;  %v4171_v11 = vld [vmem:[%s4900_s9] sm:$0xff]  }
 0x28e   :  { %2737 = vmatprep.subr.bf16.mxu1 %v5087_v52  ;;  %5111 = vst [vmem:[#allocation77_spill] sm:$0xff] %v4171_v11 }
 0x291   :  { %2738 = vmatpush3.bf16.msra.mxu1 %v3491_v12  ;;  %v4176_v12 = vld [vmem:[%s4900_s9 + $0x48] sm:$0xff]  }
 0x292   :  { %1366 = vmatprep.subr.bf16.mxu1 %v3552_v39  ;;  %5112 = vst [vmem:[#allocation78_spill] sm:$0xff] %v4176_v12 }
 0x2bd   :  { %v4161_v7 = vpop.f32.mrb[4].mxu1 }
 0x2c0   :  { %v4159_v5 = vpop.f32.mrb[4].mxu0 }
 0x304   :  { %v492_v1 = vpop.xlane.xlu0 %491 }
 0x305   :  { %3259 = vrcp.f32 %v492_v1  ;;  %v4180_v1 = vpop.f32.mrb[5].mxu1 }
 0x306   :  { %v903_v39 = vpop.f32.mrb[6].mxu1 }
 0x307   :  { %v904_v0 = vpop.f32.mrb[7].mxu1 }
 0x308   :  { %v4192_v51 = vpop.f32.mrb[8].mxu1 }
 0x30f   :  { %v3260_v2 = vpop.eup %3259 }
 0x310   :  { %v4155_v3 = vmul.f32 %v3260_v2, %v3258_v22  ;;  %v4178_v22 = vpop.f32.mrb[5].mxu0 }
 0x311   :  { %v862_v2 = vpop.f32.mrb[6].mxu0 }
 0x312   :  { %495 = vmax.xlane.f32.xlu1 %v4155_v3  ;;  %1106 = vmatmul.mubr.f32.vlgmr.msra.gmra.mrb[12].mxu0 %v4155_v3  ;;  %v863_v58 = vpop.f32.mrb[7].mxu0  ;;  %v4197_v2 = vld [vmem:[%s4900_s9 + $0x50] sm:$0xff]  }
 0x313   :  { %2870 = vmatpush3.bf16.msra.mxu0 %v4171_v11  ;;  %v4190_v31 = vpop.f32.mrb[8].mxu0  ;;  %5114 = vst [vmem:[#allocation80_spill] sm:$0xff] %v4197_v2  ;;  %v4201_v58 = vpop.f32.mrb[9].mxu1 }
 0x314   :  { %2872 = vmatprep.subr.bf16.mxu0 %v4176_v12  ;;  %v4199_v39 = vpop.f32.mrb[9].mxu0  ;;  %v985_v12 = vpop.f32.mrb[10].mxu1 }
 0x315   :  { %v944_v0 = vpop.f32.mrb[10].mxu0  ;;  %v986_v9 = vpop.f32.mrb[11].mxu1  ;;  %v4232_v12 = vld [vmem:[%s4900_s9 + $0x20] sm:$0xff]  }
 0x316   :  { %v945_v11 = vpop.f32.mrb[11].mxu0  ;;  %v4220_v9 = vld [vmem:[%s4900_s9 + $0x18] sm:$0xff]   ;;  %5119 = vst [vmem:[#allocation85_spill] sm:$0xff] %v4232_v12  ;;  %v4237_v0 = vld [vmem:[%s4900_s9 + $0x68] sm:$0xff]  }
 0x317   :  { %2874 = vmatpush3.bf16.msra.mxu0 %v4188_v30  ;;  %5117 = vst [vmem:[#allocation83_spill] sm:$0xff] %v4220_v9  ;;  %v4225_v11 = vld [vmem:[%s4900_s9 + $0x60] sm:$0xff]   ;;  %5120 = vst [vmem:[#allocation86_spill] sm:$0xff] %v4237_v0 }
 0x318   :  { %2876 = vmatprep.subr.bf16.mxu0 %v4197_v2  ;;  %5118 = vst [vmem:[#allocation84_spill] sm:$0xff] %v4225_v11 }
 0x31b   :  { %2878 = vmatpush3.bf16.msra.mxu0 %v4208_v41  ;;  %v4262_v41 = vld [vmem:[%s4900_s9 + $0x78] sm:$0xff]  }
 0x31c   :  { %2880 = vmatprep.subr.bf16.mxu0 %v4213_v48  ;;  %5124 = vst [vmem:[#allocation90_spill] sm:$0xff] %v4262_v41 }
 0x31f   :  { %2882 = vmatpush3.bf16.msra.mxu0 %v4220_v9  ;;  %v4244_v9 = vld [vmem:[%s4900_s9 + $0x28] sm:$0xff]  }
 0x320   :  { %2884 = vmatprep.subr.bf16.mxu0 %v4225_v11  ;;  %5121 = vst [vmem:[#allocation87_spill] sm:$0xff] %v4244_v9  ;;  %v4249_v11 = vld [vmem:[%s4900_s9 + $0x70] sm:$0xff]  }
 0x321   :  { %5122 = vst [vmem:[#allocation88_spill] sm:$0xff] %v4249_v11 }
 0x323   :  { %2886 = vmatpush3.bf16.msra.mxu0 %v4232_v12  ;;  %v4256_v12 = vld [vmem:[%s4900_s9 + $0x30] sm:$0xff]  }
 0x324   :  { %2888 = vmatprep.subr.bf16.mxu0 %v4237_v0  ;;  %5123 = vst [vmem:[#allocation89_spill] sm:$0xff] %v4256_v12 }
 0x327   :  { %2890 = vmatpush3.bf16.msra.mxu0 %v4244_v9 }
 0x328   :  { %2892 = vmatprep.subr.bf16.mxu0 %v4249_v11  ;;  %v4268_v11 = vld [vmem:[%s4900_s9 + $0x38] sm:$0xff]  }
 0x329   :  { %5125 = vst [vmem:[#allocation91_spill] sm:$0xff] %v4268_v11 }
 0x32b   :  { %2894 = vmatpush3.bf16.msra.mxu0 %v4256_v12  ;;  %v4273_v12 = vcvt.s32.f32 %v3531_v28 }
 0x32c   :  { %2896 = vmatprep.subr.bf16.mxu0 %v4262_v41  ;;  %v989_v41 = vsel %vm988_vm3, %v4155_v3, 0.0 }
 0x32d   :  { %5126 = vst [vmem:[#allocation92_spill] sm:$0xff] %v4273_v12 }
 0x32f   :  { %2898 = vmatpush3.bf16.msra.mxu0 %v4268_v11  ;;  %v1000_v11 = vsel %vm999_vm4, %v4155_v3, 0.0 }
 0x330   :  { %2743 = vmatprep.subr.bf16.mxu0 %v5087_v52 }
 0x347   :  { %v1178_v0 = vpop.f32.mrb[12].mxu1 }
 0x348   :  { %v1180_v48 = vpop.f32.mrb[13].mxu1 }
 0x39f   :  { %v496_v9 = vpop.xlane.xlu1 %495 }
 0x3a0   :  { %vm497_vm2 = vcmp.ge.f32.partialorder %v4155_v3, %v496_v9  ;;  %v1036_v9 = vsel %vm1035_vm7, %v4155_v3, 0.0 }
 0x3a1   :  { %v498_v2 = vsel %vm497_vm2, %v4273_v12, 128.0 }
 0x3a2   :  { %499 = vmin.xlane.f32.xlu1 %v498_v2  ;;  %v1012_v2 = vsel %vm1011_vm5, %v4155_v3, 0.0 }
 0x3a6   :  { %990 = vadd.xlane.f32.xlu1 %v989_v41  ;;  %v1024_v41 = vsel %vm1023_vm6, %v4155_v3, 0.0 }
 0x3aa   :  { %1001 = vadd.xlane.f32.xlu1 %v1000_v11 }
 0x3ae   :  { %1013 = vadd.xlane.f32.xlu1 %v1012_v2  ;;  %v5130_v2 = vld [vmem:[#allocation7_spill] sm:$0xff] }
 0x3b2   :  { %1025 = vadd.xlane.f32.xlu1 %v1024_v41  ;;  %v5131_v41 = vld [vmem:[#allocation8_spill] sm:$0xff] }
 0x3b6   :  { %1037 = vadd.xlane.f32.xlu1 %v1036_v9  ;;  %v5132_v9 = vld [vmem:[#allocation9_spill] sm:$0xff] }
 0x3e5   :  { %v1107_v11 = vpop.f32.mrb[12].mxu0 }
 0x3e6   :  { %v1183_v30 = vmul.f32 %v1178_v0, %v1107_v11  ;;  %v1109_v26 = vpop.f32.mrb[13].mxu0  ;;  %v5129_v0 = vld [vmem:[#allocation6_spill] sm:$0xff] }
 0x3e7   :  { %v1184_v29 = vmul.f32 %v1180_v48, %v1109_v26  ;;  %v5133_v11 = vld [vmem:[#allocation10_spill] sm:$0xff] }
 0x3e9   :  { %1249 = vmatprep.mubr.f32.mxu0 %v1184_v29 }
 0x3ea   :  { %1250 = vmatmul.mubr.f32.vlgmr.msra.gmra.mrb[14].mxu0 %v1183_v30 }
 0x3eb   :  { %2744 = vmatpush3.bf16.msra.mxu0 %v3434_v4  ;;  %2759 = vmatprep.mubr.msk.bf16.mxu0 %vm3348_vm0, %v5087_v52 }
 0x3ec   :  { %2745 = vmatprep.subr.bf16.mxu0 %v5087_v52 }
 0x3ef   :  { %2746 = vmatpush3.bf16.msra.mxu0 %v3447_v6  ;;  %v5018_v6 = vmov 1.0|1.0  }
 0x3f0   :  { %2747 = vmatprep.subr.bf16.mxu0 %v5087_v52 }
 0x3f3   :  { %2748 = vmatpush3.bf16.msra.mxu0 %v3461_v8 }
 0x3f4   :  { %2749 = vmatprep.subr.bf16.mxu0 %v5087_v52 }
 0x3f7   :  { %2750 = vmatpush3.bf16.msra.mxu0 %v3475_v10 }
 0x3f8   :  { %2751 = vmatprep.subr.bf16.mxu0 %v5087_v52 }
 0x3fb   :  { %2752 = vmatpush3.bf16.msra.mxu0 %v3501_v15 }
 0x3fc   :  { %2753 = vmatprep.subr.bf16.mxu0 %v5087_v52 }
 0x3ff   :  { %2754 = vmatpush3.bf16.msra.mxu0 %v3508_v16 }
 0x400   :  { %2755 = vmatprep.subr.bf16.mxu0 %v5087_v52 }
 0x403   :  { %2756 = vmatpush3.bf16.msra.mxu0 %v3515_v17 }
 0x404   :  { %2757 = vmatprep.subr.bf16.mxu0 %v5087_v52 }
 0x407   :  { %2758 = vmatpush3.bf16.msra.mxu0 %v3522_v18 }
 0x408   :  { %1407 = vmatprep.subr.bf16.mxu0 %v3565_v44 }
 0x42f   :  { %v4315_v4 = vpop.xlane.xlu1 %499 }
 0x430   :  { %5127 = vst [vmem:[#allocation93_spill] sm:$0xff] %v4315_v4  ;;  %vm501_vm8 = vcmp.eq.f32.partialorder %v4273_v12, %v4315_v4 }
 0x431   :  { %vm2439_vm9 = vmpackc.low %vm501_vm8, %vm501_vm8 }
 0x432   :  { %2740 = vmatmul.mubr.msk.bf16.vlgmr.msra.gmra.mrb[16].mxu1 %vm2439_vm9, %v5018_v6  ;;  %v1006_v6 = vsel %vm1005_vm11, %v4155_v3, 0.0 }
 0x433   :  { %1367 = vmatpush1.bf16.msra.mxu1 %v3550_v38  ;;  %1398 = vmatprep.mubr.bf16.mxu1 %v5054_v57 }
 0x434   :  { %1368 = vmatprep.subr.bf16.mxu1 %v3567_v45 }
 0x437   :  { %1369 = vmatpush1.bf16.msra.mxu1 %v3592_v53 }
 0x438   :  { %1370 = vmatprep.subr.bf16.mxu1 %v3598_v55 }
 0x43b   :  { %1371 = vmatpush1.bf16.msra.mxu1 %v3616_v61 }
 0x43c   :  { %1372 = vmatprep.subr.bf16.mxu1 %v3622_v63 }
 0x43f   :  { %1373 = vmatpush1.bf16.msra.mxu1 %v3640_v23 }
 0x440   :  { %1374 = vmatprep.subr.bf16.mxu1 %v3646_v25 }
 0x443   :  { %1375 = vmatpush1.bf16.msra.mxu1 %v3664_v33 }
 0x444   :  { %1376 = vmatprep.subr.bf16.mxu1 %v3670_v35 }
 0x447   :  { %1377 = vmatpush1.bf16.msra.mxu1 %v3688_v47 }
 0x448   :  { %1378 = vmatprep.subr.bf16.mxu1 %v3694_v50 }
 0x44b   :  { %1379 = vmatpush1.bf16.msra.mxu1 %v3712_v60 }
 0x44c   :  { %1380 = vmatprep.subr.bf16.mxu1 %v3718_v20 }
 0x44f   :  { %1381 = vmatpush1.bf16.msra.mxu1 %v3736_v32 }
 0x450   :  { %1448 = vmatprep.subr.bf16.mxu1 %v3747_v42 }
 0x4bd   :  { %v2574_v8 = vpop.f32.mrb[14].mxu0 }
 0x4be   :  { %v2575_v10 = vpop.f32.mrb[15].mxu0 }
 0x4bf   :  { %v4337_v15 = vadd.f32 %v2575_v10, %v2574_v8  ;;  %v5134_v8 = vld [vmem:[#allocation11_spill] sm:$0xff]  ;;  %v5135_v10 = vld [vmem:[#allocation12_spill] sm:$0xff] }
 0x505   :  { %v1299_v16 = vpop.f32.mrb[16].mxu1 }
 0x506   :  { %v1300_v17 = vadd.f32 %v1299_v16, %v3528_v19  ;;  %v2741_v18 = vpop.f32.mrb[17].mxu1  ;;  %v5128_v19 = vld [vmem:[#allocation5_spill] sm:$0xff] }
 0x507   :  { %v1302_v26 = vpop.f32.mrb[18].mxu1  ;;  %v5136_v16 = vld [vmem:[#allocation13_spill] sm:$0xff] }
 0x508   :  { %3261 = vtanh.f32 %v1300_v17  ;;  %v2742_v48 = vpop.f32.mrb[19].mxu1 }
 0x512   :  { %v3262_v29 = vpop.eup %3261 }
 0x513   :  { %v1306_v30 = vpack.c.bf16 %v3262_v29, %v3262_v29 }
 0x515   :  { %2760 = vmatmul.mubr.bf16.vlgmr.msra.gmra.mrb[16].mxu0 %v1306_v30  ;;  %v994_v30 = vsel %vm993_vm10, %v4155_v3, 0.0 }
 0x516   :  { %1408 = vmatpush1.bf16.msra.mxu0 %v3563_v43  ;;  %1439 = vmatprep.mubr.bf16.mxu0 %v5054_v57 }
 0x517   :  { %1409 = vmatprep.subr.bf16.mxu0 %v3579_v49 }
 0x51a   :  { %1410 = vmatpush1.bf16.msra.mxu0 %v3596_v54 }
 0x51b   :  { %1411 = vmatprep.subr.bf16.mxu0 %v3601_v56 }
 0x51e   :  { %1412 = vmatpush1.bf16.msra.mxu0 %v3620_v62 }
 0x51f   :  { %1413 = vmatprep.subr.bf16.mxu0 %v3625_v13 }
 0x522   :  { %1414 = vmatpush1.bf16.msra.mxu0 %v3644_v24 }
 0x523   :  { %1415 = vmatprep.subr.bf16.mxu0 %v5128_v19 }
 0x526   :  { %1416 = vmatpush1.bf16.msra.mxu0 %v5129_v0 }
 0x527   :  { %1417 = vmatprep.subr.bf16.mxu0 %v5130_v2 }
 0x52a   :  { %1418 = vmatpush1.bf16.msra.mxu0 %v5131_v41 }
 0x52b   :  { %1419 = vmatprep.subr.bf16.mxu0 %v5132_v9 }
 0x52e   :  { %1420 = vmatpush1.bf16.msra.mxu0 %v5133_v11 }
 0x52f   :  { %1421 = vmatprep.subr.bf16.mxu0 %v5134_v8 }
 0x532   :  { %1422 = vmatpush1.bf16.msra.mxu0 %v5135_v10 }
 0x533   :  { %1489 = vmatprep.subr.bf16.mxu0 %v5136_v16 }
 0x5e8   :  { %v1341_v17 = vpop.f32.mrb[16].mxu0 }
 0x5e9   :  { %v2761_v18 = vpop.f32.mrb[17].mxu0  ;;  %v1347_v26 = vsel %vm484_vm1, %v1341_v17, -1e+30  ;;  %v1018_v17 = vsel %vm1017_vm12, %v4155_v3, 0.0 }
 0x5ea   :  { %1348 = vmax.xlane.f32.xlu0 %v1347_v26  ;;  %v1344_v48 = vpop.f32.mrb[18].mxu0  ;;  %v1030_v18 = vsel %vm1029_vm13, %v4155_v3, 0.0 }
 0x5eb   :  { %v2762_v29 = vpop.f32.mrb[19].mxu0  ;;  %v991_v48 = vpop.xlane.xlu1 %990 }
 0x5ec   :  { %v992_v8 = vmul.f32 %v991_v48, %v3741_v40 }
 0x5ee   :  { %995 = vadd.xlane.f32.xlu0 %v994_v30 }
 0x5ef   :  { %v1002_v29 = vpop.xlane.xlu1 %1001 }
 0x5f2   :  { %1007 = vadd.xlane.f32.xlu0 %v1006_v6 }
 0x5f3   :  { %v1014_v6 = vpop.xlane.xlu1 %1013 }
 0x5f4   :  { %v1015_v0 = vmul.f32 %v1014_v6, %v4180_v1  ;;  %v5137_v6 = vld [vmem:[#allocation14_spill] sm:$0xff] }
 0x5f6   :  { %1019 = vadd.xlane.f32.xlu0 %v1018_v17  ;;  %v1003_v17 = vmul.f32 %v1002_v29, %v4178_v22 }
 0x5fa   :  { %1031 = vadd.xlane.f32.xlu0 %v1030_v18  ;;  %v1026_v18 = vpop.xlane.xlu1 %1025 }
 0x5fb   :  { %v1027_v40 = vmul.f32 %v1026_v18, %v4199_v39  ;;  %v5139_v18 = vld [vmem:[#allocation16_spill] sm:$0xff] }
 0x677   :  { %v1349_v30 = vpop.xlane.xlu0 %1348 }
 0x678   :  { %v1350_v4 = vsub.f32 %v1347_v26, %v1349_v30 }
 0x67a   :  { %v1351_v16 = vmul.f32 1.442695, %v1350_v4 }
 0x67b   :  { %v996_v10 = vpop.xlane.xlu0 %995 }
 0x67c   :  { %3263 = vpow2.f32 %v1351_v16  ;;  %v997_v11 = vmul.f32 %v996_v10, %v4159_v5  ;;  %v1038_v5 = vpop.xlane.xlu1 %1037 }
 0x67e   :  { %v998_v9 = vadd.f32 %v997_v11, %v992_v8 }
 0x67f   :  { %v1008_v41 = vpop.xlane.xlu0 %1007 }
 0x680   :  { %v1004_v2 = vadd.f32 %v1003_v17, %v998_v9  ;;  %v1009_v3 = vmul.f32 %v1008_v41, %v4161_v7  ;;  %v1039_v7 = vmul.f32 %v1038_v5, %v4201_v58  ;;  %v5138_v17 = vld [vmem:[#allocation15_spill] sm:$0xff]  ;;  %v5144_v5 = vld [vmem:[#allocation21_spill] sm:$0xff] }
 0x682   :  { %v1010_v19 = vadd.f32 %v1009_v3, %v1004_v2 }
 0x683   :  { %v1020_v26 = vpop.xlane.xlu0 %1019 }
 0x684   :  { %v1016_v4 = vadd.f32 %v1015_v0, %v1010_v19  ;;  %v1021_v30 = vmul.f32 %v1020_v26, %v4190_v31  ;;  %v5140_v26 = vld [vmem:[#allocation17_spill] sm:$0xff] }
 0x686   :  { %v3264_v24 = vpop.eup %3263  ;;  %v1022_v16 = vadd.f32 %v1021_v30, %v1016_v4  ;;  %v5141_v4 = vld [vmem:[#allocation18_spill] sm:$0xff]  ;;  %v5142_v30 = vld [vmem:[#allocation19_spill] sm:$0xff] }
 0x687   :  { %1353 = vadd.xlane.f32.xlu0 %v3264_v24  ;;  %v1032_v22 = vpop.xlane.xlu0 %1031 }
 0x688   :  { %v1028_v11 = vadd.f32 %v1027_v40, %v1022_v16  ;;  %v1033_v9 = vmul.f32 %v1032_v22, %v4192_v51  ;;  %v5143_v16 = vld [vmem:[#allocation20_spill] sm:$0xff]  ;;  %v5145_v22 = vld [vmem:[#allocation22_spill] sm:$0xff] }
 0x68a   :  { %v1034_v41 = vadd.f32 %v1033_v9, %v1028_v11  ;;  %v5146_v11 = vld [vmem:[#allocation23_spill] sm:$0xff]  ;;  %v5147_v9 = vld [vmem:[#allocation24_spill] sm:$0xff] }
 0x68c   :  { %v1040_v8 = vadd.f32 %v1039_v7, %v1034_v41  ;;  %v5148_v7 = vld [vmem:[#allocation25_spill] sm:$0xff]  ;;  %v5149_v41 = vld [vmem:[#allocation26_spill] sm:$0xff] }
 0x68e   :  { %v1255_v1 = vsub.f32 %v1040_v8, %v4337_v15  ;;  %v5150_v8 = vld [vmem:[#allocation27_spill] sm:$0xff] }
 0x690   :  { %v1256_v2 = vmax.f32 %v1255_v1, 0.0  ;;  %v5151_v1 = vld [vmem:[#allocation28_spill] sm:$0xff] }
 0x692   :  { %1257 = vadd.xlane.f32.xlu1 %v1256_v2 }
 0x714   :  { %v1354_v19 = vpop.xlane.xlu0 %1353 }
 0x715   :  { %3265 = vrcp.f32 %v1354_v19  ;;  %v5153_v19 = vld [vmem:[#allocation30_spill] sm:$0xff] }
 0x71f   :  { %v3266_v31 = vpop.eup %3265  ;;  %v1258_v0 = vpop.xlane.xlu1 %1257 }
 0x720   :  { %v4385_v39 = vmul.f32 %v3266_v31, %v3264_v24  ;;  %v1259_v10 = vmax.f32 %v1258_v0, 1e-20  ;;  %v5154_v31 = vld [vmem:[#allocation31_spill] sm:$0xff]  ;;  %v5155_v0 = vld [vmem:[#allocation32_spill] sm:$0xff] }
 0x722   :  { %3267 = vrcp.f32 %v1259_v10  ;;  %1357 = vmax.xlane.f32.xlu0 %v4385_v39  ;;  %v1530_v51 = vsel %vm988_vm3, %v4385_v39, 0.0  ;;  %v1539_v58 = vsel %vm999_vm4, %v4385_v39, 0.0  ;;  %v1549_v24 = vsel %vm1011_vm5, %v4385_v39, 0.0  ;;  %v5156_v10 = vld [vmem:[#allocation33_spill] sm:$0xff] }
 0x723   :  { %v1559_v3 = vsel %vm1023_vm6, %v4385_v39, 0.0  ;;  %v1569_v40 = vsel %vm1035_vm7, %v4385_v39, 0.0 }
 0x726   :  { %1531 = vadd.xlane.f32.xlu0 %v1530_v51  ;;  %v5157_v51 = vld [vmem:[#allocation42_spill] sm:$0xff] }
 0x72a   :  { %1540 = vadd.xlane.f32.xlu0 %v1539_v58  ;;  %v5158_v58 = vld [vmem:[#allocation43_spill] sm:$0xff] }
 0x72c   :  { %v3268_v15 = vpop.eup %3267 }
 0x72d   :  { %v4397_v48 = vmul.f32 %v3268_v15, %v1256_v2  ;;  %v5152_v2 = vld [vmem:[#allocation29_spill] sm:$0xff]  ;;  %v5159_v15 = vld [vmem:[#allocation44_spill] sm:$0xff] }
 0x72e   :  { %1550 = vadd.xlane.f32.xlu0 %v1549_v24  ;;  %v5160_v24 = vld [vmem:[#allocation45_spill] sm:$0xff] }
 0x72f   :  { %v1364_v29 = vpack.c.bf16 %v4397_v48, %v4397_v48 }
 0x731   :  { %1399 = vmatmul.mubr.bf16.vlgmr.msra.gmra.mrb[20].mxu1 %v1364_v29  ;;  %1440 = vmatmul.mubr.bf16.vlgmr.msra.gmra.mrb[20].mxu0 %v1364_v29 }
 0x732   :  { %1449 = vmatpush1.bf16.msra.mxu1 %v5137_v6  ;;  %1490 = vmatpush1.bf16.msra.mxu0 %v5138_v17 }
 0x733   :  { %1560 = vadd.xlane.f32.xlu0 %v1559_v3  ;;  %1450 = vmatprep.subr.bf16.mxu1 %v5139_v18  ;;  %v5161_v3 = vld [vmem:[#allocation46_spill] sm:$0xff] }
 0x734   :  { %1491 = vmatprep.subr.bf16.mxu0 %v5140_v26  ;;  %1480 = vmatprep.mubr.bf16.mxu1 %v5054_v57 }
 0x735   :  { %1521 = vmatprep.mubr.bf16.mxu0 %v5054_v57 }
 0x736   :  { %1451 = vmatpush1.bf16.msra.mxu1 %v5141_v4  ;;  %1492 = vmatpush1.bf16.msra.mxu0 %v5142_v30 }
 0x737   :  { %1570 = vadd.xlane.f32.xlu0 %v1569_v40  ;;  %1452 = vmatprep.subr.bf16.mxu1 %v5143_v16  ;;  %v5162_v40 = vld [vmem:[#allocation47_spill] sm:$0xff] }
 0x738   :  { %1493 = vmatprep.subr.bf16.mxu0 %v5144_v5 }
 0x73a   :  { %1453 = vmatpush1.bf16.msra.mxu1 %v5145_v22  ;;  %1494 = vmatpush1.bf16.msra.mxu0 %v5146_v11 }
 0x73b   :  { %1454 = vmatprep.subr.bf16.mxu1 %v5147_v9  ;;  %1495 = vmatprep.subr.bf16.mxu0 %v5148_v7 }
 0x73e   :  { %1455 = vmatpush1.bf16.msra.mxu1 %v5149_v41  ;;  %1496 = vmatpush1.bf16.msra.mxu0 %v5150_v8 }
 0x73f   :  { %1456 = vmatprep.subr.bf16.mxu1 %v5151_v1  ;;  %1497 = vmatprep.subr.bf16.mxu0 %v5152_v2 }
 0x742   :  { %1457 = vmatpush1.bf16.msra.mxu1 %v5153_v19  ;;  %1498 = vmatpush1.bf16.msra.mxu0 %v5154_v31 }
 0x743   :  { %1458 = vmatprep.subr.bf16.mxu1 %v5155_v0  ;;  %1499 = vmatprep.subr.bf16.mxu0 %v5156_v10 }
 0x746   :  { %1459 = vmatpush1.bf16.msra.mxu1 %v3893_v27  ;;  %1500 = vmatpush1.bf16.msra.mxu0 %v3897_v36 }
 0x747   :  { %1460 = vmatprep.subr.bf16.mxu1 %v3899_v34  ;;  %1501 = vmatprep.subr.bf16.mxu0 %v3902_v46 }
 0x74a   :  { %1461 = vmatpush1.bf16.msra.mxu1 %v3917_v37  ;;  %1502 = vmatpush1.bf16.msra.mxu0 %v3921_v59  ;;  %v5163_v37 = vld [vmem:[#allocation48_spill] sm:$0xff]  ;;  %v5164_v59 = vld [vmem:[#allocation49_spill] sm:$0xff] }
 0x74b   :  { %1462 = vmatprep.subr.bf16.mxu1 %v3923_v21  ;;  %1503 = vmatprep.subr.bf16.mxu0 %v3926_v14  ;;  %v5174_v14 = vld [vmem:[#allocation59_spill] sm:$0xff]  ;;  %v5175_v21 = vld [vmem:[#allocation60_spill] sm:$0xff] }
 0x74e   :  { %1463 = vmatpush1.bf16.msra.mxu1 %v5157_v51  ;;  %1504 = vmatpush1.bf16.msra.mxu0 %v5158_v58  ;;  %v5165_v51 = vld [vmem:[#allocation50_spill] sm:$0xff]  ;;  %v5166_v58 = vld [vmem:[#allocation51_spill] sm:$0xff] }
 0x74f   :  { %2900 = vmatprep.subr.bf16.mxu1 %v5159_v15  ;;  %2932 = vmatprep.subr.bf16.mxu0 %v5160_v24  ;;  %v5167_v15 = vld [vmem:[#allocation52_spill] sm:$0xff]  ;;  %v5168_v24 = vld [vmem:[#allocation53_spill] sm:$0xff] }
 0x751   :  { %1481 = vmatmul.mubr.bf16.vlgmr.msra.gmra.mrb[24].mxu1 %v1364_v29  ;;  %1522 = vmatmul.mubr.bf16.vlgmr.msra.gmra.mrb[24].mxu0 %v1364_v29  ;;  %v5169_v29 = vld [vmem:[#allocation54_spill] sm:$0xff] }
 0x752   :  { %2902 = vmatpush1.bf16.msra.mxu1 %v5161_v3  ;;  %2934 = vmatpush1.bf16.msra.mxu0 %v5162_v40  ;;  %v5170_v3 = vld [vmem:[#allocation55_spill] sm:$0xff]  ;;  %v5171_v40 = vld [vmem:[#allocation56_spill] sm:$0xff] }
 0x753   :  { %2904 = vmatprep.subr.bf16.mxu1 %v5163_v37  ;;  %2936 = vmatprep.subr.bf16.mxu0 %v5164_v59  ;;  %v5172_v37 = vld [vmem:[#allocation57_spill] sm:$0xff]  ;;  %v5173_v59 = vld [vmem:[#allocation58_spill] sm:$0xff] }
 0x754   :  { %1638 = vmatprep.mubr.f32.mxu1 %v5087_v52  ;;  %1709 = vmatprep.mubr.f32.mxu0 %v5087_v52 }
 0x756   :  { %2906 = vmatpush1.bf16.msra.mxu1 %v5165_v51  ;;  %2938 = vmatpush1.bf16.msra.mxu0 %v5166_v58  ;;  %v5176_v51 = vld [vmem:[#allocation61_spill] sm:$0xff]  ;;  %v5177_v58 = vld [vmem:[#allocation62_spill] sm:$0xff] }
 0x757   :  { %2908 = vmatprep.subr.bf16.mxu1 %v5167_v15  ;;  %2940 = vmatprep.subr.bf16.mxu0 %v5168_v24  ;;  %v5178_v15 = vld [vmem:[#allocation63_spill] sm:$0xff]  ;;  %v5179_v24 = vld [vmem:[#allocation64_spill] sm:$0xff] }
 0x75a   :  { %2910 = vmatpush1.bf16.msra.mxu1 %v5169_v29  ;;  %2942 = vmatpush1.bf16.msra.mxu0 %v5170_v3  ;;  %v5180_v29 = vld [vmem:[#allocation65_spill] sm:$0xff]  ;;  %v5181_v3 = vld [vmem:[#allocation66_spill] sm:$0xff] }
 0x75b   :  { %2912 = vmatprep.subr.bf16.mxu1 %v5171_v40  ;;  %2944 = vmatprep.subr.bf16.mxu0 %v5172_v37  ;;  %v5182_v40 = vld [vmem:[#allocation67_spill] sm:$0xff]  ;;  %v5183_v37 = vld [vmem:[#allocation68_spill] sm:$0xff] }
 0x75e   :  { %2914 = vmatpush1.bf16.msra.mxu1 %v5173_v59  ;;  %2946 = vmatpush1.bf16.msra.mxu0 %v5174_v14  ;;  %v5184_v59 = vld [vmem:[#allocation69_spill] sm:$0xff]  ;;  %v5185_v14 = vld [vmem:[#allocation70_spill] sm:$0xff] }
 0x75f   :  { %2916 = vmatprep.subr.bf16.mxu1 %v5175_v21  ;;  %2948 = vmatprep.subr.bf16.mxu0 %v5176_v51  ;;  %v5186_v21 = vld [vmem:[#allocation71_spill] sm:$0xff]  ;;  %v5187_v51 = vld [vmem:[#allocation72_spill] sm:$0xff] }
 0x762   :  { %2918 = vmatpush1.bf16.msra.mxu1 %v5177_v58  ;;  %2950 = vmatpush1.bf16.msra.mxu0 %v5178_v15  ;;  %v5188_v58 = vld [vmem:[#allocation73_spill] sm:$0xff]  ;;  %v5189_v15 = vld [vmem:[#allocation74_spill] sm:$0xff] }
 0x763   :  { %2920 = vmatprep.subr.bf16.mxu1 %v5179_v24  ;;  %2952 = vmatprep.subr.bf16.mxu0 %v5180_v29  ;;  %v5190_v24 = vld [vmem:[#allocation75_spill] sm:$0xff]  ;;  %v5191_v29 = vld [vmem:[#allocation76_spill] sm:$0xff] }
 0x766   :  { %2922 = vmatpush1.bf16.msra.mxu1 %v5181_v3  ;;  %2954 = vmatpush1.bf16.msra.mxu0 %v5182_v40  ;;  %v3281_v3 = vld [vmem:[%s4892_s4] sm:$0xff]   ;;  %v5192_v40 = vld [vmem:[#allocation77_spill] sm:$0xff] }
 0x767   :  { %2924 = vmatprep.subr.bf16.mxu1 %v5183_v37  ;;  %2956 = vmatprep.subr.bf16.mxu0 %v5184_v59  ;;  %v5193_v37 = vld [vmem:[#allocation78_spill] sm:$0xff]  ;;  %v3282_v59 = vld [vmem:[%s4892_s4 + $0x8] sm:$0xff]  }
 0x76a   :  { %2926 = vmatpush1.bf16.msra.mxu1 %v5185_v14  ;;  %2958 = vmatpush1.bf16.msra.mxu0 %v5186_v21  ;;  %v5194_v14 = vld [vmem:[#allocation79_spill] sm:$0xff]  ;;  %v5195_v21 = vld [vmem:[#allocation80_spill] sm:$0xff] }
 0x76b   :  { %2928 = vmatprep.subr.bf16.mxu1 %v5187_v51  ;;  %2960 = vmatprep.subr.bf16.mxu0 %v5188_v58  ;;  %v3283_v51 = vld [vmem:[%s4892_s4 + $0x10] sm:$0xff]   ;;  %v5196_v58 = vld [vmem:[#allocation81_spill] sm:$0xff] }
 0x76e   :  { %2930 = vmatpush1.bf16.msra.mxu1 %v5189_v15  ;;  %2962 = vmatpush1.bf16.msra.mxu0 %v5190_v24  ;;  %v5197_v15 = vld [vmem:[#allocation82_spill] sm:$0xff]  ;;  %v3284_v24 = vld [vmem:[%s4892_s4 + $0x18] sm:$0xff]  }
 0x76f   :  { %2763 = vmatprep.subr.bf16.mxu0 %v5087_v52  ;;  %2964 = vmatprep.subr.bf16.mxu1 %v5191_v29  ;;  %v5198_v29 = vld [vmem:[#allocation83_spill] sm:$0xff] }
 0x771   :  { %1639 = vmatmul.mubr.f32.vlgmr.msra.gmra.mrb[14].mxu1 %v4385_v39  ;;  %1710 = vmatmul.mubr.f32.vlgmr.msra.gmra.mrb[28].mxu0 %v4397_v48 }
 0x772   :  { %2764 = vmatpush3.bf16.msra.mxu0 %v3281_v3  ;;  %2966 = vmatpush3.bf16.msra.mxu1 %v5192_v40  ;;  %v5199_v3 = vld [vmem:[#allocation84_spill] sm:$0xff]  ;;  %v3285_v40 = vld [vmem:[%s4892_s4 + $0x20] sm:$0xff]  }
 0x773   :  { %2765 = vmatprep.subr.bf16.mxu0 %v5087_v52  ;;  %2968 = vmatprep.subr.bf16.mxu1 %v5193_v37  ;;  %v5200_v37 = vld [vmem:[#allocation85_spill] sm:$0xff] }
 0x774   :  { %2779 = vmatprep.mubr.msk.bf16.mxu0 %vm3348_vm0, %v5087_v52 }
 0x776   :  { %2766 = vmatpush3.bf16.msra.mxu0 %v3282_v59  ;;  %2970 = vmatpush3.bf16.msra.mxu1 %v5194_v14  ;;  %v5201_v59 = vld [vmem:[#allocation86_spill] sm:$0xff]  ;;  %v3286_v14 = vld [vmem:[%s4892_s4 + $0x28] sm:$0xff]  }
 0x777   :  { %2767 = vmatprep.subr.bf16.mxu0 %v5087_v52  ;;  %2972 = vmatprep.subr.bf16.mxu1 %v5195_v21  ;;  %v5202_v21 = vld [vmem:[#allocation87_spill] sm:$0xff] }
 0x77a   :  { %2768 = vmatpush3.bf16.msra.mxu0 %v3283_v51  ;;  %2974 = vmatpush3.bf16.msra.mxu1 %v5196_v58  ;;  %v5203_v51 = vld [vmem:[#allocation88_spill] sm:$0xff] }
 0x77b   :  { %2769 = vmatprep.subr.bf16.mxu0 %v5087_v52  ;;  %2976 = vmatprep.subr.bf16.mxu1 %v5197_v15  ;;  %v3287_v58 = vld [vmem:[%s4892_s4 + $0x30] sm:$0xff]   ;;  %v5204_v15 = vld [vmem:[#allocation89_spill] sm:$0xff] }
 0x77e   :  { %2770 = vmatpush3.bf16.msra.mxu0 %v3284_v24  ;;  %2978 = vmatpush3.bf16.msra.mxu1 %v5198_v29  ;;  %v5205_v24 = vld [vmem:[#allocation90_spill] sm:$0xff]  ;;  %v3288_v29 = vld [vmem:[%s4892_s4 + $0x38] sm:$0xff]  }
 0x77f   :  { %2771 = vmatprep.subr.bf16.mxu0 %v5087_v52  ;;  %2980 = vmatprep.subr.bf16.mxu1 %v5199_v3  ;;  %v5206_v3 = vld [vmem:[#allocation91_spill] sm:$0xff] }
 0x782   :  { %2772 = vmatpush3.bf16.msra.mxu0 %v3285_v40  ;;  %2982 = vmatpush3.bf16.msra.mxu1 %v5200_v37  ;;  %v5207_v40 = vld [vmem:[#allocation3_spill] sm:$0xff] }
 0x783   :  { %2773 = vmatprep.subr.bf16.mxu0 %v5087_v52  ;;  %2984 = vmatprep.subr.bf16.mxu1 %v5201_v59 }
 0x786   :  { %2774 = vmatpush3.bf16.msra.mxu0 %v3286_v14  ;;  %2986 = vmatpush3.bf16.msra.mxu1 %v5202_v21  ;;  %v1534_v14 = vsel %vm993_vm10, %v4385_v39, 0.0  ;;  %v1544_v21 = vsel %vm1005_vm11, %v4385_v39, 0.0 }
 0x787   :  { %2775 = vmatprep.subr.bf16.mxu0 %v5087_v52  ;;  %2988 = vmatprep.subr.bf16.mxu1 %v5203_v51  ;;  %v1554_v51 = vsel %vm1017_vm12, %v4385_v39, 0.0 }
 0x78a   :  { %2776 = vmatpush3.bf16.msra.mxu0 %v3287_v58  ;;  %2990 = vmatpush3.bf16.msra.mxu1 %v5204_v15  ;;  %v1564_v58 = vsel %vm1029_vm13, %v4385_v39, 0.0 }
 0x78b   :  { %2777 = vmatprep.subr.bf16.mxu0 %v5087_v52  ;;  %2992 = vmatprep.subr.bf16.mxu1 %v5205_v24 }
 0x78e   :  { %2778 = vmatpush3.bf16.msra.mxu0 %v3288_v29  ;;  %2994 = vmatpush3.bf16.msra.mxu1 %v5206_v3 }
 0x78f   :  { %2783 = vmatprep.subr.bf16.mxu1 %v5087_v52  ;;  %1898 = vmatprep.subr.bf16.mxu0 %v5207_v40 }
 0x7af   :  { %v1358_v37 = vpop.xlane.xlu0 %1357 }
 0x7b0   :  { %vm1359_vm14 = vcmp.ge.f32.partialorder %v4385_v39, %v1358_v37 }
 0x7b1   :  { %v1360_v59 = vsel %vm1359_vm14, %v4273_v12, 128.0 }
 0x7b2   :  { %1361 = vmin.xlane.f32.xlu1 %v1360_v59 }
 0x7b3   :  { %v1532_v31 = vpop.xlane.xlu0 %1531 }
 0x7b6   :  { %1535 = vadd.xlane.f32.xlu1 %v1534_v14 }
 0x7b7   :  { %v1541_v28 = vpop.xlane.xlu0 %1540 }
 0x7ba   :  { %1545 = vadd.xlane.f32.xlu1 %v1544_v21 }
 0x7be   :  { %1555 = vadd.xlane.f32.xlu1 %v1554_v51 }
 0x7c2   :  { %1565 = vadd.xlane.f32.xlu1 %v1564_v58  ;;  %v5209_v58 = vmov 1.0|1.0  }
 0x804   :  { %v1400_v15 = vpop.f32.mrb[20].mxu1  ;;  %v1441_v24 = vpop.f32.mrb[20].mxu0 }
 0x805   :  { %v1402_v29 = vpop.f32.mrb[21].mxu1  ;;  %v1443_v3 = vpop.f32.mrb[21].mxu0 }
 0x806   :  { %v1404_v40 = vpop.f32.mrb[22].mxu1  ;;  %v1445_v37 = vpop.f32.mrb[22].mxu0 }
 0x807   :  { %v1405_v59 = vpop.f32.mrb[23].mxu1  ;;  %v1446_v14 = vpop.f32.mrb[23].mxu0 }
 0x808   :  { %v1551_v40 = vpop.xlane.xlu0 %1550 }
 0x824   :  { %v1482_v46 = vpop.f32.mrb[24].mxu1  ;;  %v1523_v21 = vpop.f32.mrb[24].mxu0 }
 0x825   :  { %v1484_v34 = vpop.f32.mrb[25].mxu1  ;;  %v1525_v36 = vpop.f32.mrb[25].mxu0 }
 0x826   :  { %v1486_v27 = vpop.f32.mrb[26].mxu1  ;;  %v1527_v10 = vpop.f32.mrb[26].mxu0 }
 0x827   :  { %v1487_v51 = vpop.f32.mrb[27].mxu1  ;;  %v1528_v0 = vpop.f32.mrb[27].mxu0  ;;  %v1533_v27 = vmul.f32 %v1532_v31, %v4397_v48  ;;  %v1552_v48 = vmul.f32 %v1551_v40, %v1443_v3 }
 0x83f   :  { %v4541_v39 = vpop.xlane.xlu1 %1361 }
 0x840   :  { %5208 = vst [vmem:[#allocation14_spill] sm:$0xff] %v4541_v39  ;;  %vm1363_vm15 = vcmp.eq.f32.partialorder %v4273_v12, %v4541_v39  ;;  %v1542_v39 = vmul.f32 %v1541_v28, %v1402_v29  ;;  %v1561_v28 = vpop.xlane.xlu0 %1560 }
 0x841   :  { %vm2442_vm2 = vmpackc.low %vm1363_vm15, %vm1363_vm15 }
 0x842   :  { %2780 = vmatmul.mubr.msk.bf16.vlgmr.msra.gmra.mrb[32].mxu0 %vm2442_vm2, %v5209_v58 }
 0x843   :  { %v1536_v37 = vpop.xlane.xlu1 %1535  ;;  %1899 = vmatpush1.bf16.msra.mxu0 %v3550_v38  ;;  %1930 = vmatprep.mubr.bf16.mxu0 %v5054_v57 }
 0x844   :  { %v1640_v10 = vpop.f32.mrb[14].mxu1  ;;  %v1711_v0 = vpop.f32.mrb[28].mxu0  ;;  %v1537_v59 = vmul.f32 %v1536_v37, %v1400_v15  ;;  %1900 = vmatprep.subr.bf16.mxu0 %v3567_v45  ;;  %v3289_v45 = vld [vmem:[%s4893_s5] sm:$0xff]  }
 0x845   :  { %v1716_v14 = vmul.f32 %v1711_v0, %v1640_v10  ;;  %v1642_v51 = vpop.f32.mrb[15].mxu1  ;;  %v1713_v19 = vpop.f32.mrb[29].mxu0 }
 0x846   :  { %v1538_v12 = vadd.f32 %v1537_v59, %v1533_v27  ;;  %v1717_v2 = vmul.f32 %v1713_v19, %v1642_v51  ;;  %v5211_v59 = vld [vmem:[#allocation5_spill] sm:$0xff]  ;;  %v5213_v51 = vld [vmem:[#allocation7_spill] sm:$0xff] }
 0x847   :  { %v1546_v58 = vpop.xlane.xlu1 %1545  ;;  %1901 = vmatpush1.bf16.msra.mxu0 %v3592_v53 }
 0x848   :  { %1782 = vmatprep.mubr.f32.mxu1 %v1717_v2  ;;  %v1543_v38 = vadd.f32 %v1542_v39, %v1538_v12  ;;  %v1547_v1 = vmul.f32 %v1546_v58, %v1441_v24  ;;  %1902 = vmatprep.subr.bf16.mxu0 %v3598_v55  ;;  %v1562_v55 = vmul.f32 %v1561_v28, %v1484_v34  ;;  %v3290_v2 = vld [vmem:[%s4893_s5 + $0x8] sm:$0xff]   ;;  %v5215_v58 = vld [vmem:[#allocation9_spill] sm:$0xff] }
 0x849   :  { %1783 = vmatmul.mubr.f32.vlgmr.msra.gmra.mrb[28].mxu1 %v1716_v14  ;;  %v5212_v14 = vld [vmem:[#allocation6_spill] sm:$0xff]  ;;  %v5235_v28 = vld [vmem:[#allocation43_spill] sm:$0xff] }
 0x84a   :  { %v1548_v31 = vadd.f32 %v1547_v1, %v1543_v38  ;;  %2784 = vmatpush3.bf16.msra.mxu1 %v3289_v45  ;;  %2799 = vmatprep.mubr.msk.bf16.mxu1 %vm3348_vm0, %v5087_v52 }
 0x84b   :  { %v1556_v19 = vpop.xlane.xlu1 %1555  ;;  %2785 = vmatprep.subr.bf16.mxu1 %v5087_v52  ;;  %1903 = vmatpush1.bf16.msra.mxu0 %v3616_v61  ;;  %v1571_v61 = vpop.xlane.xlu0 %1570 }
 0x84c   :  { %v1553_v53 = vadd.f32 %v1552_v48, %v1548_v31  ;;  %v1557_v12 = vmul.f32 %v1556_v19, %v1482_v46  ;;  %1904 = vmatprep.subr.bf16.mxu0 %v3622_v63  ;;  %v1572_v46 = vmul.f32 %v1571_v61, %v1525_v36  ;;  %v3291_v63 = vld [vmem:[%s4893_s5 + $0x10] sm:$0xff]   ;;  %v3296_v36 = vld [vmem:[%s4893_s5 + $0x38] sm:$0xff]   ;;  %v3298_v19 = vld [vmem:[%s4898_s8 + $0x4] ss:$8 sps:$4 sm:$0xff]  }
 0x84d   :  { %v3307_v61 = vld [vmem:[%s4897_s7 + $0x24] ss:$8 sps:$4 sm:$0xff]  }
 0x84e   :  { %v1558_v1 = vadd.f32 %v1557_v12, %v1553_v53  ;;  %2786 = vmatpush3.bf16.msra.mxu1 %v3290_v2  ;;  %v3299_v53 = vld [vmem:[%s4897_s7 + $0x4] ss:$8 sps:$4 sm:$0xff]   ;;  %v3300_v12 = vld [vmem:[%s4898_s8] ss:$8 sps:$4 sm:$0xff]   ;;  %v3303_v2 = vld [vmem:[%s4897_s7 + $0x14] ss:$8 sps:$4 sm:$0xff]  }
 0x84f   :  { %v1566_v15 = vpop.xlane.xlu1 %1565  ;;  %2787 = vmatprep.subr.bf16.mxu1 %v5087_v52  ;;  %1905 = vmatpush1.bf16.msra.mxu0 %v3640_v23  ;;  %v3292_v23 = vld [vmem:[%s4893_s5 + $0x18] sm:$0xff]  }
 0x850   :  { %v1563_v24 = vadd.f32 %v1562_v55, %v1558_v1  ;;  %v1567_v29 = vmul.f32 %v1566_v15, %v1523_v21  ;;  %1906 = vmatprep.subr.bf16.mxu0 %v3646_v25  ;;  %v3293_v25 = vld [vmem:[%s4893_s5 + $0x20] sm:$0xff]   ;;  %v3301_v55 = vld [vmem:[%s4898_s8 + $0x14] ss:$8 sps:$4 sm:$0xff]   ;;  %v3304_v15 = vld [vmem:[%s4898_s8 + $0x10] ss:$8 sps:$4 sm:$0xff]  }
 0x851   :  { %v3302_v1 = vld [vmem:[%s4897_s7] ss:$8 sps:$4 sm:$0xff]  }
 0x852   :  { %v1568_v3 = vadd.f32 %v1567_v29, %v1563_v24  ;;  %2788 = vmatpush3.bf16.msra.mxu1 %v3291_v63  ;;  %v3305_v24 = vld [vmem:[%s4898_s8 + $0x24] ss:$8 sps:$4 sm:$0xff]   ;;  %v3306_v29 = vld [vmem:[%s4897_s7 + $0x10] ss:$8 sps:$4 sm:$0xff]   ;;  %v3310_v63 = vld [vmem:[%s4897_s7 + $0x20] ss:$8 sps:$4 sm:$0xff]  }
 0x853   :  { %2789 = vmatprep.subr.bf16.mxu1 %v5087_v52  ;;  %1907 = vmatpush1.bf16.msra.mxu0 %v3664_v33  ;;  %v3294_v33 = vld [vmem:[%s4893_s5 + $0x28] sm:$0xff]  }
 0x854   :  { %v1573_v34 = vadd.f32 %v1572_v46, %v1568_v3  ;;  %1908 = vmatprep.subr.bf16.mxu0 %v3670_v35  ;;  %v3295_v35 = vld [vmem:[%s4893_s5 + $0x30] sm:$0xff]   ;;  %v3308_v46 = vld [vmem:[%s4898_s8 + $0x20] ss:$8 sps:$4 sm:$0xff]  }
 0x855   :  { %v3309_v3 = vld [vmem:[%s4898_s8 + $0x34] ss:$8 sps:$4 sm:$0xff]  }
 0x856   :  { %2790 = vmatpush3.bf16.msra.mxu1 %v3292_v23  ;;  %v3312_v23 = vld [vmem:[%s4898_s8 + $0x30] ss:$8 sps:$4 sm:$0xff]  }
 0x857   :  { %2791 = vmatprep.subr.bf16.mxu1 %v5087_v52  ;;  %1909 = vmatpush1.bf16.msra.mxu0 %v3688_v47 }
 0x858   :  { %1910 = vmatprep.subr.bf16.mxu0 %v3694_v50  ;;  %v3297_v50 = vld [vmem:[%s4895_s1] sm:$0xff] }
 0x85a   :  { %2792 = vmatpush3.bf16.msra.mxu1 %v3293_v25  ;;  %v3313_v25 = vld [vmem:[%s4898_s8 + $0x44] ss:$8 sps:$4 sm:$0xff]  }
 0x85b   :  { %2793 = vmatprep.subr.bf16.mxu1 %v5087_v52  ;;  %1911 = vmatpush1.bf16.msra.mxu0 %v3712_v60 }
 0x85c   :  { %1912 = vmatprep.subr.bf16.mxu0 %v3718_v20 }
 0x85e   :  { %2794 = vmatpush3.bf16.msra.mxu1 %v3294_v33  ;;  %v3314_v33 = vld [vmem:[%s4897_s7 + $0x30] ss:$8 sps:$4 sm:$0xff]  }
 0x85f   :  { %2795 = vmatprep.subr.bf16.mxu1 %v5087_v52  ;;  %1913 = vmatpush1.bf16.msra.mxu0 %v3736_v32 }
 0x860   :  { %1980 = vmatprep.subr.bf16.mxu0 %v3747_v42 }
 0x862   :  { %2796 = vmatpush3.bf16.msra.mxu1 %v3295_v35  ;;  %v3315_v35 = vld [vmem:[%s4897_s7 + $0x44] ss:$8 sps:$4 sm:$0xff]  }
 0x863   :  { %2797 = vmatprep.subr.bf16.mxu1 %v5087_v52 }
 0x866   :  { %2798 = vmatpush3.bf16.msra.mxu1 %v3296_v36  ;;  %v3316_v36 = vld [vmem:[%s4898_s8 + $0x40] ss:$8 sps:$4 sm:$0xff]  }
 0x867   :  { %1939 = vmatprep.subr.bf16.mxu1 %v3565_v44  ;;  %v5210_v44 = vld [vmem:[#allocation4_spill] sm:$0xff] }
 0x915   :  { %v1832_v47 = vpop.f32.mrb[32].mxu0 }
 0x916   :  { %v1833_v60 = vadd.f32 %v3297_v50, %v1832_v47  ;;  %v2781_v20 = vpop.f32.mrb[33].mxu0  ;;  %v3317_v47 = vld [vmem:[%s4898_s8 + $0x54] ss:$8 sps:$4 sm:$0xff]   ;;  %v3318_v50 = vld [vmem:[%s4897_s7 + $0x40] ss:$8 sps:$4 sm:$0xff]  }
 0x917   :  { %v1835_v32 = vpop.f32.mrb[34].mxu0  ;;  %v3320_v20 = vld [vmem:[%s4898_s8 + $0x50] ss:$8 sps:$4 sm:$0xff]  }
 0x918   :  { %3269 = vtanh.f32 %v1833_v60  ;;  %v2782_v42 = vpop.f32.mrb[35].mxu0  ;;  %v3319_v60 = vld [vmem:[%s4897_s7 + $0x54] ss:$8 sps:$4 sm:$0xff]  }
 0x91c   :  { %v2627_v21 = vpop.f32.mrb[28].mxu1 }
 0x91d   :  { %v2628_v39 = vpop.f32.mrb[29].mxu1 }
 0x91e   :  { %v2629_v40 = vadd.f32 %v2628_v39, %v2627_v21  ;;  %v3321_v21 = vld [vmem:[%s4898_s8 + $0x64] ss:$8 sps:$4 sm:$0xff]  }
 0x920   :  { %v1788_v37 = vsub.f32 %v1573_v34, %v2629_v40  ;;  %v3311_v34 = vld [vmem:[%s4897_s7 + $0x34] ss:$8 sps:$4 sm:$0xff]  }
 0x922   :  { %v3270_v27 = vpop.eup %3269  ;;  %v1789_v10 = vmax.f32 %v1788_v37, 0.0  ;;  %v3322_v37 = vld [vmem:[%s4897_s7 + $0x50] ss:$8 sps:$4 sm:$0xff]  }
 0x923   :  { %v1839_v0 = vpack.c.bf16 %v3270_v27, %v3270_v27 }
 0x924   :  { %1790 = vadd.xlane.f32.xlu0 %v1789_v10 }
 0x925   :  { %2800 = vmatmul.mubr.bf16.vlgmr.msra.gmra.mrb[32].mxu1 %v1839_v0 }
 0x926   :  { %1940 = vmatpush1.bf16.msra.mxu1 %v3563_v43  ;;  %1971 = vmatprep.mubr.bf16.mxu1 %v5054_v57  ;;  %v5214_v43 = vld [vmem:[#allocation8_spill] sm:$0xff] }
 0x927   :  { %1941 = vmatprep.subr.bf16.mxu1 %v3579_v49  ;;  %v5216_v49 = vld [vmem:[#allocation10_spill] sm:$0xff] }
 0x92a   :  { %1942 = vmatpush1.bf16.msra.mxu1 %v3596_v54  ;;  %v5217_v54 = vld [vmem:[#allocation11_spill] sm:$0xff] }
 0x92b   :  { %1943 = vmatprep.subr.bf16.mxu1 %v3601_v56  ;;  %v5218_v56 = vld [vmem:[#allocation12_spill] sm:$0xff] }
 0x92e   :  { %1944 = vmatpush1.bf16.msra.mxu1 %v3620_v62  ;;  %v5219_v62 = vld [vmem:[#allocation13_spill] sm:$0xff] }
 0x92f   :  { %1945 = vmatprep.subr.bf16.mxu1 %v3625_v13 }
 0x932   :  { %1946 = vmatpush1.bf16.msra.mxu1 %v5210_v44  ;;  %v3324_v44 = vld [vmem:[%s4898_s8 + $0x60] ss:$8 sps:$4 sm:$0xff]  }
 0x933   :  { %1947 = vmatprep.subr.bf16.mxu1 %v5211_v59  ;;  %v3325_v59 = vld [vmem:[%s4898_s8 + $0x74] ss:$8 sps:$4 sm:$0xff]  }
 0x936   :  { %1948 = vmatpush1.bf16.msra.mxu1 %v5212_v14  ;;  %v3326_v14 = vld [vmem:[%s4897_s7 + $0x60] ss:$8 sps:$4 sm:$0xff]  }
 0x937   :  { %1949 = vmatprep.subr.bf16.mxu1 %v5213_v51  ;;  %v3327_v51 = vld [vmem:[%s4897_s7 + $0x74] ss:$8 sps:$4 sm:$0xff]  }
 0x93a   :  { %1950 = vmatpush1.bf16.msra.mxu1 %v5214_v43  ;;  %v3328_v43 = vld [vmem:[%s4898_s8 + $0x70] ss:$8 sps:$4 sm:$0xff]  }
 0x93b   :  { %1951 = vmatprep.subr.bf16.mxu1 %v5215_v58  ;;  %v3329_v58 = vld [vmem:[%s4897_s7 + $0x70] ss:$8 sps:$4 sm:$0xff]  }
 0x93e   :  { %1952 = vmatpush1.bf16.msra.mxu1 %v5216_v49  ;;  %v3330_v49 = vld [vmem:[%s4900_s9 + $0x40] sm:$0xff]  }
 0x93f   :  { %1953 = vmatprep.subr.bf16.mxu1 %v5217_v54 }
 0x942   :  { %1954 = vmatpush1.bf16.msra.mxu1 %v5218_v56 }
 0x943   :  { %2021 = vmatprep.subr.bf16.mxu1 %v5219_v62 }
 0x9b1   :  { %v1791_v13 = vpop.xlane.xlu0 %1790 }
 0x9b2   :  { %v1792_v38 = vmax.f32 %v1791_v13, 1e-20 }
 0x9b4   :  { %3271 = vrcp.f32 %v1792_v38 }
 0x9be   :  { %v3272_v48 = vpop.eup %3271 }
 0x9bf   :  { %v4618_v31 = vmul.f32 %v3272_v48, %v1789_v10  ;;  %v3323_v10 = vld [vmem:[%s4897_s7 + $0x64] ss:$8 sps:$4 sm:$0xff]  }
 0x9c1   :  { %v1896_v45 = vpack.c.bf16 %v4618_v31, %v4618_v31 }
 0x9c3   :  { %1931 = vmatmul.mubr.bf16.vlgmr.msra.gmra.mrb[36].mxu0 %v1896_v45  ;;  %1972 = vmatmul.mubr.bf16.vlgmr.msra.gmra.mrb[36].mxu1 %v1896_v45 }
 0x9c4   :  { %1981 = vmatpush1.bf16.msra.mxu0 %v5137_v6  ;;  %2022 = vmatpush1.bf16.msra.mxu1 %v5138_v17  ;;  %v5221_v6 = vld [vmem:[#allocation29_spill] sm:$0xff]  ;;  %v5222_v17 = vld [vmem:[#allocation30_spill] sm:$0xff] }
 0x9c5   :  { %1982 = vmatprep.subr.bf16.mxu0 %v5139_v18  ;;  %2023 = vmatprep.subr.bf16.mxu1 %v5140_v26  ;;  %v5223_v18 = vld [vmem:[#allocation31_spill] sm:$0xff]  ;;  %v5224_v26 = vld [vmem:[#allocation32_spill] sm:$0xff] }
 0x9c6   :  { %2012 = vmatprep.mubr.bf16.mxu0 %v5054_v57  ;;  %2053 = vmatprep.mubr.bf16.mxu1 %v5054_v57  ;;  %v5220_v57 = vld [vmem:[#allocation28_spill] sm:$0xff] }
 0x9c8   :  { %1983 = vmatpush1.bf16.msra.mxu0 %v5141_v4  ;;  %2024 = vmatpush1.bf16.msra.mxu1 %v5142_v30  ;;  %v5225_v4 = vld [vmem:[#allocation33_spill] sm:$0xff]  ;;  %v5226_v30 = vld [vmem:[#allocation34_spill] sm:$0xff] }
 0x9c9   :  { %1984 = vmatprep.subr.bf16.mxu0 %v5143_v16  ;;  %2025 = vmatprep.subr.bf16.mxu1 %v5144_v5  ;;  %v5227_v16 = vld [vmem:[#allocation35_spill] sm:$0xff]  ;;  %v5228_v5 = vld [vmem:[#allocation36_spill] sm:$0xff] }
 0x9cc   :  { %1985 = vmatpush1.bf16.msra.mxu0 %v5145_v22  ;;  %2026 = vmatpush1.bf16.msra.mxu1 %v5146_v11  ;;  %v5229_v22 = vld [vmem:[#allocation37_spill] sm:$0xff]  ;;  %v5230_v11 = vld [vmem:[#allocation38_spill] sm:$0xff] }
 0x9cd   :  { %1986 = vmatprep.subr.bf16.mxu0 %v5147_v9  ;;  %2027 = vmatprep.subr.bf16.mxu1 %v5148_v7  ;;  %v5231_v9 = vld [vmem:[#allocation39_spill] sm:$0xff]  ;;  %v5232_v7 = vld [vmem:[#allocation40_spill] sm:$0xff] }
 0x9d0   :  { %1987 = vmatpush1.bf16.msra.mxu0 %v5149_v41  ;;  %2028 = vmatpush1.bf16.msra.mxu1 %v5150_v8  ;;  %v5233_v41 = vld [vmem:[#allocation41_spill] sm:$0xff]  ;;  %v5234_v8 = vld [vmem:[#allocation42_spill] sm:$0xff] }
 0x9d1   :  { %1988 = vmatprep.subr.bf16.mxu0 %v5220_v57  ;;  %2029 = vmatprep.subr.bf16.mxu1 %v5221_v6 }
 0x9d4   :  { %1989 = vmatpush1.bf16.msra.mxu0 %v5222_v17  ;;  %2030 = vmatpush1.bf16.msra.mxu1 %v5223_v18 }
 0x9d5   :  { %1990 = vmatprep.subr.bf16.mxu0 %v5224_v26  ;;  %2031 = vmatprep.subr.bf16.mxu1 %v5225_v4 }
 0x9d8   :  { %1991 = vmatpush1.bf16.msra.mxu0 %v5226_v30  ;;  %2032 = vmatpush1.bf16.msra.mxu1 %v5227_v16 }
 0x9d9   :  { %1992 = vmatprep.subr.bf16.mxu0 %v5228_v5  ;;  %2033 = vmatprep.subr.bf16.mxu1 %v5229_v22 }
 0x9dc   :  { %1993 = vmatpush1.bf16.msra.mxu0 %v5230_v11  ;;  %2034 = vmatpush1.bf16.msra.mxu1 %v5231_v9 }
 0x9dd   :  { %1994 = vmatprep.subr.bf16.mxu0 %v5232_v7  ;;  %2035 = vmatprep.subr.bf16.mxu1 %v5233_v41 }
 0x9e0   :  { %1995 = vmatpush1.bf16.msra.mxu0 %v5234_v8  ;;  %2036 = vmatpush1.bf16.msra.mxu1 %v5235_v28 }
 0x9e1   :  { %3028 = vmatprep.subr.bf16.mxu1 %v3298_v19  ;;  %2996 = vmatprep.subr.bf16.mxu0 %v3299_v53 }
 0x9e3   :  { %2013 = vmatmul.mubr.bf16.vlgmr.msra.gmra.mrb[40].mxu0 %v1896_v45  ;;  %2054 = vmatmul.mubr.bf16.vlgmr.msra.gmra.mrb[40].mxu1 %v1896_v45 }
 0x9e4   :  { %3030 = vmatpush1.bf16.msra.mxu1 %v3300_v12  ;;  %2241 = vmatprep.mubr.f32.mxu1 %v5087_v52 }
 0x9e5   :  { %3032 = vmatprep.subr.bf16.mxu1 %v3301_v55  ;;  %2998 = vmatpush1.bf16.msra.mxu0 %v3302_v1  ;;  %v3331_v1 = vld [vmem:[%s4900_s9] sm:$0xff]  }
 0x9e6   :  { %3000 = vmatprep.subr.bf16.mxu0 %v3303_v2  ;;  %2170 = vmatprep.mubr.f32.mxu0 %v5087_v52  ;;  %v3332_v2 = vld [vmem:[%s4900_s9 + $0x48] sm:$0xff]  }
 0x9e8   :  { %3034 = vmatpush1.bf16.msra.mxu1 %v3304_v15 }
 0x9e9   :  { %3036 = vmatprep.subr.bf16.mxu1 %v3305_v24  ;;  %3002 = vmatpush1.bf16.msra.mxu0 %v3306_v29  ;;  %v3333_v29 = vld [vmem:[%s4900_s9 + $0x8] sm:$0xff]  }
 0x9ea   :  { %3004 = vmatprep.subr.bf16.mxu0 %v3307_v61  ;;  %v3334_v61 = vld [vmem:[%s4900_s9 + $0x50] sm:$0xff]  }
 0x9ec   :  { %3038 = vmatpush1.bf16.msra.mxu1 %v3308_v46 }
 0x9ed   :  { %3040 = vmatprep.subr.bf16.mxu1 %v3309_v3  ;;  %3006 = vmatpush1.bf16.msra.mxu0 %v3310_v63  ;;  %v3335_v63 = vld [vmem:[%s4900_s9 + $0x10] sm:$0xff]  }
 0x9ee   :  { %3008 = vmatprep.subr.bf16.mxu0 %v3311_v34  ;;  %v3336_v34 = vld [vmem:[%s4900_s9 + $0x58] sm:$0xff]  }
 0x9f0   :  { %3042 = vmatpush1.bf16.msra.mxu1 %v3312_v23 }
 0x9f1   :  { %3044 = vmatprep.subr.bf16.mxu1 %v3313_v25  ;;  %3010 = vmatpush1.bf16.msra.mxu0 %v3314_v33  ;;  %v3337_v33 = vld [vmem:[%s4900_s9 + $0x18] sm:$0xff]  }
 0x9f2   :  { %3012 = vmatprep.subr.bf16.mxu0 %v3315_v35  ;;  %v3338_v35 = vld [vmem:[%s4900_s9 + $0x60] sm:$0xff]  }
 0x9f4   :  { %3046 = vmatpush1.bf16.msra.mxu1 %v3316_v36 }
 0x9f5   :  { %3048 = vmatprep.subr.bf16.mxu1 %v3317_v47  ;;  %3014 = vmatpush1.bf16.msra.mxu0 %v3318_v50  ;;  %v3339_v47 = vld [vmem:[%s4900_s9 + $0x20] sm:$0xff]   ;;  %v3340_v50 = vld [vmem:[%s4900_s9 + $0x68] sm:$0xff]  }
 0x9f6   :  { %3016 = vmatprep.subr.bf16.mxu0 %v3319_v60  ;;  %v3341_v60 = vld [vmem:[%s4900_s9 + $0x28] sm:$0xff]  }
 0x9f8   :  { %3050 = vmatpush1.bf16.msra.mxu1 %v3320_v20  ;;  %v1874_v32 = vpop.f32.mrb[32].mxu1  ;;  %v3342_v20 = vld [vmem:[%s4900_s9 + $0x70] sm:$0xff]  }
 0x9f9   :  { %v2801_v42 = vpop.f32.mrb[33].mxu1  ;;  %3052 = vmatprep.subr.bf16.mxu1 %v3321_v21  ;;  %v1880_v40 = vsel %vm484_vm1, %v1874_v32, -1e+30  ;;  %3018 = vmatpush1.bf16.msra.mxu0 %v3322_v37  ;;  %v3343_v32 = vld [vmem:[%s4900_s9 + $0x30] sm:$0xff]   ;;  %v3345_v21 = vld [vmem:[%s4900_s9 + $0x38] sm:$0xff]  }
 0x9fa   :  { %1881 = vmax.xlane.f32.xlu1 %v1880_v40  ;;  %v1877_v27 = vpop.f32.mrb[34].mxu1  ;;  %3020 = vmatprep.subr.bf16.mxu0 %v3323_v10  ;;  %v3344_v42 = vld [vmem:[%s4900_s9 + $0x78] sm:$0xff]  }
 0x9fb   :  { %v2802_v0 = vpop.f32.mrb[35].mxu1 }
 0x9fc   :  { %3054 = vmatpush1.bf16.msra.mxu1 %v3324_v44 }
 0x9fd   :  { %3056 = vmatprep.subr.bf16.mxu1 %v3325_v59  ;;  %3022 = vmatpush1.bf16.msra.mxu0 %v3326_v14 }
 0x9fe   :  { %3024 = vmatprep.subr.bf16.mxu0 %v3327_v51 }
 0xa00   :  { %3058 = vmatpush1.bf16.msra.mxu1 %v3328_v43 }
 0xa01   :  { %3026 = vmatpush1.bf16.msra.mxu0 %v3329_v58 }
 0xa02   :  { %3060 = vmatprep.subr.bf16.mxu0 %v3330_v49 }
 0xa03   :  { %2242 = vmatmul.mubr.f32.vlgmr.msra.gmra.mrb[30].mxu1 %v4618_v31 }
 0xa87   :  { %v1882_v54 = vpop.xlane.xlu1 %1881 }
 0xa88   :  { %v1883_v56 = vsub.f32 %v1880_v40, %v1882_v54 }
 0xa8a   :  { %v1884_v62 = vmul.f32 1.442695, %v1883_v56 }
 0xa8c   :  { %3273 = vpow2.f32 %v1884_v62 }
 0xa96   :  { %v3274_v13 = vpop.eup %3273  ;;  %v4758_v38 = vpop.f32.mrb[36].mxu0 }
 0xa97   :  { %v4760_v48 = vpop.f32.mrb[36].mxu1  ;;  %v4762_v45 = vpop.f32.mrb[37].mxu0  ;;  %1886 = vadd.xlane.f32.xlu1 %v3274_v13 }
 0xa98   :  { %v4764_v57 = vpop.f32.mrb[37].mxu1  ;;  %v1936_v6 = vpop.f32.mrb[38].mxu0 }
 0xa99   :  { %v1977_v17 = vpop.f32.mrb[38].mxu1  ;;  %v1937_v18 = vpop.f32.mrb[39].mxu0 }
 0xa9a   :  { %v1978_v26 = vpop.f32.mrb[39].mxu1 }
 0xab6   :  { %v4766_v4 = vpop.f32.mrb[40].mxu0  ;;  %v4768_v30 = vpop.f32.mrb[40].mxu1 }
 0xab7   :  { %v4770_v16 = vpop.f32.mrb[41].mxu0  ;;  %v4772_v5 = vpop.f32.mrb[41].mxu1 }
 0xab8   :  { %v2018_v22 = vpop.f32.mrb[42].mxu0  ;;  %v2059_v11 = vpop.f32.mrb[42].mxu1 }
 0xab9   :  { %v2019_v9 = vpop.f32.mrb[43].mxu0  ;;  %v2060_v7 = vpop.f32.mrb[43].mxu1 }
 0xad6   :  { %v4774_v41 = vpop.f32.mrb[30].mxu1 }
 0xad7   :  { %v4776_v8 = vpop.f32.mrb[31].mxu1 }
 0xb24   :  { %v1887_v28 = vpop.xlane.xlu1 %1886 }
 0xb25   :  { %3275 = vrcp.f32 %v1887_v28 }
 0xb2f   :  { %v3276_v19 = vpop.eup %3275 }
 0xb30   :  { %v4778_v53 = vmul.f32 %v3276_v19, %v3274_v13 }
 0xb32   :  { %2171 = vmatmul.mubr.f32.vlgmr.msra.gmra.mrb[30].mxu0 %v4778_v53  ;;  %v2066_v12 = vsel %vm993_vm10, %v4778_v53, 0.0  ;;  %v2062_v55 = vsel %vm988_vm3, %v4778_v53, 0.0  ;;  %v2076_v15 = vsel %vm1005_vm11, %v4778_v53, 0.0  ;;  %v2071_v24 = vsel %vm999_vm4, %v4778_v53, 0.0 }
 0xb33   :  { %2067 = vadd.xlane.f32.xlu1 %v2066_v12  ;;  %2063 = vadd.xlane.f32.xlu0 %v2062_v55  ;;  %v2086_v46 = vsel %vm1017_vm12, %v4778_v53, 0.0  ;;  %v2081_v3 = vsel %vm1011_vm5, %v4778_v53, 0.0  ;;  %v2096_v23 = vsel %vm1029_vm13, %v4778_v53, 0.0  ;;  %v2091_v25 = vsel %vm1023_vm6, %v4778_v53, 0.0 }
 0xb34   :  { %3062 = vmatpush3.bf16.msra.mxu0 %v3331_v1  ;;  %v2101_v36 = vsel %vm1035_vm7, %v4778_v53, 0.0 }
 0xb35   :  { %3064 = vmatprep.subr.bf16.mxu0 %v3332_v2 }
 0xb37   :  { %2077 = vadd.xlane.f32.xlu1 %v2076_v15  ;;  %2072 = vadd.xlane.f32.xlu0 %v2071_v24 }
 0xb38   :  { %3066 = vmatpush3.bf16.msra.mxu0 %v3333_v29 }
 0xb39   :  { %3068 = vmatprep.subr.bf16.mxu0 %v3334_v61 }
 0xb3b   :  { %2087 = vadd.xlane.f32.xlu1 %v2086_v46  ;;  %2082 = vadd.xlane.f32.xlu0 %v2081_v3 }
 0xb3c   :  { %3070 = vmatpush3.bf16.msra.mxu0 %v3335_v63  ;;  %v5237_v63 = vld [vmem:[#allocation92_spill] sm:$0xff] }
 0xb3d   :  { %3072 = vmatprep.subr.bf16.mxu0 %v3336_v34 }
 0xb3f   :  { %2097 = vadd.xlane.f32.xlu1 %v2096_v23  ;;  %2092 = vadd.xlane.f32.xlu0 %v2091_v25 }
 0xb40   :  { %3074 = vmatpush3.bf16.msra.mxu0 %v3337_v33 }
 0xb41   :  { %3076 = vmatprep.subr.bf16.mxu0 %v3338_v35 }
 0xb43   :  { %2102 = vadd.xlane.f32.xlu0 %v2101_v36 }
 0xb44   :  { %3078 = vmatpush3.bf16.msra.mxu0 %v3339_v47 }
 0xb45   :  { %3080 = vmatprep.subr.bf16.mxu0 %v3340_v50 }
 0xb48   :  { %3082 = vmatpush3.bf16.msra.mxu0 %v3341_v60 }
 0xb49   :  { %3084 = vmatprep.subr.bf16.mxu0 %v3342_v20 }
 0xb4c   :  { %3086 = vmatpush3.bf16.msra.mxu0 %v3343_v32 }
 0xb4d   :  { %3088 = vmatprep.subr.bf16.mxu0 %v3344_v42 }
 0xb50   :  { %3090 = vmatpush3.bf16.msra.mxu0 %v3345_v21 }
 0xbc0   :  { %v2068_v40 = vpop.xlane.xlu1 %2067  ;;  %v2064_v37 = vpop.xlane.xlu0 %2063 }
 0xbc1   :  { %v2069_v27 = vmul.f32 %v2068_v40, %v4758_v38  ;;  %v2065_v10 = vmul.f32 %v2064_v37, %v4618_v31  ;;  %v5238_v40 = vld [vmem:[#allocation93_spill] sm:$0xff] }
 0xbc3   :  { %v2070_v59 = vadd.f32 %v2069_v27, %v2065_v10  ;;  %v5239_v10 = vld [vmem:[#allocation14_spill] sm:$0xff] }
 0xbc4   :  { %v2078_v0 = vpop.xlane.xlu1 %2077  ;;  %v2073_v44 = vpop.xlane.xlu0 %2072 }
 0xbc5   :  { %v2074_v14 = vmul.f32 %v2073_v44, %v4762_v45  ;;  %v2079_v51 = vmul.f32 %v2078_v0, %v4760_v48  ;;  %v2349_v0 = vsel %vm1017_vm12, %v5239_v10, 0.0 }
 0xbc7   :  { %v2075_v43 = vadd.f32 %v2074_v14, %v2070_v59 }
 0xbc8   :  { %v2088_v58 = vpop.xlane.xlu1 %2087  ;;  %v2083_v49 = vpop.xlane.xlu0 %2082 }
 0xbc9   :  { %v2080_v54 = vadd.f32 %v2079_v51, %v2075_v43  ;;  %v2084_v56 = vmul.f32 %v2083_v49, %v4764_v57  ;;  %v2089_v62 = vmul.f32 %v2088_v58, %v4766_v4 }
 0xbcb   :  { %v2085_v13 = vadd.f32 %v2084_v56, %v2080_v54 }
 0xbcc   :  { %v2098_v6 = vpop.xlane.xlu1 %2097  ;;  %v2093_v38 = vpop.xlane.xlu0 %2092 }
 0xbcd   :  { %v2090_v17 = vadd.f32 %v2089_v62, %v2085_v13  ;;  %v2094_v31 = vmul.f32 %v2093_v38, %v4770_v16  ;;  %v2099_v18 = vmul.f32 %v2098_v6, %v4768_v30  ;;  %v3346_v30 = vld [vmem:[%s4894_s0] sm:$0xff] }
 0xbcf   :  { %v2095_v26 = vadd.f32 %v2094_v31, %v2090_v17 }
 0xbd0   :  { %v2103_v45 = vpop.xlane.xlu0 %2102 }
 0xbd1   :  { %v2100_v22 = vadd.f32 %v2099_v18, %v2095_v26  ;;  %v2104_v48 = vmul.f32 %v2103_v45, %v4772_v5 }
 0xbd3   :  { %v2105_v11 = vadd.f32 %v2104_v48, %v2100_v22 }
 0xc05   :  { %v2172_v9 = vpop.f32.mrb[30].mxu0 }
 0xc06   :  { %v2248_v7 = vmul.f32 %v4774_v41, %v2172_v9  ;;  %v2174_v57 = vpop.f32.mrb[31].mxu0 }
 0xc07   :  { %v2249_v4 = vmul.f32 %v4776_v8, %v2174_v57  ;;  %v297_v8 = vld [vmem:[%s4901_s3] sm:$0xff] }
 0xc09   :  { %2314 = vmatprep.mubr.f32.mxu0 %v2249_v4 }
 0xc0a   :  { %2315 = vmatmul.mubr.f32.vlgmr.msra.gmra.mrb[44].mxu0 %v2248_v7 }
 0xcdd   :  { %v2680_v28 = vpop.f32.mrb[44].mxu0 }
 0xcde   :  { %v2681_v19 = vpop.f32.mrb[45].mxu0 }
 0xcdf   :  { %v2682_v12 = vadd.f32 %v2681_v19, %v2680_v28 }
 0xce1   :  { %v2320_v16 = vsub.f32 %v2105_v11, %v2682_v12 }
 0xce3   :  { %v2321_v55 = vmax.f32 %v2320_v16, 0.0 }
 0xce5   :  { %2322 = vadd.xlane.f32.xlu1 %v2321_v55 }
 0xce9   :  { %299 = vmax.xlane.f32.xlu1 %v3346_v30 }
 0xd72   :  { %v2323_v5 = vpop.xlane.xlu1 %2322 }
 0xd73   :  { %v2324_v1 = vmax.f32 %v2323_v5, 1e-20 }
 0xd75   :  { %3277 = vrcp.f32 %v2324_v1 }
 0xd76   :  { %v300_v3 = vpop.xlane.xlu1 %299 }
 0xd77   :  { %vm301_vm0 = vcmp.ge.f32.partialorder %v3346_v30, %v300_v3 }
 0xd78   :  { %v302_v34 = vsel %vm301_vm0, %v5237_v63, 128.0 }
 0xd7f   :  { %v3278_v41 = vpop.eup %3277 }
 0xd80   :  { %v2326_v2 = vmul.f32 %v3278_v41, %v2321_v55 }
 0xd82   :  { %v2334_v15 = vmul.f32 %v2326_v2, %v297_v8  ;;  %v2327_v24 = vmax.f32 %v2326_v2, 1e-20 }
 0xd84   :  { %2335 = vadd.xlane.f32.xlu0 %v2334_v15  ;;  %3279 = vlog2.f32 %v2327_v24 }
 0xd88   :  { %1890 = vmax.xlane.f32.xlu0 %v4778_v53 }
 0xd8e   :  { %v3280_v29 = vpop.eup %3279 }
 0xd8f   :  { %v2329_v61 = vmul.f32 0.6931472, %v3280_v29 }
 0xd91   :  { %v2330_v46 = vmul.f32 %v2329_v61, %v297_v8 }
 0xd93   :  { %2331 = vadd.xlane.f32.xlu1 %v2330_v46 }
 0xd97   :  { %303 = vmin.xlane.f32.xlu1 %v302_v34 }
 0xe11   :  { %v2336_v23 = vpop.xlane.xlu0 %2335 }
 0xe12   :  { %vm2337_vm1 = vcmp.gt.f32.partialorder %v2326_v2, %v2336_v23 }
 0xe13   :  { %v2444_v25 = vsel %vm2337_vm1, 1.0, %v5087_v52 }
 0xe14   :  { %2340 = vadd.xlane.f32.xlu0 %v2444_v25 }
 0xe15   :  { %v1891_v33 = vpop.xlane.xlu0 %1890 }
 0xe16   :  { %vm1892_vm3 = vcmp.ge.f32.partialorder %v4778_v53, %v1891_v33  ;;  %v2347_v53 = vsel %vm1011_vm5, %v5238_v40, 0.0 }
 0xe17   :  { %v1893_v35 = vsel %vm1892_vm3, %v5237_v63, 128.0 }
 0xe18   :  { %1894 = vmin.xlane.f32.xlu0 %v1893_v35 }
 0xe20   :  { %v2332_v36 = vpop.xlane.xlu1 %2331 }
 0xe21   :  { %v2333_v47 = vsub.f32 0.0, %v2332_v36 }
 0xe23   :  { %v2342_v20 = vsel %vm993_vm10, %v2333_v47, 0.0 }
 0xe24   :  { %v304_v50 = vpop.xlane.xlu1 %303 }
 0xe25   :  { %v2345_v52 = vsel %vm1005_vm11, %v304_v50, 0.0 }
 0xea1   :  { %v2341_v60 = vpop.xlane.xlu0 %2340 }
 0xea2   :  { %v2343_v32 = vsel %vm999_vm4, %v2341_v60, 0.0 }
 0xea3   :  { %v2344_v42 = vadd.f32 %v2343_v32, %v2342_v20 }
 0xea5   :  { %v2346_v21 = vadd.f32 %v2345_v52, %v2344_v42  ;;  %v1895_v27 = vpop.xlane.xlu0 %1894 }
 0xea6   :  { %v2351_v59 = vsel %vm1023_vm6, %v1895_v27, 0.0 }
 0xea7   :  { %v2348_v37 = vadd.f32 %v2347_v53, %v2346_v21 }
 0xea9   :  { %v2350_v44 = vadd.f32 %v2349_v0, %v2348_v37 }
 0xeab   :  { %v2352_v14 = vadd.f32 %v2351_v59, %v2350_v44 }
 0xead   :  { %2353 = vst [vmem:[%s4902_s10] sm:$0xff] %v2352_v14 }

</bundles_post_ra>
